<compile_context>
chip_gen: v7x
topology: tpu7x:2x2x1
jax: 0.10.0
libtpu: 0.0.40
codegen_flags: <defaults>
</compile_context>

<pallas_src>
import functools
import math

import jax
import jax.numpy as jnp
from jax.experimental import pallas as pl
from jax.experimental.pallas import tpu as pltpu


# ------------------------------------------------------------------ helpers --
def positional_encoding(length, d_model):
    """PE(pos, 2i)=sin(pos/10000^(2i/d)), PE(pos, 2i+1)=cos(...), (length, d_model)."""
    position = jnp.arange(length, dtype=jnp.float32)[:, None]
    div_term = jnp.exp(
        jnp.arange(0, d_model, 2, dtype=jnp.float32) * -(math.log(10000.0) / d_model)
    )
    ang = position * div_term
    pe = jnp.zeros((length, d_model), jnp.float32)
    pe = pe.at[:, 0::2].set(jnp.sin(ang))
    pe = pe.at[:, 1::2].set(jnp.cos(ang))
    return pe


def _layernorm(x, w, b, eps=1e-5):
    mean = jnp.mean(x, axis=-1, keepdims=True)
    var = jnp.mean((x - mean) ** 2, axis=-1, keepdims=True)
    return (x - mean) * jax.lax.rsqrt(var + eps) * w + b


# ------------------------------------------------------------------- kernel --
def globally_attentive_kernel(
    x_ref, pe_ref,
    ln1w_ref, ln1b_ref,
    wqkv_ref, bqkv_ref,
    wo_ref, bo_ref,
    ln2w_ref, ln2b_ref,
    g_ref, gt_ref,
    o_ref,
    q_scr, k_scr, v_scr, attn_scr,
    *, num_heads, sec,
):
    Sb, L, N = x_ref.shape

    # LayerNorm1 + positional encoding (PE broadcasts over the L tokens).
    x1 = _layernorm(x_ref[...], ln1w_ref[...], ln1b_ref[...]) + pe_ref[...]   # (Sb, L, N)
    x1_2d = x1.reshape(Sb * L, N)

    # Fused QKV projection: each section starts on a 128-lane boundary so the
    # Q/K/V slices below are vreg-aligned.  1/sqrt(Dh) is already folded into
    # the Q columns of wqkv/bqkv on the host.
    qkv = jnp.dot(x1_2d, wqkv_ref[...],
                  preferred_element_type=jnp.float32) + bqkv_ref[...]         # (Sb*L, 3*sec)
    q_scr[...] = qkv[:, 0:N].reshape(Sb, L, N)
    k_scr[...] = qkv[:, sec:sec + N].reshape(Sb, L, N)
    v_scr[...] = qkv[:, 2 * sec:2 * sec + N].reshape(Sb, L, N)

    g = g_ref[...]     # (N, H) 0/1 head-grouping matrix
    gt = gt_ref[...]   # (H, N)

    # Attention core, one s-slice at a time so only (L, L, N) / (L, L, H)
    # slabs are live per iteration (bounded live set -> no vreg spills).
    def attend(s, carry):
        q_s = q_scr[s]                                          # (L, N)
        k_s = k_scr[s]
        v_s = v_scr[s]
        # scores[l, m, h] = sum_{n in head h} q_s[l, n] * k_s[m, n]
        e = q_s[:, None, :] * k_s[None, :, :]                   # (L, L, N)
        scores = jnp.dot(e.reshape(L * L, N), g,
                         preferred_element_type=jnp.float32)
        scores = scores.reshape(L, L, num_heads)                # (l, m, h)
        # softmax over the key axis m (exact normalization).
        smax = jnp.max(scores, axis=1, keepdims=True)
        p = jnp.exp(scores - smax)
        p = p / jnp.sum(p, axis=1, keepdims=True)
        # expand probabilities back onto packed-head lanes and apply to V:
        # attn[l, n] = sum_m p[l, m, head(n)] * v_s[m, n]
        pexp = jnp.dot(p.reshape(L * L, num_heads), gt,
                       preferred_element_type=jnp.float32).reshape(L, L, N)
        attn_scr[s] = jnp.sum(pexp * v_s[None, :, :], axis=1)   # (L, N)
        return carry

    jax.lax.fori_loop(0, Sb, attend, 0, unroll=True)

    # Output projection, residual2 + Dropout(attn) (eval: identity), LN2, + residual1.
    attn2d = jnp.dot(attn_scr[...].reshape(Sb * L, N), wo_ref[...],
                     preferred_element_type=jnp.float32) + bo_ref[...]
    x2 = x1_2d + attn2d
    y = _layernorm(x2, ln2w_ref[...], ln2b_ref[...])
    o_ref[...] = y.reshape(Sb, L, N) + x_ref[...]


# ------------------------------------------------------------------ wrapper --
@functools.partial(jax.jit, static_argnames=("num_heads",))
def globally_attentive(x, params, num_heads):
    """x: (B, N, K, S) float32 -> (B, N, K, S) float32."""
    B, N, K, S = x.shape
    L = B * K
    H = num_heads
    Dh = N // H
    scale = 1.0 / math.sqrt(Dh)
    sec = ((N + 127) // 128) * 128          # 128-lane-aligned QKV section width

    # Single HBM transpose on the way in: (B,N,K,S) -> (S, L=B*K, N).
    xs = jnp.transpose(x, (3, 0, 2, 1)).reshape(S, L, N).astype(jnp.float32)
    pe = positional_encoding(S, N).reshape(S, 1, N)

    # Fused QKV weight (PyTorch computes x @ in_proj_w.T + in_proj_b).  Each
    # section is placed at a 128-lane boundary; the query scale is folded in.
    wq = params["in_proj_w"][:N].T * scale
    wk = params["in_proj_w"][N:2 * N].T
    wv = params["in_proj_w"][2 * N:].T
    bq = params["in_proj_b"][:N] * scale
    bk = params["in_proj_b"][N:2 * N]
    bv = params["in_proj_b"][2 * N:]

    wqkv = jnp.zeros((N, 3 * sec), jnp.float32)
    wqkv = wqkv.at[:, 0:N].set(wq)
    wqkv = wqkv.at[:, sec:sec + N].set(wk)
    wqkv = wqkv.at[:, 2 * sec:2 * sec + N].set(wv)
    bqkv = jnp.zeros((1, 3 * sec), jnp.float32)
    bqkv = bqkv.at[0, 0:N].set(bq)
    bqkv = bqkv.at[0, sec:sec + N].set(bk)
    bqkv = bqkv.at[0, 2 * sec:2 * sec + N].set(bv)

    wo = params["out_proj_w"].T
    bo = params["out_proj_b"].reshape(1, N)
    ln1w = params["ln1_w"].reshape(1, N)
    ln1b = params["ln1_b"].reshape(1, N)
    ln2w = params["ln2_w"].reshape(1, N)
    ln2b = params["ln2_b"].reshape(1, N)

    # 0/1 head-grouping matrix: G[n, h] = 1 iff feature n belongs to head h.
    g = (jnp.arange(N)[:, None] // Dh == jnp.arange(H)[None, :]).astype(jnp.float32)
    gt = g.T

    # Grid selection: a single step at small sizes (grid steps are a serial
    # loop on single-TensorCore chips); only split 2-way when each block is
    # big enough to amortize per-step overhead / feed both v7x cores.
    block_bytes = 7 * S * L * N * 4
    s_grid = 2 if (S % 2 == 0 and block_bytes // 2 >= (1 << 20)) else 1
    Sb = S // s_grid

    vec_spec = pl.BlockSpec((1, N), lambda i: (0, 0))
    out_sln = pl.pallas_call(
        functools.partial(globally_attentive_kernel, num_heads=H, sec=sec),
        out_shape=jax.ShapeDtypeStruct((S, L, N), jnp.float32),
        grid=(s_grid,),
        in_specs=[
            pl.BlockSpec((Sb, L, N), lambda i: (i, 0, 0)),     # tokens
            pl.BlockSpec((Sb, 1, N), lambda i: (i, 0, 0)),     # PE rows
            vec_spec, vec_spec,                                # ln1 w/b
            pl.BlockSpec((N, 3 * sec), lambda i: (0, 0)),      # fused Wqkv (padded)
            pl.BlockSpec((1, 3 * sec), lambda i: (0, 0)),      # fused bqkv
            pl.BlockSpec((N, N), lambda i: (0, 0)),            # Wo
            vec_spec,                                          # bo
            vec_spec, vec_spec,                                # ln2 w/b
            pl.BlockSpec((N, H), lambda i: (0, 0)),            # G
            pl.BlockSpec((H, N), lambda i: (0, 0)),            # G^T
        ],
        out_specs=pl.BlockSpec((Sb, L, N), lambda i: (i, 0, 0)),
        scratch_shapes=[
            pltpu.VMEM((Sb, L, N), jnp.float32),               # q
            pltpu.VMEM((Sb, L, N), jnp.float32),               # k
            pltpu.VMEM((Sb, L, N), jnp.float32),               # v
            pltpu.VMEM((Sb, L, N), jnp.float32),               # attn
        ],
        compiler_params=pltpu.CompilerParams(dimension_semantics=("parallel",)),
    )(xs, pe, ln1w, ln1b, wqkv, bqkv, wo, bo, ln2w, ln2b, g, gt)

    # Single HBM transpose on the way out: (S, L, N) -> (B, N, K, S).
    return jnp.transpose(out_sln.reshape(S, B, K, N), (1, 3, 2, 0))


# -------------------------------------------------------- pure-JAX reference --
def globally_attentive_ref(x, params, num_heads):
    B, N, K, S = x.shape
    L = B * K
    Dh = N // num_heads
    prec = jax.lax.Precision.HIGHEST

    xs = jnp.transpose(x, (0, 2, 3, 1)).reshape(L, S, N)            # (L, S, N)
    pe = positional_encoding(S, N)                                  # (S, N)

    x1 = _layernorm(xs, params["ln1_w"], params["ln1_b"]) + pe[None, :, :]
    residual2 = x1

    wq = params["in_proj_w"][:N]
    wk = params["in_proj_w"][N:2 * N]
    wv = params["in_proj_w"][2 * N:]
    bq = params["in_proj_b"][:N]
    bk = params["in_proj_b"][N:2 * N]
    bv = params["in_proj_b"][2 * N:]

    q = jnp.einsum("lsn,mn->lsm", x1, wq, precision=prec) + bq
    k = jnp.einsum("lsn,mn->lsm", x1, wk, precision=prec) + bk
    v = jnp.einsum("lsn,mn->lsm", x1, wv, precision=prec) + bv

    def split(t):   # (L, S, N) -> (S, H, L, Dh)
        return jnp.transpose(t.reshape(L, S, num_heads, Dh), (1, 2, 0, 3))

    qh = split(q) * (Dh ** -0.5)
    kh = split(k)
    vh = split(v)
    scores = jnp.einsum("shld,shmd->shlm", qh, kh, precision=prec)
    p = jax.nn.softmax(scores, axis=-1)
    o = jnp.einsum("shlm,shmd->shld", p, vh, precision=prec)
    o = jnp.transpose(o, (2, 0, 1, 3)).reshape(L, S, N)
    o = jnp.einsum("lsn,mn->lsm", o, params["out_proj_w"], precision=prec) + params["out_proj_b"]

    x2 = residual2 + o
    x3 = _layernorm(x2, params["ln2_w"], params["ln2_b"])
    out = jnp.transpose(x3.reshape(B, K, S, N), (0, 3, 1, 2)) + x
    return out


# --------------------------------------------------------------------- main --
if __name__ == "__main__":
    B, N, K, S = 2, 32, 4, 8          # in_channels = 32, attention seq len L = B*K = 8
    num_heads = 8

    key = jax.random.PRNGKey(0)
    ks = jax.random.split(key, 10)

    x = jax.random.normal(ks[0], (B, N, K, S), dtype=jnp.float32)

    params = {
        "ln1_w": 1.0 + 0.1 * jax.random.normal(ks[1], (N,), dtype=jnp.float32),
        "ln1_b": 0.05 * jax.random.normal(ks[2], (N,), dtype=jnp.float32),
        "in_proj_w": 0.1 * jax.random.normal(ks[3], (3 * N, N), dtype=jnp.float32),
        "in_proj_b": 0.02 * jax.random.normal(ks[4], (3 * N,), dtype=jnp.float32),
        "out_proj_w": 0.1 * jax.random.normal(ks[5], (N, N), dtype=jnp.float32),
        "out_proj_b": 0.02 * jax.random.normal(ks[6], (N,), dtype=jnp.float32),
        "ln2_w": 1.0 + 0.1 * jax.random.normal(ks[7], (N,), dtype=jnp.float32),
        "ln2_b": 0.05 * jax.random.normal(ks[8], (N,), dtype=jnp.float32),
    }

    out = jax.block_until_ready(globally_attentive(x, params, num_heads=num_heads))
    ref = jax.block_until_ready(globally_attentive_ref(x, params, num_heads))

    assert out.shape == (B, N, K, S)
    max_diff = float(jnp.max(jnp.abs(out - ref)))
    # The two dense projections keep DEFAULT (single-pass bf16-input) MXU
    # precision while the reference uses HIGHEST f32; softmax normalization is
    # now exact, so the drift is strictly smaller than the previous version.
    assert jnp.allclose(out, ref, atol=2e-2, rtol=2e-2), f"max abs diff = {max_diff}"

    print("KERNEL_OK")
</pallas_src>

<mosaic_0001>
module attributes {stable_mosaic.version = 11 : i64} {
  func.func @globally_attentive_kernel(%arg0: i32, %arg1: memref<8x8x32xf32, #tpu.memory_space<vmem>>, %arg2: memref<8x1x32xf32, #tpu.memory_space<vmem>>, %arg3: memref<1x32xf32, #tpu.memory_space<vmem>>, %arg4: memref<1x32xf32, #tpu.memory_space<vmem>>, %arg5: memref<32x384xf32, #tpu.memory_space<vmem>>, %arg6: memref<1x384xf32, #tpu.memory_space<vmem>>, %arg7: memref<32x32xf32, #tpu.memory_space<vmem>>, %arg8: memref<1x32xf32, #tpu.memory_space<vmem>>, %arg9: memref<1x32xf32, #tpu.memory_space<vmem>>, %arg10: memref<1x32xf32, #tpu.memory_space<vmem>>, %arg11: memref<32x8xf32, #tpu.memory_space<vmem>>, %arg12: memref<8x32xf32, #tpu.memory_space<vmem>>, %arg13: memref<8x8x32xf32, #tpu.memory_space<vmem>>, %arg14: memref<8x8x32xf32, #tpu.memory_space<vmem>>, %arg15: memref<8x8x32xf32, #tpu.memory_space<vmem>>, %arg16: memref<8x8x32xf32, #tpu.memory_space<vmem>>, %arg17: memref<8x8x32xf32, #tpu.memory_space<vmem>>) attributes {dimension_semantics = [#tpu.dimension_semantics<parallel>], iteration_bounds = array<i64: 1>, scalar_prefetch = 0 : i64, scratch_operands = 4 : i64, tpu.core_type = #tpu.core_type<tc>, window_params = [{transform_indices = @transform_0, window_bounds = array<i64: 8, 8, 32>}, {transform_indices = @transform_1, window_bounds = array<i64: 8, 1, 32>}, {pipeline_mode = #tpu.pipeline_mode<synchronous>, transform_indices = @transform_2, window_bounds = array<i64: 1, 32>}, {pipeline_mode = #tpu.pipeline_mode<synchronous>, transform_indices = @transform_3, window_bounds = array<i64: 1, 32>}, {pipeline_mode = #tpu.pipeline_mode<synchronous>, transform_indices = @transform_4, window_bounds = array<i64: 32, 384>}, {pipeline_mode = #tpu.pipeline_mode<synchronous>, transform_indices = @transform_5, window_bounds = array<i64: 1, 384>}, {pipeline_mode = #tpu.pipeline_mode<synchronous>, transform_indices = @transform_6, window_bounds = array<i64: 32, 32>}, {pipeline_mode = #tpu.pipeline_mode<synchronous>, transform_indices = @transform_7, window_bounds = array<i64: 1, 32>}, {pipeline_mode = #tpu.pipeline_mode<synchronous>, transform_indices = @transform_8, window_bounds = array<i64: 1, 32>}, {pipeline_mode = #tpu.pipeline_mode<synchronous>, transform_indices = @transform_9, window_bounds = array<i64: 1, 32>}, {pipeline_mode = #tpu.pipeline_mode<synchronous>, transform_indices = @transform_10, window_bounds = array<i64: 32, 8>}, {pipeline_mode = #tpu.pipeline_mode<synchronous>, transform_indices = @transform_11, window_bounds = array<i64: 8, 32>}, {transform_indices = @transform_12, window_bounds = array<i64: 8, 8, 32>}]} {
    %c0 = arith.constant 0 : index
    %c0_0 = arith.constant 0 : index
    %c0_1 = arith.constant 0 : index
    %0 = vector.load %arg1[%c0, %c0_0, %c0_1] : memref<8x8x32xf32, #tpu.memory_space<vmem>>, vector<8x8x32xf32>
    %c0_2 = arith.constant 0 : index
    %c0_3 = arith.constant 0 : index
    %1 = vector.load %arg3[%c0_2, %c0_3] : memref<1x32xf32, #tpu.memory_space<vmem>>, vector<1x32xf32>
    %c0_4 = arith.constant 0 : index
    %c0_5 = arith.constant 0 : index
    %2 = vector.load %arg4[%c0_4, %c0_5] : memref<1x32xf32, #tpu.memory_space<vmem>>, vector<1x32xf32>
    %cst = arith.constant dense<0.000000e+00> : vector<8x8xf32>
    %3 = vector.multi_reduction <add>, %0, %cst [2] : vector<8x8x32xf32> to vector<8x8xf32>
    %4 = vector.shape_cast %3 : vector<8x8xf32> to vector<8x8x1xf32>
    %cst_6 = arith.constant 3.200000e+01 : f32
    %5 = vector.broadcast %cst_6 : f32 to vector<8x8x1xf32>
    %6 = arith.divf %4, %5 : vector<8x8x1xf32>
    %7 = vector.broadcast %6 : vector<8x8x1xf32> to vector<8x8x32xf32>
    %8 = arith.subf %0, %7 : vector<8x8x32xf32>
    %9 = arith.mulf %8, %8 : vector<8x8x32xf32>
    %cst_7 = arith.constant dense<0.000000e+00> : vector<8x8xf32>
    %10 = vector.multi_reduction <add>, %9, %cst_7 [2] : vector<8x8x32xf32> to vector<8x8xf32>
    %11 = vector.shape_cast %10 : vector<8x8xf32> to vector<8x8x1xf32>
    %cst_8 = arith.constant 3.200000e+01 : f32
    %12 = vector.broadcast %cst_8 : f32 to vector<8x8x1xf32>
    %13 = arith.divf %11, %12 : vector<8x8x1xf32>
    %14 = vector.broadcast %6 : vector<8x8x1xf32> to vector<8x8x32xf32>
    %15 = arith.subf %0, %14 : vector<8x8x32xf32>
    %cst_9 = arith.constant 9.99999974E-6 : f32
    %16 = vector.broadcast %cst_9 : f32 to vector<8x8x1xf32>
    %17 = arith.addf %13, %16 : vector<8x8x1xf32>
    %18 = math.rsqrt %17 : vector<8x8x1xf32>
    %19 = vector.broadcast %18 : vector<8x8x1xf32> to vector<8x8x32xf32>
    %20 = arith.mulf %15, %19 : vector<8x8x32xf32>
    %21 = vector.shape_cast %1 : vector<1x32xf32> to vector<1x1x32xf32>
    %22 = vector.broadcast %21 : vector<1x1x32xf32> to vector<8x8x32xf32>
    %23 = arith.mulf %20, %22 : vector<8x8x32xf32>
    %24 = vector.shape_cast %2 : vector<1x32xf32> to vector<1x1x32xf32>
    %25 = vector.broadcast %24 : vector<1x1x32xf32> to vector<8x8x32xf32>
    %26 = arith.addf %23, %25 : vector<8x8x32xf32>
    %c0_10 = arith.constant 0 : index
    %c0_11 = arith.constant 0 : index
    %c0_12 = arith.constant 0 : index
    %27 = vector.load %arg2[%c0_10, %c0_11, %c0_12] : memref<8x1x32xf32, #tpu.memory_space<vmem>>, vector<8x1x32xf32>
    %28 = vector.broadcast %27 : vector<8x1x32xf32> to vector<8x8x32xf32>
    %29 = arith.addf %26, %28 : vector<8x8x32xf32>
    %30 = vector.shape_cast %29 : vector<8x8x32xf32> to vector<64x32xf32>
    %c0_13 = arith.constant 0 : index
    %c0_14 = arith.constant 0 : index
    %31 = vector.load %arg5[%c0_13, %c0_14] : memref<32x384xf32, #tpu.memory_space<vmem>>, vector<32x384xf32>
    %cst_15 = arith.constant dense<0.000000e+00> : vector<64x384xf32>
    %32 = tpu.matmul %30, %31, %cst_15 {dimension_numbers = #tpu.dot_dimension_numbers<[1], [0], [0], [1], [0, 0, 1, 1], [], []>} : vector<64x32xf32>, vector<32x384xf32>, vector<64x384xf32> -> vector<64x384xf32>
    %c0_16 = arith.constant 0 : index
    %c0_17 = arith.constant 0 : index
    %33 = vector.load %arg6[%c0_16, %c0_17] : memref<1x384xf32, #tpu.memory_space<vmem>>, vector<1x384xf32>
    %34 = vector.broadcast %33 : vector<1x384xf32> to vector<64x384xf32>
    %35 = arith.addf %32, %34 : vector<64x384xf32>
    %36 = vector.extract_strided_slice %35 {offsets = [0, 0], sizes = [64, 32], strides = [1, 1]} : vector<64x384xf32> to vector<64x32xf32>
    %37 = vector.shape_cast %36 : vector<64x32xf32> to vector<8x8x32xf32>
    %c0_18 = arith.constant 0 : index
    %c0_19 = arith.constant 0 : index
    %c0_20 = arith.constant 0 : index
    %38 = vector.load %arg14[%c0_18, %c0_19, %c0_20] : memref<8x8x32xf32, #tpu.memory_space<vmem>>, vector<8x8x32xf32>
    tpu.vector_store %arg14[%c0_18, %c0_19, %c0_20], %37 {strides = array<i32>} : memref<8x8x32xf32, #tpu.memory_space<vmem>>, vector<8x8x32xf32>,
    %39 = vector.extract_strided_slice %35 {offsets = [0, 128], sizes = [64, 32], strides = [1, 1]} : vector<64x384xf32> to vector<64x32xf32>
    %40 = vector.shape_cast %39 : vector<64x32xf32> to vector<8x8x32xf32>
    %c0_21 = arith.constant 0 : index
    %c0_22 = arith.constant 0 : index
    %c0_23 = arith.constant 0 : index
    %41 = vector.load %arg15[%c0_21, %c0_22, %c0_23] : memref<8x8x32xf32, #tpu.memory_space<vmem>>, vector<8x8x32xf32>
    tpu.vector_store %arg15[%c0_21, %c0_22, %c0_23], %40 {strides = array<i32>} : memref<8x8x32xf32, #tpu.memory_space<vmem>>, vector<8x8x32xf32>,
    %42 = vector.extract_strided_slice %35 {offsets = [0, 256], sizes = [64, 32], strides = [1, 1]} : vector<64x384xf32> to vector<64x32xf32>
    %43 = vector.shape_cast %42 : vector<64x32xf32> to vector<8x8x32xf32>
    %c0_24 = arith.constant 0 : index
    %c0_25 = arith.constant 0 : index
    %c0_26 = arith.constant 0 : index
    %44 = vector.load %arg16[%c0_24, %c0_25, %c0_26] : memref<8x8x32xf32, #tpu.memory_space<vmem>>, vector<8x8x32xf32>
    tpu.vector_store %arg16[%c0_24, %c0_25, %c0_26], %43 {strides = array<i32>} : memref<8x8x32xf32, #tpu.memory_space<vmem>>, vector<8x8x32xf32>,
    %c0_27 = arith.constant 0 : index
    %c0_28 = arith.constant 0 : index
    %45 = vector.load %arg11[%c0_27, %c0_28] : memref<32x8xf32, #tpu.memory_space<vmem>>, vector<32x8xf32>
    %c0_29 = arith.constant 0 : index
    %c0_30 = arith.constant 0 : index
    %46 = vector.load %arg12[%c0_29, %c0_30] : memref<8x32xf32, #tpu.memory_space<vmem>>, vector<8x32xf32>
    %c0_i32 = arith.constant 0 : i32
    %47 = arith.index_cast %c0_i32 : i32 to index
    %c0_31 = arith.constant 0 : index
    %c0_32 = arith.constant 0 : index
    %48 = vector.load %arg14[%47, %c0_31, %c0_32] : memref<8x8x32xf32, #tpu.memory_space<vmem>>, vector<1x8x32xf32>
    %49 = vector.shape_cast %48 : vector<1x8x32xf32> to vector<8x32xf32>
    %50 = arith.index_cast %c0_i32 : i32 to index
    %c0_33 = arith.constant 0 : index
    %c0_34 = arith.constant 0 : index
    %51 = vector.load %arg15[%50, %c0_33, %c0_34] : memref<8x8x32xf32, #tpu.memory_space<vmem>>, vector<1x8x32xf32>
    %52 = vector.shape_cast %51 : vector<1x8x32xf32> to vector<8x32xf32>
    %53 = arith.index_cast %c0_i32 : i32 to index
    %c0_35 = arith.constant 0 : index
    %c0_36 = arith.constant 0 : index
    %54 = vector.load %arg16[%53, %c0_35, %c0_36] : memref<8x8x32xf32, #tpu.memory_space<vmem>>, vector<1x8x32xf32>
    %55 = vector.shape_cast %54 : vector<1x8x32xf32> to vector<8x32xf32>
    %56 = vector.shape_cast %49 : vector<8x32xf32> to vector<8x1x32xf32>
    %57 = vector.shape_cast %52 : vector<8x32xf32> to vector<1x8x32xf32>
    %58 = vector.broadcast %56 : vector<8x1x32xf32> to vector<8x8x32xf32>
    %59 = vector.broadcast %57 : vector<1x8x32xf32> to vector<8x8x32xf32>
    %60 = arith.mulf %58, %59 : vector<8x8x32xf32>
    %61 = vector.shape_cast %60 : vector<8x8x32xf32> to vector<64x32xf32>
    %cst_37 = arith.constant dense<0.000000e+00> : vector<64x8xf32>
    %62 = tpu.matmul %61, %45, %cst_37 {dimension_numbers = #tpu.dot_dimension_numbers<[1], [0], [0], [1], [0, 0, 1, 1], [], []>} : vector<64x32xf32>, vector<32x8xf32>, vector<64x8xf32> -> vector<64x8xf32>
    %63 = vector.shape_cast %62 : vector<64x8xf32> to vector<8x8x8xf32>
    %cst_38 = arith.constant dense<0xFF800000> : vector<8x8xf32>
    %64 = vector.multi_reduction <maximumf>, %63, %cst_38 [1] : vector<8x8x8xf32> to vector<8x8xf32>
    %65 = vector.shape_cast %64 : vector<8x8xf32> to vector<8x1x8xf32>
    %66 = vector.broadcast %65 : vector<8x1x8xf32> to vector<8x8x8xf32>
    %67 = arith.subf %63, %66 : vector<8x8x8xf32>
    %68 = math.exp %67 : vector<8x8x8xf32>
    %cst_39 = arith.constant dense<0.000000e+00> : vector<8x8xf32>
    %69 = vector.multi_reduction <add>, %68, %cst_39 [1] : vector<8x8x8xf32> to vector<8x8xf32>
    %70 = vector.shape_cast %69 : vector<8x8xf32> to vector<8x1x8xf32>
    %71 = vector.broadcast %70 : vector<8x1x8xf32> to vector<8x8x8xf32>
    %72 = arith.divf %68, %71 : vector<8x8x8xf32>
    %73 = vector.shape_cast %72 : vector<8x8x8xf32> to vector<64x8xf32>
    %cst_40 = arith.constant dense<0.000000e+00> : vector<64x32xf32>
    %74 = tpu.matmul %73, %46, %cst_40 {dimension_numbers = #tpu.dot_dimension_numbers<[1], [0], [0], [1], [0, 0, 1, 1], [], []>} : vector<64x8xf32>, vector<8x32xf32>, vector<64x32xf32> -> vector<64x32xf32>
    %75 = vector.shape_cast %74 : vector<64x32xf32> to vector<8x8x32xf32>
    %76 = vector.shape_cast %55 : vector<8x32xf32> to vector<1x8x32xf32>
    %77 = vector.broadcast %76 : vector<1x8x32xf32> to vector<8x8x32xf32>
    %78 = arith.mulf %75, %77 : vector<8x8x32xf32>
    %cst_41 = arith.constant dense<0.000000e+00> : vector<8x32xf32>
    %79 = vector.multi_reduction <add>, %78, %cst_41 [1] : vector<8x8x32xf32> to vector<8x32xf32>
    %80 = arith.index_cast %c0_i32 : i32 to index
    %c0_42 = arith.constant 0 : index
    %c0_43 = arith.constant 0 : index
    %81 = vector.load %arg17[%80, %c0_42, %c0_43] : memref<8x8x32xf32, #tpu.memory_space<vmem>>, vector<1x8x32xf32>
    %82 = vector.shape_cast %81 : vector<1x8x32xf32> to vector<8x32xf32>
    %83 = vector.shape_cast %79 : vector<8x32xf32> to vector<1x8x32xf32>
    tpu.vector_store %arg17[%80, %c0_42, %c0_43], %83 {strides = array<i32>} : memref<8x8x32xf32, #tpu.memory_space<vmem>>, vector<1x8x32xf32>,
    %c1_i32 = arith.constant 1 : i32
    %84 = arith.index_cast %c1_i32 : i32 to index
    %c0_44 = arith.constant 0 : index
    %c0_45 = arith.constant 0 : index
    %85 = vector.load %arg14[%84, %c0_44, %c0_45] : memref<8x8x32xf32, #tpu.memory_space<vmem>>, vector<1x8x32xf32>
    %86 = vector.shape_cast %85 : vector<1x8x32xf32> to vector<8x32xf32>
    %87 = arith.index_cast %c1_i32 : i32 to index
    %c0_46 = arith.constant 0 : index
    %c0_47 = arith.constant 0 : index
    %88 = vector.load %arg15[%87, %c0_46, %c0_47] : memref<8x8x32xf32, #tpu.memory_space<vmem>>, vector<1x8x32xf32>
    %89 = vector.shape_cast %88 : vector<1x8x32xf32> to vector<8x32xf32>
    %90 = arith.index_cast %c1_i32 : i32 to index
    %c0_48 = arith.constant 0 : index
    %c0_49 = arith.constant 0 : index
    %91 = vector.load %arg16[%90, %c0_48, %c0_49] : memref<8x8x32xf32, #tpu.memory_space<vmem>>, vector<1x8x32xf32>
    %92 = vector.shape_cast %91 : vector<1x8x32xf32> to vector<8x32xf32>
    %93 = vector.shape_cast %86 : vector<8x32xf32> to vector<8x1x32xf32>
    %94 = vector.shape_cast %89 : vector<8x32xf32> to vector<1x8x32xf32>
    %95 = vector.broadcast %93 : vector<8x1x32xf32> to vector<8x8x32xf32>
    %96 = vector.broadcast %94 : vector<1x8x32xf32> to vector<8x8x32xf32>
    %97 = arith.mulf %95, %96 : vector<8x8x32xf32>
    %98 = vector.shape_cast %97 : vector<8x8x32xf32> to vector<64x32xf32>
    %cst_50 = arith.constant dense<0.000000e+00> : vector<64x8xf32>
    %99 = tpu.matmul %98, %45, %cst_50 {dimension_numbers = #tpu.dot_dimension_numbers<[1], [0], [0], [1], [0, 0, 1, 1], [], []>} : vector<64x32xf32>, vector<32x8xf32>, vector<64x8xf32> -> vector<64x8xf32>
    %100 = vector.shape_cast %99 : vector<64x8xf32> to vector<8x8x8xf32>
    %cst_51 = arith.constant dense<0xFF800000> : vector<8x8xf32>
    %101 = vector.multi_reduction <maximumf>, %100, %cst_51 [1] : vector<8x8x8xf32> to vector<8x8xf32>
    %102 = vector.shape_cast %101 : vector<8x8xf32> to vector<8x1x8xf32>
    %103 = vector.broadcast %102 : vector<8x1x8xf32> to vector<8x8x8xf32>
    %104 = arith.subf %100, %103 : vector<8x8x8xf32>
    %105 = math.exp %104 : vector<8x8x8xf32>
    %cst_52 = arith.constant dense<0.000000e+00> : vector<8x8xf32>
    %106 = vector.multi_reduction <add>, %105, %cst_52 [1] : vector<8x8x8xf32> to vector<8x8xf32>
    %107 = vector.shape_cast %106 : vector<8x8xf32> to vector<8x1x8xf32>
    %108 = vector.broadcast %107 : vector<8x1x8xf32> to vector<8x8x8xf32>
    %109 = arith.divf %105, %108 : vector<8x8x8xf32>
    %110 = vector.shape_cast %109 : vector<8x8x8xf32> to vector<64x8xf32>
    %cst_53 = arith.constant dense<0.000000e+00> : vector<64x32xf32>
    %111 = tpu.matmul %110, %46, %cst_53 {dimension_numbers = #tpu.dot_dimension_numbers<[1], [0], [0], [1], [0, 0, 1, 1], [], []>} : vector<64x8xf32>, vector<8x32xf32>, vector<64x32xf32> -> vector<64x32xf32>
    %112 = vector.shape_cast %111 : vector<64x32xf32> to vector<8x8x32xf32>
    %113 = vector.shape_cast %92 : vector<8x32xf32> to vector<1x8x32xf32>
    %114 = vector.broadcast %113 : vector<1x8x32xf32> to vector<8x8x32xf32>
    %115 = arith.mulf %112, %114 : vector<8x8x32xf32>
    %cst_54 = arith.constant dense<0.000000e+00> : vector<8x32xf32>
    %116 = vector.multi_reduction <add>, %115, %cst_54 [1] : vector<8x8x32xf32> to vector<8x32xf32>
    %117 = arith.index_cast %c1_i32 : i32 to index
    %c0_55 = arith.constant 0 : index
    %c0_56 = arith.constant 0 : index
    %118 = vector.load %arg17[%117, %c0_55, %c0_56] : memref<8x8x32xf32, #tpu.memory_space<vmem>>, vector<1x8x32xf32>
    %119 = vector.shape_cast %118 : vector<1x8x32xf32> to vector<8x32xf32>
    %120 = vector.shape_cast %116 : vector<8x32xf32> to vector<1x8x32xf32>
    tpu.vector_store %arg17[%117, %c0_55, %c0_56], %120 {strides = array<i32>} : memref<8x8x32xf32, #tpu.memory_space<vmem>>, vector<1x8x32xf32>,
    %c2_i32 = arith.constant 2 : i32
    %121 = arith.index_cast %c2_i32 : i32 to index
    %c0_57 = arith.constant 0 : index
    %c0_58 = arith.constant 0 : index
    %122 = vector.load %arg14[%121, %c0_57, %c0_58] : memref<8x8x32xf32, #tpu.memory_space<vmem>>, vector<1x8x32xf32>
    %123 = vector.shape_cast %122 : vector<1x8x32xf32> to vector<8x32xf32>
    %124 = arith.index_cast %c2_i32 : i32 to index
    %c0_59 = arith.constant 0 : index
    %c0_60 = arith.constant 0 : index
    %125 = vector.load %arg15[%124, %c0_59, %c0_60] : memref<8x8x32xf32, #tpu.memory_space<vmem>>, vector<1x8x32xf32>
    %126 = vector.shape_cast %125 : vector<1x8x32xf32> to vector<8x32xf32>
    %127 = arith.index_cast %c2_i32 : i32 to index
    %c0_61 = arith.constant 0 : index
    %c0_62 = arith.constant 0 : index
    %128 = vector.load %arg16[%127, %c0_61, %c0_62] : memref<8x8x32xf32, #tpu.memory_space<vmem>>, vector<1x8x32xf32>
    %129 = vector.shape_cast %128 : vector<1x8x32xf32> to vector<8x32xf32>
    %130 = vector.shape_cast %123 : vector<8x32xf32> to vector<8x1x32xf32>
    %131 = vector.shape_cast %126 : vector<8x32xf32> to vector<1x8x32xf32>
    %132 = vector.broadcast %130 : vector<8x1x32xf32> to vector<8x8x32xf32>
    %133 = vector.broadcast %131 : vector<1x8x32xf32> to vector<8x8x32xf32>
    %134 = arith.mulf %132, %133 : vector<8x8x32xf32>
    %135 = vector.shape_cast %134 : vector<8x8x32xf32> to vector<64x32xf32>
    %cst_63 = arith.constant dense<0.000000e+00> : vector<64x8xf32>
    %136 = tpu.matmul %135, %45, %cst_63 {dimension_numbers = #tpu.dot_dimension_numbers<[1], [0], [0], [1], [0, 0, 1, 1], [], []>} : vector<64x32xf32>, vector<32x8xf32>, vector<64x8xf32> -> vector<64x8xf32>
    %137 = vector.shape_cast %136 : vector<64x8xf32> to vector<8x8x8xf32>
    %cst_64 = arith.constant dense<0xFF800000> : vector<8x8xf32>
    %138 = vector.multi_reduction <maximumf>, %137, %cst_64 [1] : vector<8x8x8xf32> to vector<8x8xf32>
    %139 = vector.shape_cast %138 : vector<8x8xf32> to vector<8x1x8xf32>
    %140 = vector.broadcast %139 : vector<8x1x8xf32> to vector<8x8x8xf32>
    %141 = arith.subf %137, %140 : vector<8x8x8xf32>
    %142 = math.exp %141 : vector<8x8x8xf32>
    %cst_65 = arith.constant dense<0.000000e+00> : vector<8x8xf32>
    %143 = vector.multi_reduction <add>, %142, %cst_65 [1] : vector<8x8x8xf32> to vector<8x8xf32>
    %144 = vector.shape_cast %143 : vector<8x8xf32> to vector<8x1x8xf32>
    %145 = vector.broadcast %144 : vector<8x1x8xf32> to vector<8x8x8xf32>
    %146 = arith.divf %142, %145 : vector<8x8x8xf32>
    %147 = vector.shape_cast %146 : vector<8x8x8xf32> to vector<64x8xf32>
    %cst_66 = arith.constant dense<0.000000e+00> : vector<64x32xf32>
    %148 = tpu.matmul %147, %46, %cst_66 {dimension_numbers = #tpu.dot_dimension_numbers<[1], [0], [0], [1], [0, 0, 1, 1], [], []>} : vector<64x8xf32>, vector<8x32xf32>, vector<64x32xf32> -> vector<64x32xf32>
    %149 = vector.shape_cast %148 : vector<64x32xf32> to vector<8x8x32xf32>
    %150 = vector.shape_cast %129 : vector<8x32xf32> to vector<1x8x32xf32>
    %151 = vector.broadcast %150 : vector<1x8x32xf32> to vector<8x8x32xf32>
    %152 = arith.mulf %149, %151 : vector<8x8x32xf32>
    %cst_67 = arith.constant dense<0.000000e+00> : vector<8x32xf32>
    %153 = vector.multi_reduction <add>, %152, %cst_67 [1] : vector<8x8x32xf32> to vector<8x32xf32>
    %154 = arith.index_cast %c2_i32 : i32 to index
    %c0_68 = arith.constant 0 : index
    %c0_69 = arith.constant 0 : index
    %155 = vector.load %arg17[%154, %c0_68, %c0_69] : memref<8x8x32xf32, #tpu.memory_space<vmem>>, vector<1x8x32xf32>
    %156 = vector.shape_cast %155 : vector<1x8x32xf32> to vector<8x32xf32>
    %157 = vector.shape_cast %153 : vector<8x32xf32> to vector<1x8x32xf32>
    tpu.vector_store %arg17[%154, %c0_68, %c0_69], %157 {strides = array<i32>} : memref<8x8x32xf32, #tpu.memory_space<vmem>>, vector<1x8x32xf32>,
    %c3_i32 = arith.constant 3 : i32
    %158 = arith.index_cast %c3_i32 : i32 to index
    %c0_70 = arith.constant 0 : index
    %c0_71 = arith.constant 0 : index
    %159 = vector.load %arg14[%158, %c0_70, %c0_71] : memref<8x8x32xf32, #tpu.memory_space<vmem>>, vector<1x8x32xf32>
    %160 = vector.shape_cast %159 : vector<1x8x32xf32> to vector<8x32xf32>
    %161 = arith.index_cast %c3_i32 : i32 to index
    %c0_72 = arith.constant 0 : index
    %c0_73 = arith.constant 0 : index
    %162 = vector.load %arg15[%161, %c0_72, %c0_73] : memref<8x8x32xf32, #tpu.memory_space<vmem>>, vector<1x8x32xf32>
    %163 = vector.shape_cast %162 : vector<1x8x32xf32> to vector<8x32xf32>
    %164 = arith.index_cast %c3_i32 : i32 to index
    %c0_74 = arith.constant 0 : index
    %c0_75 = arith.constant 0 : index
    %165 = vector.load %arg16[%164, %c0_74, %c0_75] : memref<8x8x32xf32, #tpu.memory_space<vmem>>, vector<1x8x32xf32>
    %166 = vector.shape_cast %165 : vector<1x8x32xf32> to vector<8x32xf32>
    %167 = vector.shape_cast %160 : vector<8x32xf32> to vector<8x1x32xf32>
    %168 = vector.shape_cast %163 : vector<8x32xf32> to vector<1x8x32xf32>
    %169 = vector.broadcast %167 : vector<8x1x32xf32> to vector<8x8x32xf32>
    %170 = vector.broadcast %168 : vector<1x8x32xf32> to vector<8x8x32xf32>
    %171 = arith.mulf %169, %170 : vector<8x8x32xf32>
    %172 = vector.shape_cast %171 : vector<8x8x32xf32> to vector<64x32xf32>
    %cst_76 = arith.constant dense<0.000000e+00> : vector<64x8xf32>
    %173 = tpu.matmul %172, %45, %cst_76 {dimension_numbers = #tpu.dot_dimension_numbers<[1], [0], [0], [1], [0, 0, 1, 1], [], []>} : vector<64x32xf32>, vector<32x8xf32>, vector<64x8xf32> -> vector<64x8xf32>
    %174 = vector.shape_cast %173 : vector<64x8xf32> to vector<8x8x8xf32>
    %cst_77 = arith.constant dense<0xFF800000> : vector<8x8xf32>
    %175 = vector.multi_reduction <maximumf>, %174, %cst_77 [1] : vector<8x8x8xf32> to vector<8x8xf32>
    %176 = vector.shape_cast %175 : vector<8x8xf32> to vector<8x1x8xf32>
    %177 = vector.broadcast %176 : vector<8x1x8xf32> to vector<8x8x8xf32>
    %178 = arith.subf %174, %177 : vector<8x8x8xf32>
    %179 = math.exp %178 : vector<8x8x8xf32>
    %cst_78 = arith.constant dense<0.000000e+00> : vector<8x8xf32>
    %180 = vector.multi_reduction <add>, %179, %cst_78 [1] : vector<8x8x8xf32> to vector<8x8xf32>
    %181 = vector.shape_cast %180 : vector<8x8xf32> to vector<8x1x8xf32>
    %182 = vector.broadcast %181 : vector<8x1x8xf32> to vector<8x8x8xf32>
    %183 = arith.divf %179, %182 : vector<8x8x8xf32>
    %184 = vector.shape_cast %183 : vector<8x8x8xf32> to vector<64x8xf32>
    %cst_79 = arith.constant dense<0.000000e+00> : vector<64x32xf32>
    %185 = tpu.matmul %184, %46, %cst_79 {dimension_numbers = #tpu.dot_dimension_numbers<[1], [0], [0], [1], [0, 0, 1, 1], [], []>} : vector<64x8xf32>, vector<8x32xf32>, vector<64x32xf32> -> vector<64x32xf32>
    %186 = vector.shape_cast %185 : vector<64x32xf32> to vector<8x8x32xf32>
    %187 = vector.shape_cast %166 : vector<8x32xf32> to vector<1x8x32xf32>
    %188 = vector.broadcast %187 : vector<1x8x32xf32> to vector<8x8x32xf32>
    %189 = arith.mulf %186, %188 : vector<8x8x32xf32>
    %cst_80 = arith.constant dense<0.000000e+00> : vector<8x32xf32>
    %190 = vector.multi_reduction <add>, %189, %cst_80 [1] : vector<8x8x32xf32> to vector<8x32xf32>
    %191 = arith.index_cast %c3_i32 : i32 to index
    %c0_81 = arith.constant 0 : index
    %c0_82 = arith.constant 0 : index
    %192 = vector.load %arg17[%191, %c0_81, %c0_82] : memref<8x8x32xf32, #tpu.memory_space<vmem>>, vector<1x8x32xf32>
    %193 = vector.shape_cast %192 : vector<1x8x32xf32> to vector<8x32xf32>
    %194 = vector.shape_cast %190 : vector<8x32xf32> to vector<1x8x32xf32>
    tpu.vector_store %arg17[%191, %c0_81, %c0_82], %194 {strides = array<i32>} : memref<8x8x32xf32, #tpu.memory_space<vmem>>, vector<1x8x32xf32>,
    %c4_i32 = arith.constant 4 : i32
    %195 = arith.index_cast %c4_i32 : i32 to index
    %c0_83 = arith.constant 0 : index
    %c0_84 = arith.constant 0 : index
    %196 = vector.load %arg14[%195, %c0_83, %c0_84] : memref<8x8x32xf32, #tpu.memory_space<vmem>>, vector<1x8x32xf32>
    %197 = vector.shape_cast %196 : vector<1x8x32xf32> to vector<8x32xf32>
    %198 = arith.index_cast %c4_i32 : i32 to index
    %c0_85 = arith.constant 0 : index
    %c0_86 = arith.constant 0 : index
    %199 = vector.load %arg15[%198, %c0_85, %c0_86] : memref<8x8x32xf32, #tpu.memory_space<vmem>>, vector<1x8x32xf32>
    %200 = vector.shape_cast %199 : vector<1x8x32xf32> to vector<8x32xf32>
    %201 = arith.index_cast %c4_i32 : i32 to index
    %c0_87 = arith.constant 0 : index
    %c0_88 = arith.constant 0 : index
    %202 = vector.load %arg16[%201, %c0_87, %c0_88] : memref<8x8x32xf32, #tpu.memory_space<vmem>>, vector<1x8x32xf32>
    %203 = vector.shape_cast %202 : vector<1x8x32xf32> to vector<8x32xf32>
    %204 = vector.shape_cast %197 : vector<8x32xf32> to vector<8x1x32xf32>
    %205 = vector.shape_cast %200 : vector<8x32xf32> to vector<1x8x32xf32>
    %206 = vector.broadcast %204 : vector<8x1x32xf32> to vector<8x8x32xf32>
    %207 = vector.broadcast %205 : vector<1x8x32xf32> to vector<8x8x32xf32>
    %208 = arith.mulf %206, %207 : vector<8x8x32xf32>
    %209 = vector.shape_cast %208 : vector<8x8x32xf32> to vector<64x32xf32>
    %cst_89 = arith.constant dense<0.000000e+00> : vector<64x8xf32>
    %210 = tpu.matmul %209, %45, %cst_89 {dimension_numbers = #tpu.dot_dimension_numbers<[1], [0], [0], [1], [0, 0, 1, 1], [], []>} : vector<64x32xf32>, vector<32x8xf32>, vector<64x8xf32> -> vector<64x8xf32>
    %211 = vector.shape_cast %210 : vector<64x8xf32> to vector<8x8x8xf32>
    %cst_90 = arith.constant dense<0xFF800000> : vector<8x8xf32>
    %212 = vector.multi_reduction <maximumf>, %211, %cst_90 [1] : vector<8x8x8xf32> to vector<8x8xf32>
    %213 = vector.shape_cast %212 : vector<8x8xf32> to vector<8x1x8xf32>
    %214 = vector.broadcast %213 : vector<8x1x8xf32> to vector<8x8x8xf32>
    %215 = arith.subf %211, %214 : vector<8x8x8xf32>
    %216 = math.exp %215 : vector<8x8x8xf32>
    %cst_91 = arith.constant dense<0.000000e+00> : vector<8x8xf32>
    %217 = vector.multi_reduction <add>, %216, %cst_91 [1] : vector<8x8x8xf32> to vector<8x8xf32>
    %218 = vector.shape_cast %217 : vector<8x8xf32> to vector<8x1x8xf32>
    %219 = vector.broadcast %218 : vector<8x1x8xf32> to vector<8x8x8xf32>
    %220 = arith.divf %216, %219 : vector<8x8x8xf32>
    %221 = vector.shape_cast %220 : vector<8x8x8xf32> to vector<64x8xf32>
    %cst_92 = arith.constant dense<0.000000e+00> : vector<64x32xf32>
    %222 = tpu.matmul %221, %46, %cst_92 {dimension_numbers = #tpu.dot_dimension_numbers<[1], [0], [0], [1], [0, 0, 1, 1], [], []>} : vector<64x8xf32>, vector<8x32xf32>, vector<64x32xf32> -> vector<64x32xf32>
    %223 = vector.shape_cast %222 : vector<64x32xf32> to vector<8x8x32xf32>
    %224 = vector.shape_cast %203 : vector<8x32xf32> to vector<1x8x32xf32>
    %225 = vector.broadcast %224 : vector<1x8x32xf32> to vector<8x8x32xf32>
    %226 = arith.mulf %223, %225 : vector<8x8x32xf32>
    %cst_93 = arith.constant dense<0.000000e+00> : vector<8x32xf32>
    %227 = vector.multi_reduction <add>, %226, %cst_93 [1] : vector<8x8x32xf32> to vector<8x32xf32>
    %228 = arith.index_cast %c4_i32 : i32 to index
    %c0_94 = arith.constant 0 : index
    %c0_95 = arith.constant 0 : index
    %229 = vector.load %arg17[%228, %c0_94, %c0_95] : memref<8x8x32xf32, #tpu.memory_space<vmem>>, vector<1x8x32xf32>
    %230 = vector.shape_cast %229 : vector<1x8x32xf32> to vector<8x32xf32>
    %231 = vector.shape_cast %227 : vector<8x32xf32> to vector<1x8x32xf32>
    tpu.vector_store %arg17[%228, %c0_94, %c0_95], %231 {strides = array<i32>} : memref<8x8x32xf32, #tpu.memory_space<vmem>>, vector<1x8x32xf32>,
    %c5_i32 = arith.constant 5 : i32
    %232 = arith.index_cast %c5_i32 : i32 to index
    %c0_96 = arith.constant 0 : index
    %c0_97 = arith.constant 0 : index
    %233 = vector.load %arg14[%232, %c0_96, %c0_97] : memref<8x8x32xf32, #tpu.memory_space<vmem>>, vector<1x8x32xf32>
    %234 = vector.shape_cast %233 : vector<1x8x32xf32> to vector<8x32xf32>
    %235 = arith.index_cast %c5_i32 : i32 to index
    %c0_98 = arith.constant 0 : index
    %c0_99 = arith.constant 0 : index
    %236 = vector.load %arg15[%235, %c0_98, %c0_99] : memref<8x8x32xf32, #tpu.memory_space<vmem>>, vector<1x8x32xf32>
    %237 = vector.shape_cast %236 : vector<1x8x32xf32> to vector<8x32xf32>
    %238 = arith.index_cast %c5_i32 : i32 to index
    %c0_100 = arith.constant 0 : index
    %c0_101 = arith.constant 0 : index
    %239 = vector.load %arg16[%238, %c0_100, %c0_101] : memref<8x8x32xf32, #tpu.memory_space<vmem>>, vector<1x8x32xf32>
    %240 = vector.shape_cast %239 : vector<1x8x32xf32> to vector<8x32xf32>
    %241 = vector.shape_cast %234 : vector<8x32xf32> to vector<8x1x32xf32>
    %242 = vector.shape_cast %237 : vector<8x32xf32> to vector<1x8x32xf32>
    %243 = vector.broadcast %241 : vector<8x1x32xf32> to vector<8x8x32xf32>
    %244 = vector.broadcast %242 : vector<1x8x32xf32> to vector<8x8x32xf32>
    %245 = arith.mulf %243, %244 : vector<8x8x32xf32>
    %246 = vector.shape_cast %245 : vector<8x8x32xf32> to vector<64x32xf32>
    %cst_102 = arith.constant dense<0.000000e+00> : vector<64x8xf32>
    %247 = tpu.matmul %246, %45, %cst_102 {dimension_numbers = #tpu.dot_dimension_numbers<[1], [0], [0], [1], [0, 0, 1, 1], [], []>} : vector<64x32xf32>, vector<32x8xf32>, vector<64x8xf32> -> vector<64x8xf32>
    %248 = vector.shape_cast %247 : vector<64x8xf32> to vector<8x8x8xf32>
    %cst_103 = arith.constant dense<0xFF800000> : vector<8x8xf32>
    %249 = vector.multi_reduction <maximumf>, %248, %cst_103 [1] : vector<8x8x8xf32> to vector<8x8xf32>
    %250 = vector.shape_cast %249 : vector<8x8xf32> to vector<8x1x8xf32>
    %251 = vector.broadcast %250 : vector<8x1x8xf32> to vector<8x8x8xf32>
    %252 = arith.subf %248, %251 : vector<8x8x8xf32>
    %253 = math.exp %252 : vector<8x8x8xf32>
    %cst_104 = arith.constant dense<0.000000e+00> : vector<8x8xf32>
    %254 = vector.multi_reduction <add>, %253, %cst_104 [1] : vector<8x8x8xf32> to vector<8x8xf32>
    %255 = vector.shape_cast %254 : vector<8x8xf32> to vector<8x1x8xf32>
    %256 = vector.broadcast %255 : vector<8x1x8xf32> to vector<8x8x8xf32>
    %257 = arith.divf %253, %256 : vector<8x8x8xf32>
    %258 = vector.shape_cast %257 : vector<8x8x8xf32> to vector<64x8xf32>
    %cst_105 = arith.constant dense<0.000000e+00> : vector<64x32xf32>
    %259 = tpu.matmul %258, %46, %cst_105 {dimension_numbers = #tpu.dot_dimension_numbers<[1], [0], [0], [1], [0, 0, 1, 1], [], []>} : vector<64x8xf32>, vector<8x32xf32>, vector<64x32xf32> -> vector<64x32xf32>
    %260 = vector.shape_cast %259 : vector<64x32xf32> to vector<8x8x32xf32>
    %261 = vector.shape_cast %240 : vector<8x32xf32> to vector<1x8x32xf32>
    %262 = vector.broadcast %261 : vector<1x8x32xf32> to vector<8x8x32xf32>
    %263 = arith.mulf %260, %262 : vector<8x8x32xf32>
    %cst_106 = arith.constant dense<0.000000e+00> : vector<8x32xf32>
    %264 = vector.multi_reduction <add>, %263, %cst_106 [1] : vector<8x8x32xf32> to vector<8x32xf32>
    %265 = arith.index_cast %c5_i32 : i32 to index
    %c0_107 = arith.constant 0 : index
    %c0_108 = arith.constant 0 : index
    %266 = vector.load %arg17[%265, %c0_107, %c0_108] : memref<8x8x32xf32, #tpu.memory_space<vmem>>, vector<1x8x32xf32>
    %267 = vector.shape_cast %266 : vector<1x8x32xf32> to vector<8x32xf32>
    %268 = vector.shape_cast %264 : vector<8x32xf32> to vector<1x8x32xf32>
    tpu.vector_store %arg17[%265, %c0_107, %c0_108], %268 {strides = array<i32>} : memref<8x8x32xf32, #tpu.memory_space<vmem>>, vector<1x8x32xf32>,
    %c6_i32 = arith.constant 6 : i32
    %269 = arith.index_cast %c6_i32 : i32 to index
    %c0_109 = arith.constant 0 : index
    %c0_110 = arith.constant 0 : index
    %270 = vector.load %arg14[%269, %c0_109, %c0_110] : memref<8x8x32xf32, #tpu.memory_space<vmem>>, vector<1x8x32xf32>
    %271 = vector.shape_cast %270 : vector<1x8x32xf32> to vector<8x32xf32>
    %272 = arith.index_cast %c6_i32 : i32 to index
    %c0_111 = arith.constant 0 : index
    %c0_112 = arith.constant 0 : index
    %273 = vector.load %arg15[%272, %c0_111, %c0_112] : memref<8x8x32xf32, #tpu.memory_space<vmem>>, vector<1x8x32xf32>
    %274 = vector.shape_cast %273 : vector<1x8x32xf32> to vector<8x32xf32>
    %275 = arith.index_cast %c6_i32 : i32 to index
    %c0_113 = arith.constant 0 : index
    %c0_114 = arith.constant 0 : index
    %276 = vector.load %arg16[%275, %c0_113, %c0_114] : memref<8x8x32xf32, #tpu.memory_space<vmem>>, vector<1x8x32xf32>
    %277 = vector.shape_cast %276 : vector<1x8x32xf32> to vector<8x32xf32>
    %278 = vector.shape_cast %271 : vector<8x32xf32> to vector<8x1x32xf32>
    %279 = vector.shape_cast %274 : vector<8x32xf32> to vector<1x8x32xf32>
    %280 = vector.broadcast %278 : vector<8x1x32xf32> to vector<8x8x32xf32>
    %281 = vector.broadcast %279 : vector<1x8x32xf32> to vector<8x8x32xf32>
    %282 = arith.mulf %280, %281 : vector<8x8x32xf32>
    %283 = vector.shape_cast %282 : vector<8x8x32xf32> to vector<64x32xf32>
    %cst_115 = arith.constant dense<0.000000e+00> : vector<64x8xf32>
    %284 = tpu.matmul %283, %45, %cst_115 {dimension_numbers = #tpu.dot_dimension_numbers<[1], [0], [0], [1], [0, 0, 1, 1], [], []>} : vector<64x32xf32>, vector<32x8xf32>, vector<64x8xf32> -> vector<64x8xf32>
    %285 = vector.shape_cast %284 : vector<64x8xf32> to vector<8x8x8xf32>
    %cst_116 = arith.constant dense<0xFF800000> : vector<8x8xf32>
    %286 = vector.multi_reduction <maximumf>, %285, %cst_116 [1] : vector<8x8x8xf32> to vector<8x8xf32>
    %287 = vector.shape_cast %286 : vector<8x8xf32> to vector<8x1x8xf32>
    %288 = vector.broadcast %287 : vector<8x1x8xf32> to vector<8x8x8xf32>
    %289 = arith.subf %285, %288 : vector<8x8x8xf32>
    %290 = math.exp %289 : vector<8x8x8xf32>
    %cst_117 = arith.constant dense<0.000000e+00> : vector<8x8xf32>
    %291 = vector.multi_reduction <add>, %290, %cst_117 [1] : vector<8x8x8xf32> to vector<8x8xf32>
    %292 = vector.shape_cast %291 : vector<8x8xf32> to vector<8x1x8xf32>
    %293 = vector.broadcast %292 : vector<8x1x8xf32> to vector<8x8x8xf32>
    %294 = arith.divf %290, %293 : vector<8x8x8xf32>
    %295 = vector.shape_cast %294 : vector<8x8x8xf32> to vector<64x8xf32>
    %cst_118 = arith.constant dense<0.000000e+00> : vector<64x32xf32>
    %296 = tpu.matmul %295, %46, %cst_118 {dimension_numbers = #tpu.dot_dimension_numbers<[1], [0], [0], [1], [0, 0, 1, 1], [], []>} : vector<64x8xf32>, vector<8x32xf32>, vector<64x32xf32> -> vector<64x32xf32>
    %297 = vector.shape_cast %296 : vector<64x32xf32> to vector<8x8x32xf32>
    %298 = vector.shape_cast %277 : vector<8x32xf32> to vector<1x8x32xf32>
    %299 = vector.broadcast %298 : vector<1x8x32xf32> to vector<8x8x32xf32>
    %300 = arith.mulf %297, %299 : vector<8x8x32xf32>
    %cst_119 = arith.constant dense<0.000000e+00> : vector<8x32xf32>
    %301 = vector.multi_reduction <add>, %300, %cst_119 [1] : vector<8x8x32xf32> to vector<8x32xf32>
    %302 = arith.index_cast %c6_i32 : i32 to index
    %c0_120 = arith.constant 0 : index
    %c0_121 = arith.constant 0 : index
    %303 = vector.load %arg17[%302, %c0_120, %c0_121] : memref<8x8x32xf32, #tpu.memory_space<vmem>>, vector<1x8x32xf32>
    %304 = vector.shape_cast %303 : vector<1x8x32xf32> to vector<8x32xf32>
    %305 = vector.shape_cast %301 : vector<8x32xf32> to vector<1x8x32xf32>
    tpu.vector_store %arg17[%302, %c0_120, %c0_121], %305 {strides = array<i32>} : memref<8x8x32xf32, #tpu.memory_space<vmem>>, vector<1x8x32xf32>,
    %c7_i32 = arith.constant 7 : i32
    %306 = arith.index_cast %c7_i32 : i32 to index
    %c0_122 = arith.constant 0 : index
    %c0_123 = arith.constant 0 : index
    %307 = vector.load %arg14[%306, %c0_122, %c0_123] : memref<8x8x32xf32, #tpu.memory_space<vmem>>, vector<1x8x32xf32>
    %308 = vector.shape_cast %307 : vector<1x8x32xf32> to vector<8x32xf32>
    %309 = arith.index_cast %c7_i32 : i32 to index
    %c0_124 = arith.constant 0 : index
    %c0_125 = arith.constant 0 : index
    %310 = vector.load %arg15[%309, %c0_124, %c0_125] : memref<8x8x32xf32, #tpu.memory_space<vmem>>, vector<1x8x32xf32>
    %311 = vector.shape_cast %310 : vector<1x8x32xf32> to vector<8x32xf32>
    %312 = arith.index_cast %c7_i32 : i32 to index
    %c0_126 = arith.constant 0 : index
    %c0_127 = arith.constant 0 : index
    %313 = vector.load %arg16[%312, %c0_126, %c0_127] : memref<8x8x32xf32, #tpu.memory_space<vmem>>, vector<1x8x32xf32>
    %314 = vector.shape_cast %313 : vector<1x8x32xf32> to vector<8x32xf32>
    %315 = vector.shape_cast %308 : vector<8x32xf32> to vector<8x1x32xf32>
    %316 = vector.shape_cast %311 : vector<8x32xf32> to vector<1x8x32xf32>
    %317 = vector.broadcast %315 : vector<8x1x32xf32> to vector<8x8x32xf32>
    %318 = vector.broadcast %316 : vector<1x8x32xf32> to vector<8x8x32xf32>
    %319 = arith.mulf %317, %318 : vector<8x8x32xf32>
    %320 = vector.shape_cast %319 : vector<8x8x32xf32> to vector<64x32xf32>
    %cst_128 = arith.constant dense<0.000000e+00> : vector<64x8xf32>
    %321 = tpu.matmul %320, %45, %cst_128 {dimension_numbers = #tpu.dot_dimension_numbers<[1], [0], [0], [1], [0, 0, 1, 1], [], []>} : vector<64x32xf32>, vector<32x8xf32>, vector<64x8xf32> -> vector<64x8xf32>
    %322 = vector.shape_cast %321 : vector<64x8xf32> to vector<8x8x8xf32>
    %cst_129 = arith.constant dense<0xFF800000> : vector<8x8xf32>
    %323 = vector.multi_reduction <maximumf>, %322, %cst_129 [1] : vector<8x8x8xf32> to vector<8x8xf32>
    %324 = vector.shape_cast %323 : vector<8x8xf32> to vector<8x1x8xf32>
    %325 = vector.broadcast %324 : vector<8x1x8xf32> to vector<8x8x8xf32>
    %326 = arith.subf %322, %325 : vector<8x8x8xf32>
    %327 = math.exp %326 : vector<8x8x8xf32>
    %cst_130 = arith.constant dense<0.000000e+00> : vector<8x8xf32>
    %328 = vector.multi_reduction <add>, %327, %cst_130 [1] : vector<8x8x8xf32> to vector<8x8xf32>
    %329 = vector.shape_cast %328 : vector<8x8xf32> to vector<8x1x8xf32>
    %330 = vector.broadcast %329 : vector<8x1x8xf32> to vector<8x8x8xf32>
    %331 = arith.divf %327, %330 : vector<8x8x8xf32>
    %332 = vector.shape_cast %331 : vector<8x8x8xf32> to vector<64x8xf32>
    %cst_131 = arith.constant dense<0.000000e+00> : vector<64x32xf32>
    %333 = tpu.matmul %332, %46, %cst_131 {dimension_numbers = #tpu.dot_dimension_numbers<[1], [0], [0], [1], [0, 0, 1, 1], [], []>} : vector<64x8xf32>, vector<8x32xf32>, vector<64x32xf32> -> vector<64x32xf32>
    %334 = vector.shape_cast %333 : vector<64x32xf32> to vector<8x8x32xf32>
    %335 = vector.shape_cast %314 : vector<8x32xf32> to vector<1x8x32xf32>
    %336 = vector.broadcast %335 : vector<1x8x32xf32> to vector<8x8x32xf32>
    %337 = arith.mulf %334, %336 : vector<8x8x32xf32>
    %cst_132 = arith.constant dense<0.000000e+00> : vector<8x32xf32>
    %338 = vector.multi_reduction <add>, %337, %cst_132 [1] : vector<8x8x32xf32> to vector<8x32xf32>
    %339 = arith.index_cast %c7_i32 : i32 to index
    %c0_133 = arith.constant 0 : index
    %c0_134 = arith.constant 0 : index
    %340 = vector.load %arg17[%339, %c0_133, %c0_134] : memref<8x8x32xf32, #tpu.memory_space<vmem>>, vector<1x8x32xf32>
    %341 = vector.shape_cast %340 : vector<1x8x32xf32> to vector<8x32xf32>
    %342 = vector.shape_cast %338 : vector<8x32xf32> to vector<1x8x32xf32>
    tpu.vector_store %arg17[%339, %c0_133, %c0_134], %342 {strides = array<i32>} : memref<8x8x32xf32, #tpu.memory_space<vmem>>, vector<1x8x32xf32>,
    %c8_i32 = arith.constant 8 : i32
    %c0_135 = arith.constant 0 : index
    %c0_136 = arith.constant 0 : index
    %c0_137 = arith.constant 0 : index
    %343 = vector.load %arg17[%c0_135, %c0_136, %c0_137] : memref<8x8x32xf32, #tpu.memory_space<vmem>>, vector<8x8x32xf32>
    %344 = vector.shape_cast %343 : vector<8x8x32xf32> to vector<64x32xf32>
    %c0_138 = arith.constant 0 : index
    %c0_139 = arith.constant 0 : index
    %345 = vector.load %arg7[%c0_138, %c0_139] : memref<32x32xf32, #tpu.memory_space<vmem>>, vector<32x32xf32>
    %cst_140 = arith.constant dense<0.000000e+00> : vector<64x32xf32>
    %346 = tpu.matmul %344, %345, %cst_140 {dimension_numbers = #tpu.dot_dimension_numbers<[1], [0], [0], [1], [0, 0, 1, 1], [], []>} : vector<64x32xf32>, vector<32x32xf32>, vector<64x32xf32> -> vector<64x32xf32>
    %c0_141 = arith.constant 0 : index
    %c0_142 = arith.constant 0 : index
    %347 = vector.load %arg8[%c0_141, %c0_142] : memref<1x32xf32, #tpu.memory_space<vmem>>, vector<1x32xf32>
    %348 = vector.broadcast %347 : vector<1x32xf32> to vector<64x32xf32>
    %349 = arith.addf %346, %348 : vector<64x32xf32>
    %350 = arith.addf %30, %349 : vector<64x32xf32>
    %c0_143 = arith.constant 0 : index
    %c0_144 = arith.constant 0 : index
    %351 = vector.load %arg9[%c0_143, %c0_144] : memref<1x32xf32, #tpu.memory_space<vmem>>, vector<1x32xf32>
    %c0_145 = arith.constant 0 : index
    %c0_146 = arith.constant 0 : index
    %352 = vector.load %arg10[%c0_145, %c0_146] : memref<1x32xf32, #tpu.memory_space<vmem>>, vector<1x32xf32>
    %cst_147 = arith.constant dense<0.000000e+00> : vector<64xf32>
    %353 = vector.multi_reduction <add>, %350, %cst_147 [1] : vector<64x32xf32> to vector<64xf32>
    %354 = vector.shape_cast %353 : vector<64xf32> to vector<64x1xf32>
    %cst_148 = arith.constant 3.200000e+01 : f32
    %355 = vector.broadcast %cst_148 : f32 to vector<64x1xf32>
    %356 = arith.divf %354, %355 : vector<64x1xf32>
    %357 = vector.broadcast %356 : vector<64x1xf32> to vector<64x32xf32>
    %358 = arith.subf %350, %357 : vector<64x32xf32>
    %359 = arith.mulf %358, %358 : vector<64x32xf32>
    %cst_149 = arith.constant dense<0.000000e+00> : vector<64xf32>
    %360 = vector.multi_reduction <add>, %359, %cst_149 [1] : vector<64x32xf32> to vector<64xf32>
    %361 = vector.shape_cast %360 : vector<64xf32> to vector<64x1xf32>
    %cst_150 = arith.constant 3.200000e+01 : f32
    %362 = vector.broadcast %cst_150 : f32 to vector<64x1xf32>
    %363 = arith.divf %361, %362 : vector<64x1xf32>
    %364 = vector.broadcast %356 : vector<64x1xf32> to vector<64x32xf32>
    %365 = arith.subf %350, %364 : vector<64x32xf32>
    %cst_151 = arith.constant 9.99999974E-6 : f32
    %366 = vector.broadcast %cst_151 : f32 to vector<64x1xf32>
    %367 = arith.addf %363, %366 : vector<64x1xf32>
    %368 = math.rsqrt %367 : vector<64x1xf32>
    %369 = vector.broadcast %368 : vector<64x1xf32> to vector<64x32xf32>
    %370 = arith.mulf %365, %369 : vector<64x32xf32>
    %371 = vector.broadcast %351 : vector<1x32xf32> to vector<64x32xf32>
    %372 = arith.mulf %370, %371 : vector<64x32xf32>
    %373 = vector.broadcast %352 : vector<1x32xf32> to vector<64x32xf32>
    %374 = arith.addf %372, %373 : vector<64x32xf32>
    %375 = vector.shape_cast %374 : vector<64x32xf32> to vector<8x8x32xf32>
    %c0_152 = arith.constant 0 : index
    %c0_153 = arith.constant 0 : index
    %c0_154 = arith.constant 0 : index
    %376 = vector.load %arg1[%c0_152, %c0_153, %c0_154] : memref<8x8x32xf32, #tpu.memory_space<vmem>>, vector<8x8x32xf32>
    %377 = arith.addf %375, %376 : vector<8x8x32xf32>
    %c0_155 = arith.constant 0 : index
    %c0_156 = arith.constant 0 : index
    %c0_157 = arith.constant 0 : index
    %378 = vector.load %arg13[%c0_155, %c0_156, %c0_157] : memref<8x8x32xf32, #tpu.memory_space<vmem>>, vector<8x8x32xf32>
    tpu.vector_store %arg13[%c0_155, %c0_156, %c0_157], %377 {strides = array<i32>} : memref<8x8x32xf32, #tpu.memory_space<vmem>>, vector<8x8x32xf32>,
    return
  }
  func.func @transform_0(%arg0: i32) -> (i32, i32, i32) {
    %c0_i32 = arith.constant 0 : i32
    %c0_i32_0 = arith.constant 0 : i32
    %c0_i32_1 = arith.constant 0 : i32
    return %arg0, %c0_i32, %c0_i32_0 : i32, i32, i32
  }
  func.func @transform_1(%arg0: i32) -> (i32, i32, i32) {
    %c0_i32 = arith.constant 0 : i32
    %c0_i32_0 = arith.constant 0 : i32
    %c0_i32_1 = arith.constant 0 : i32
    return %arg0, %c0_i32, %c0_i32_0 : i32, i32, i32
  }
  func.func @transform_2(%arg0: i32) -> (i32, i32) {
    %c0_i32 = arith.constant 0 : i32
    %c0_i32_0 = arith.constant 0 : i32
    %c0_i32_1 = arith.constant 0 : i32
    return %c0_i32, %c0_i32_0 : i32, i32
  }
  func.func @transform_3(%arg0: i32) -> (i32, i32) {
    %c0_i32 = arith.constant 0 : i32
    %c0_i32_0 = arith.constant 0 : i32
    %c0_i32_1 = arith.constant 0 : i32
    return %c0_i32, %c0_i32_0 : i32, i32
  }
  func.func @transform_4(%arg0: i32) -> (i32, i32) {
    %c0_i32 = arith.constant 0 : i32
    %c0_i32_0 = arith.constant 0 : i32
    %c0_i32_1 = arith.constant 0 : i32
    return %c0_i32, %c0_i32_0 : i32, i32
  }
  func.func @transform_5(%arg0: i32) -> (i32, i32) {
    %c0_i32 = arith.constant 0 : i32
    %c0_i32_0 = arith.constant 0 : i32
    %c0_i32_1 = arith.constant 0 : i32
    return %c0_i32, %c0_i32_0 : i32, i32
  }
  func.func @transform_6(%arg0: i32) -> (i32, i32) {
    %c0_i32 = arith.constant 0 : i32
    %c0_i32_0 = arith.constant 0 : i32
    %c0_i32_1 = arith.constant 0 : i32
    return %c0_i32, %c0_i32_0 : i32, i32
  }
  func.func @transform_7(%arg0: i32) -> (i32, i32) {
    %c0_i32 = arith.constant 0 : i32
    %c0_i32_0 = arith.constant 0 : i32
    %c0_i32_1 = arith.constant 0 : i32
    return %c0_i32, %c0_i32_0 : i32, i32
  }
  func.func @transform_8(%arg0: i32) -> (i32, i32) {
    %c0_i32 = arith.constant 0 : i32
    %c0_i32_0 = arith.constant 0 : i32
    %c0_i32_1 = arith.constant 0 : i32
    return %c0_i32, %c0_i32_0 : i32, i32
  }
  func.func @transform_9(%arg0: i32) -> (i32, i32) {
    %c0_i32 = arith.constant 0 : i32
    %c0_i32_0 = arith.constant 0 : i32
    %c0_i32_1 = arith.constant 0 : i32
    return %c0_i32, %c0_i32_0 : i32, i32
  }
  func.func @transform_10(%arg0: i32) -> (i32, i32) {
    %c0_i32 = arith.constant 0 : i32
    %c0_i32_0 = arith.constant 0 : i32
    %c0_i32_1 = arith.constant 0 : i32
    return %c0_i32, %c0_i32_0 : i32, i32
  }
  func.func @transform_11(%arg0: i32) -> (i32, i32) {
    %c0_i32 = arith.constant 0 : i32
    %c0_i32_0 = arith.constant 0 : i32
    %c0_i32_1 = arith.constant 0 : i32
    return %c0_i32, %c0_i32_0 : i32, i32
  }
  func.func @transform_12(%arg0: i32) -> (i32, i32, i32) {
    %c0_i32 = arith.constant 0 : i32
    %c0_i32_0 = arith.constant 0 : i32
    %c0_i32_1 = arith.constant 0 : i32
    return %arg0, %c0_i32, %c0_i32_0 : i32, i32, i32
  }
}

</mosaic_0001>

<bundles_post_ra>
// kernel: globally_attentive.1
= control target key start
LH: loop header
LB: loop body
LE: loop exit
PB: predicated region body
PF: predicated region fallthrough
CT: control target
= control target key end

     0   :  { %vm51_vm0 = vcmask 261120   ;;  %vm779_vm1 = vcmask 64512   ;;  %vm1133_vm2 = vcmask 1041409   ;;  %vm1135_vm3 = vcmask 1042434   ;;  %s8557_s0 = inlined_call_operand.vmem [shape: f32[8,8,32], index: 0, kind: input, shape index: {}]   ;;  %s8558_s4 = inlined_call_operand.vmem [shape: f32[32,384], index: 4, kind: input, shape index: {}]   ;;  %s8559_s2 = inlined_call_operand.vmem [shape: f32[1,32], index: 2, kind: input, shape index: {}]   ;;  %s8560_s3 = inlined_call_operand.vmem [shape: f32[1,32], index: 3, kind: input, shape index: {}]   ;;  %s8561_s1 = inlined_call_operand.vmem [shape: f32[8,1,32], index: 1, kind: input, shape index: {}]   ;;  %s8562_s10 = inlined_call_operand.vmem [shape: f32[32,8], index: 10, kind: input, shape index: {}]   ;;  %s8563_s5 = inlined_call_operand.vmem [shape: f32[1,384], index: 5, kind: input, shape index: {}]   ;;  %s8564_s11 = inlined_call_operand.vmem [shape: f32[8,32], index: 11, kind: input, shape index: {}]   ;;  %s8565_s6 = inlined_call_operand.vmem [shape: f32[32,32], index: 6, kind: input, shape index: {}]   ;;  %s8566_s7 = inlined_call_operand.vmem [shape: f32[1,32], index: 7, kind: input, shape index: {}]   ;;  %s8567_s8 = inlined_call_operand.vmem [shape: f32[1,32], index: 8, kind: input, shape index: {}]   ;;  %s8568_s9 = inlined_call_operand.vmem [shape: f32[1,32], index: 9, kind: input, shape index: {}]   ;;  %s8569_s12 = inlined_call_operand.vmem [shape: f32[8,8,32], index: 12, kind: output, shape index: {}]  }
   0x1   :  { %v41_v0 = vld [vmem:[%s8557_s0] sm:$0xff]  ;;  %v42_v1 = vld [vmem:[%s8557_s0 + $0x8] sm:$0xff]  ;;  %v43_v2 = vld [vmem:[%s8557_s0 + $0x10] sm:$0xff]  ;;  %vm1137_vm4 = vcmask 1043459   ;;  %vm1139_vm5 = vcmask 1044484   ;;  %vm1141_vm6 = vcmask 1045509  }
   0x2   :  { %v52_v3 = vsel %vm51_vm0, %v41_v0, 0.0  ;;  %v58_v4 = vsel %vm51_vm0, %v43_v2, 0.0  ;;  %v44_v5 = vld [vmem:[%s8557_s0 + $0x18] sm:$0xff]  ;;  %v55_v6 = vsel %vm51_vm0, %v42_v1, 0.0  ;;  %v45_v8 = vld [vmem:[%s8557_s0 + $0x20] sm:$0xff]  ;;  %v46_v10 = vld [vmem:[%s8557_s0 + $0x28] sm:$0xff] }
   0x3   :  { %53 = vadd.xlane.f32.xlu0 %v52_v3  ;;  %59 = vadd.xlane.f32.xlu1 %v58_v4  ;;  %v61_v7 = vsel %vm51_vm0, %v44_v5, 0.0  ;;  %v64_v9 = vsel %vm51_vm0, %v45_v8, 0.0  ;;  %v67_v11 = vsel %vm51_vm0, %v46_v10, 0.0  ;;  %v47_v12 = vld [vmem:[%s8557_s0 + $0x30] sm:$0xff]  ;;  %v48_v14 = vld [vmem:[%s8557_s0 + $0x38] sm:$0xff]  ;;  %v250_v56 = vld [vmem:[%s8558_s4 + $0x8] sm:$0xff] }
   0x4   :  { %v70_v13 = vsel %vm51_vm0, %v47_v12, 0.0  ;;  %v73_v15 = vsel %vm51_vm0, %v48_v14, 0.0  ;;  %v253_v57 = vld [vmem:[%s8558_s4 + $0x20] sm:$0xff]  ;;  %v252_v60 = vld [vmem:[%s8558_s4 + $0x18] sm:$0xff]  ;;  %v259_v63 = vld [vmem:[%s8558_s4 + $0x50] sm:$0xff]  ;;  %vm1143_vm7 = vcmask 1046534  }
   0x5   :  { %v6308_v58 = vpack.c.bf16 %v253_v57, %v250_v56  ;;  %v249_v59 = vld [vmem:[%s8558_s4] sm:$0xff]  ;;  %v256_v62 = vld [vmem:[%s8558_s4 + $0x38] sm:$0xff]  ;;  %v255_v3 = vld [vmem:[%s8558_s4 + $0x30] sm:$0xff]  ;;  %vm1145_vm8 = vcmask 1047559  }
   0x6   :  { %v6310_v61 = vpack.c.bf16 %v252_v60, %v249_v59  ;;  %v258_v4 = vld [vmem:[%s8558_s4 + $0x48] sm:$0xff] }
   0x7   :  { %56 = vadd.xlane.f32.xlu0 %v55_v6  ;;  %62 = vadd.xlane.f32.xlu1 %v61_v7  ;;  %v6314_v6 = vpack.c.bf16 %v258_v4, %v255_v3  ;;  %v257_v7 = vld [vmem:[%s8558_s4 + $0x40] sm:$0xff] }
   0x8   :  { %6309 = vmatprep.subr.bf16.mxu0 %v6308_v58 }
   0x9   :  { %6311 = vmatpush1.bf16.msra.mxu0 %v6310_v61 }
   0xb   :  { %65 = vadd.xlane.f32.xlu0 %v64_v9 }
   0xf   :  { %68 = vadd.xlane.f32.xlu0 %v67_v11 }
  0x13   :  { %71 = vadd.xlane.f32.xlu0 %v70_v13 }
  0x17   :  { %74 = vadd.xlane.f32.xlu0 %v73_v15 }
  0x90   :  { %v54_v16 = vpop.xlane.xlu0 %53  ;;  %v60_v17 = vpop.xlane.xlu1 %59 }
  0x91   :  { %v77_v18 = vmul.f32 0.03125, %v54_v16  ;;  %v79_v19 = vmul.f32 0.03125, %v60_v17 }
  0x93   :  { %v6794_v20 = vsub.f32 %v41_v0, %v77_v18  ;;  %v6796_v24 = vsub.f32 %v43_v2, %v79_v19  ;;  %v251_v0 = vld [vmem:[%s8558_s4 + $0x10] sm:$0xff]  ;;  %v254_v2 = vld [vmem:[%s8558_s4 + $0x28] sm:$0xff] }
  0x94   :  { %v57_v21 = vpop.xlane.xlu0 %56  ;;  %v63_v22 = vpop.xlane.xlu1 %62 }
  0x95   :  { %v78_v23 = vmul.f32 0.03125, %v57_v21  ;;  %v93_v25 = vmul.f32 %v6794_v20, %v6794_v20  ;;  %v80_v26 = vmul.f32 0.03125, %v63_v22  ;;  %v95_v33 = vmul.f32 %v6796_v24, %v6796_v24 }
  0x97   :  { %v6800_v27 = vsub.f32 %v42_v1, %v78_v23  ;;  %v101_v28 = vsel %vm51_vm0, %v93_v25, 0.0  ;;  %v6803_v31 = vsub.f32 %v44_v5, %v80_v26  ;;  %v107_v38 = vsel %vm51_vm0, %v95_v33, 0.0 }
  0x98   :  { %102 = vadd.xlane.f32.xlu1 %v101_v28  ;;  %v66_v29 = vpop.xlane.xlu0 %65  ;;  %v6312_v1 = vpack.c.bf16 %v259_v63, %v256_v62  ;;  %v6316_v5 = vpack.c.bf16 %v254_v2, %v251_v0  ;;  %v5644_v2 = vld [vmem:[%s8561_s1 + $0x3] ss:$0 sm:$0xff] }
  0x99   :  { %v81_v30 = vmul.f32 0.03125, %v66_v29  ;;  %v94_v32 = vmul.f32 %v6800_v27, %v6800_v27  ;;  %v96_v40 = vmul.f32 %v6803_v31, %v6803_v31 }
  0x9a   :  { %6313 = vmatprep.subr.bf16.mxu0 %v6312_v1  ;;  %6317 = vmatprep.subr.bf16.mxu1 %v6316_v5 }
  0x9b   :  { %v6809_v34 = vsub.f32 %v45_v8, %v81_v30  ;;  %v104_v35 = vsel %vm51_vm0, %v94_v32, 0.0  ;;  %v110_v45 = vsel %vm51_vm0, %v96_v40, 0.0  ;;  %6315 = vmatpush1.bf16.msra.mxu0 %v6314_v6  ;;  %v260_v8 = vld [vmem:[%s8558_s4 + $0x58] sm:$0xff]  ;;  %6319 = vmatpush3.bf16.msra.mxu1 %v6316_v5  ;;  %v6874_v30 = vld [vmem:[%s8559_s2] ss:$0 sm:$0xff] }
  0x9c   :  { %105 = vadd.xlane.f32.xlu1 %v104_v35  ;;  %v69_v36 = vpop.xlane.xlu0 %68  ;;  %v6320_v9 = vpack.c.bf16 %v260_v8, %v257_v7  ;;  %v5645_v6 = vld [vmem:[%s8561_s1 + $0x4] ss:$0 sm:$0xff] }
  0x9d   :  { %v82_v37 = vmul.f32 0.03125, %v69_v36  ;;  %v97_v39 = vmul.f32 %v6809_v34, %v6809_v34 }
  0x9e   :  { %6321 = vmatprep.subr.bf16.mxu1 %v6320_v9 }
  0x9f   :  { %v6817_v41 = vsub.f32 %v46_v10, %v82_v37  ;;  %v113_v42 = vsel %vm51_vm0, %v97_v39, 0.0  ;;  %v6695_v10 = vmov 0.0   ;;  %6323 = vmatpush3.bf16.msra.mxu1 %v6320_v9 }
  0xa0   :  { %108 = vadd.xlane.f32.xlu1 %v107_v38  ;;  %114 = vadd.xlane.f32.xlu0 %v113_v42  ;;  %v72_v43 = vpop.xlane.xlu0 %71  ;;  %v6880_v38 = vld [vmem:[%s8560_s3] ss:$0 sm:$0xff] }
  0xa1   :  { %v83_v44 = vmul.f32 0.03125, %v72_v43  ;;  %v98_v46 = vmul.f32 %v6817_v41, %v6817_v41  ;;  %366 = vmatprep.mubr.f32.mxu0 %v6695_v10 }
  0xa3   :  { %v6823_v47 = vsub.f32 %v47_v12, %v83_v44  ;;  %v116_v50 = vsel %vm51_vm0, %v98_v46, 0.0  ;;  %v5641_v44 = vld [vmem:[%s8561_s1] ss:$0 sm:$0xff] }
  0xa4   :  { %111 = vadd.xlane.f32.xlu1 %v110_v45  ;;  %v75_v48 = vpop.xlane.xlu0 %74 }
  0xa5   :  { %v84_v49 = vmul.f32 0.03125, %v75_v48  ;;  %v99_v51 = vmul.f32 %v6823_v47, %v6823_v47 }
  0xa7   :  { %v6828_v52 = vsub.f32 %v48_v14, %v84_v49  ;;  %v119_v53 = vsel %vm51_vm0, %v99_v51, 0.0 }
  0xa8   :  { %117 = vadd.xlane.f32.xlu1 %v116_v50  ;;  %120 = vadd.xlane.f32.xlu0 %v119_v53 }
  0xa9   :  { %v100_v54 = vmul.f32 %v6828_v52, %v6828_v52 }
  0xab   :  { %v122_v55 = vsel %vm51_vm0, %v100_v54, 0.0  ;;  %v5642_v54 = vld [vmem:[%s8561_s1 + $0x1] ss:$0 sm:$0xff] }
  0xac   :  { %123 = vadd.xlane.f32.xlu1 %v122_v55 }
 0x125   :  { %v103_v11 = vpop.xlane.xlu1 %102 }
 0x126   :  { %v125_v12 = vmul.f32 0.03125, %v103_v11 }
 0x128   :  { %v133_v13 = vadd.f32 1e-05, %v125_v12  ;;  %v5646_v12 = vld [vmem:[%s8561_s1 + $0x5] ss:$0 sm:$0xff] }
 0x129   :  { %v106_v14 = vpop.xlane.xlu1 %105 }
 0x12a   :  { %6405 = vrsqrt.f32 %v133_v13  ;;  %v126_v15 = vmul.f32 0.03125, %v106_v14 }
 0x12c   :  { %v134_v16 = vadd.f32 1e-05, %v126_v15  ;;  %v5647_v15 = vld [vmem:[%s8561_s1 + $0x6] ss:$0 sm:$0xff] }
 0x12d   :  { %v109_v17 = vpop.xlane.xlu1 %108  ;;  %v115_v18 = vpop.xlane.xlu0 %114 }
 0x12e   :  { %6407 = vrsqrt.f32 %v134_v16  ;;  %v127_v19 = vmul.f32 0.03125, %v109_v17  ;;  %v129_v21 = vmul.f32 0.03125, %v115_v18 }
 0x130   :  { %v135_v22 = vadd.f32 1e-05, %v127_v19  ;;  %v137_v23 = vadd.f32 1e-05, %v129_v21  ;;  %v5648_v19 = vld [vmem:[%s8561_s1 + $0x7] ss:$0 sm:$0xff] }
 0x131   :  { %v112_v25 = vpop.xlane.xlu1 %111 }
 0x132   :  { %6409 = vrsqrt.f32 %v135_v22  ;;  %v128_v26 = vmul.f32 0.03125, %v112_v25  ;;  %v545_v25 = vld [vmem:[%s8562_s10 + $0x8] sm:$0xff] }
 0x133   :  { %6411 = vrsqrt.f32 %v137_v23  ;;  %v544_v23 = vld [vmem:[%s8562_s10] sm:$0xff] }
 0x134   :  { %v6406_v28 = vpop.eup %6405  ;;  %v136_v29 = vadd.f32 1e-05, %v128_v26  ;;  %v6990_v26 = vpack.c.bf16 %v545_v25, %v544_v23 }
 0x135   :  { %v149_v32 = vmul.f32 %v6406_v28, %v6794_v20  ;;  %v118_v33 = vpop.xlane.xlu1 %117  ;;  %v121_v35 = vpop.xlane.xlu0 %120  ;;  %v547_v28 = vld [vmem:[%s8562_s10 + $0x18] sm:$0xff] }
 0x136   :  { %6413 = vrsqrt.f32 %v136_v29  ;;  %v130_v36 = vmul.f32 0.03125, %v118_v33  ;;  %v131_v37 = vmul.f32 0.03125, %v121_v35  ;;  %6325 = vmatprep.subr.bf16.mxu1 %v6990_v26  ;;  %v261_v35 = vld [vmem:[%s8563_s5] sm:$0x7] }
 0x137   :  { %v163_v39 = vmul.f32 %v6874_v30, %v149_v32 }
 0x138   :  { %v6408_v40 = vpop.eup %6407  ;;  %v138_v42 = vadd.f32 1e-05, %v130_v36  ;;  %v139_v43 = vadd.f32 1e-05, %v131_v37 }
 0x139   :  { %v150_v20 = vmul.f32 %v6408_v40, %v6800_v27  ;;  %v124_v45 = vpop.xlane.xlu1 %123  ;;  %v177_v46 = vadd.f32 %v6880_v38, %v163_v39  ;;  %v6696_v40 = vmov 1966171168  }
 0x13a   :  { %6415 = vrsqrt.f32 %v138_v42  ;;  %v132_v48 = vmul.f32 0.03125, %v124_v45  ;;  %v555_v42 = vunpack.c.l.s4 %v6696_v40 }
 0x13b   :  { %6417 = vrsqrt.f32 %v139_v43  ;;  %v6888_v49 = vadd.f32 %v5641_v44, %v177_v46  ;;  %v164_v50 = vmul.f32 %v6874_v30, %v150_v20 }
 0x13c   :  { %v6410_v51 = vpop.eup %6409  ;;  %v140_v53 = vadd.f32 1e-05, %v132_v48  ;;  %v556_v48 = vunpack.c.0.s8 %v555_v42 }
 0x13d   :  { %8637 = vst [vmem:[#allocation6_spill] sm:$0xff] %v6888_v49  ;;  %v6412_v55 = vpop.eup %6411  ;;  %v151_v56 = vmul.f32 %v6410_v51, %v6796_v24  ;;  %5649 = vmatmul.mubr.msk.f32.vlgmr.msra.gmra.mrb[0].mxu0 %vm51_vm0, %v6888_v49  ;;  %6004 = vmatprep.mubr.msk.f32.mxu1 %vm51_vm0, %v6888_v49  ;;  %v178_v27 = vadd.f32 %v6880_v38, %v164_v50  ;;  %v5643_v24 = vld [vmem:[%s8561_s1 + $0x2] ss:$0 sm:$0xff] }
 0x13e   :  { %v153_v57 = vmul.f32 %v6412_v55, %v6809_v34  ;;  %6419 = vrsqrt.f32 %v140_v53  ;;  %372 = vmatprep.mubr.f32.mxu0 %v6695_v10 }
 0x13f   :  { %v6902_v58 = vadd.f32 %v5642_v54, %v178_v27  ;;  %v165_v59 = vmul.f32 %v6874_v30, %v151_v56 }
 0x140   :  { %v6414_v60 = vpop.eup %6413  ;;  %v167_v61 = vmul.f32 %v6874_v30, %v153_v57 }
 0x141   :  { %8638 = vst [vmem:[#allocation7_spill] sm:$0xff] %v6902_v58  ;;  %v152_v62 = vmul.f32 %v6414_v60, %v6803_v31  ;;  %5650 = vmatmul.mubr.msk.f32.gmra.mrb[2].mxu0 %vm51_vm0, %v6902_v58  ;;  %6005 = vmatmul.mubr.msk.f32.vlgmr.msra.gmra.mrb[0].mxu1 %vm51_vm0, %v6902_v58  ;;  %v179_v34 = vadd.f32 %v6880_v38, %v165_v59 }
 0x142   :  { %378 = vmatprep.mubr.f32.mxu0 %v6695_v10  ;;  %v181_v31 = vadd.f32 %v6880_v38, %v167_v61  ;;  %6327 = vmatpush3.bf16.msra.mxu1 %v6990_v26 }
 0x143   :  { %v6916_v63 = vadd.f32 %v5643_v24, %v179_v34  ;;  %v166_v0 = vmul.f32 %v6874_v30, %v152_v62 }
 0x144   :  { %v6416_v1 = vpop.eup %6415  ;;  %v6937_v11 = vadd.f32 %v5645_v6, %v181_v31 }
 0x145   :  { %8639 = vst [vmem:[#allocation8_spill] sm:$0xff] %v6916_v63  ;;  %v6418_v3 = vpop.eup %6417  ;;  %v154_v4 = vmul.f32 %v6416_v1, %v6817_v41  ;;  %5651 = vmatmul.mubr.msk.f32.gmra.mrb[4].mxu0 %vm51_vm0, %v6916_v63  ;;  %6007 = vmatprep.mubr.msk.f32.mxu1 %vm51_vm0, %v6916_v63  ;;  %v180_v5 = vadd.f32 %v6880_v38, %v166_v0 }
 0x146   :  { %v155_v7 = vmul.f32 %v6418_v3, %v6823_v47  ;;  %384 = vmatprep.mubr.f32.mxu0 %v6695_v10  ;;  %8641 = vst [vmem:[#allocation10_spill] sm:$0xff] %v6937_v11 }
 0x147   :  { %v6934_v8 = vadd.f32 %v5644_v2, %v180_v5  ;;  %v168_v41 = vmul.f32 %v6874_v30, %v154_v4 }
 0x148   :  { %v6420_v9 = vpop.eup %6419  ;;  %v169_v13 = vmul.f32 %v6874_v30, %v155_v7 }
 0x149   :  { %8640 = vst [vmem:[#allocation9_spill] sm:$0xff] %v6934_v8  ;;  %v156_v14 = vmul.f32 %v6420_v9, %v6828_v52  ;;  %5652 = vmatmul.mubr.msk.f32.gmra.mrb[6].mxu0 %vm51_vm0, %v6934_v8  ;;  %6008 = vmatmul.mubr.msk.f32.gmra.mrb[2].mxu1 %vm51_vm0, %v6934_v8  ;;  %v182_v47 = vadd.f32 %v6880_v38, %v168_v41 }
 0x14a   :  { %6010 = vmatprep.mubr.msk.f32.mxu1 %vm51_vm0, %v6937_v11  ;;  %390 = vmatprep.mubr.f32.mxu0 %v6695_v10  ;;  %v183_v16 = vadd.f32 %v6880_v38, %v169_v13 }
 0x14b   :  { %v6956_v52 = vadd.f32 %v5646_v12, %v182_v47  ;;  %v170_v17 = vmul.f32 %v6874_v30, %v156_v14  ;;  %v263_v30 = vlaneseq }
 0x14c   :  { %v6959_v18 = vadd.f32 %v5647_v15, %v183_v16 }
 0x14d   :  { %8642 = vst [vmem:[#allocation11_spill] sm:$0xff] %v6956_v52  ;;  %5653 = vmatmul.mubr.msk.f32.gmra.mrb[8].mxu0 %vm51_vm0, %v6937_v11  ;;  %6011 = vmatmul.mubr.msk.f32.gmra.mrb[4].mxu1 %vm51_vm0, %v6956_v52  ;;  %v184_v21 = vadd.f32 %v6880_v38, %v170_v17  ;;  %v264_v32 = vshrl.u32 %v263_v30, 7 }
 0x14e   :  { %8643 = vst [vmem:[#allocation12_spill] sm:$0xff] %v6959_v18  ;;  %6013 = vmatprep.mubr.msk.f32.mxu1 %vm51_vm0, %v6959_v18  ;;  %396 = vmatprep.mubr.f32.mxu0 %v6695_v10 }
 0x14f   :  { %v6972_v22 = vadd.f32 %v5648_v19, %v184_v21  ;;  %v7005_v33 = vsub.s32 0, %v264_v32  ;;  %v269_v36 = vsub.s32 1, %v264_v32  ;;  %v273_v38 = vsub.s32 2, %v264_v32 }
 0x150   :  { %v7025_v59 = vsub.s32 %v556_v48, %v264_v32 }
 0x151   :  { %8644 = vst [vmem:[#allocation13_spill] sm:$0xff] %v6972_v22  ;;  %5654 = vmatmul.mubr.msk.f32.gmra.mrb[10].mxu0 %vm51_vm0, %v6956_v52  ;;  %6014 = vmatmul.mubr.msk.f32.gmra.mrb[6].mxu1 %vm51_vm0, %v6972_v22  ;;  %v7011_v37 = vrot.slane %v261_v35, %v7005_v33  ;;  %v7013_v39 = vrot.slane %v261_v35, %v269_v36 }
 0x152   :  { %402 = vmatprep.mubr.f32.mxu0 %v6695_v10  ;;  %v7016_v45 = vrot.slane %v261_v35, %v273_v38 }
 0x155   :  { %5655 = vmatmul.mubr.msk.f32.gmra.mrb[12].mxu0 %vm51_vm0, %v6959_v18 }
 0x156   :  { %408 = vmatprep.mubr.f32.mxu0 %v6695_v10  ;;  %v546_v10 = vld [vmem:[%s8562_s10 + $0x10] sm:$0xff] }
 0x157   :  { %v7000_v29 = vpack.c.bf16 %v547_v28, %v546_v10 }
 0x159   :  { %5656 = vmatmul.mubr.msk.f32.gmra.mrb[14].mxu0 %vm51_vm0, %v6972_v22  ;;  %6329 = vmatprep.subr.bf16.mxu1 %v7000_v29 }
 0x15a   :  { %6331 = vmatpush3.bf16.msra.mxu1 %v7000_v29 }
 0x15b   :  { %6333 = vmatprep.subr.bf16.mxu1 %v6990_v26 }
 0x210   :  { %v368_v43 = vpop.f32.mrb[0].mxu0 }
 0x211   :  { %v369_v44 = vadd.f32 %v368_v43, %v7011_v37  ;;  %v370_v20 = vpop.f32.mrb[1].mxu0 }
 0x212   :  { %v371_v46 = vadd.f32 %v370_v20, %v7013_v39 }
 0x213   :  { %520 = vst.msk [vmem:[#allocation2] sm:$0xff] %vm51_vm0, %v369_v44 }
 0x214   :  { %528 = vst.msk [vmem:[#allocation3] sm:$0xff] %vm51_vm0, %v371_v46  ;;  %v374_v50 = vpop.f32.mrb[2].mxu0  ;;  %v6006_v51 = vpop.f32.mrb[0].mxu1 }
 0x215   :  { %v375_v53 = vadd.f32 %v374_v50, %v7011_v37  ;;  %v487_v54 = vadd.f32 %v6006_v51, %v7016_v45  ;;  %v376_v55 = vpop.f32.mrb[3].mxu0  ;;  %v481_v56 = vpop.f32.mrb[1].mxu1 }
 0x216   :  { %v377_v27 = vadd.f32 %v376_v55, %v7013_v39  ;;  %v482_v57 = vadd.f32 %v481_v56, %v7016_v45 }
 0x217   :  { %521 = vst.msk [vmem:[#allocation2 + $0x8] sm:$0xff] %vm51_vm0, %v375_v53  ;;  %537 = vst.msk [vmem:[#allocation4 + $0x8] sm:$0xff] %vm51_vm0, %v487_v54 }
 0x218   :  { %529 = vst.msk [vmem:[#allocation3 + $0x8] sm:$0xff] %vm51_vm0, %v377_v27  ;;  %536 = vst.msk [vmem:[#allocation4] sm:$0xff] %vm51_vm0, %v482_v57  ;;  %v380_v60 = vpop.f32.mrb[4].mxu0 }
 0x219   :  { %v381_v24 = vadd.f32 %v380_v60, %v7011_v37  ;;  %v382_v61 = vpop.f32.mrb[5].mxu0 }
 0x21a   :  { %v383_v62 = vadd.f32 %v382_v61, %v7013_v39  ;;  %v549_v34 = vld [vmem:[#allocation2] sm:$0xff] }
 0x21b   :  { %522 = vst.msk [vmem:[#allocation2 + $0x10] sm:$0xff] %vm51_vm0, %v381_v24  ;;  %v560_v0 = vrot.slane %v549_v34, %v7025_v59  ;;  %v553_v1 = vcombine.high %v549_v34, %v549_v34  ;;  %v7048_v19 = vld [vmem:[#allocation3] sm:$0xff] }
 0x21c   :  { %530 = vst.msk [vmem:[#allocation3 + $0x10] sm:$0xff] %vm51_vm0, %v383_v62  ;;  %v386_v2 = vpop.f32.mrb[6].mxu0  ;;  %v6009_v31 = vpop.f32.mrb[2].mxu1 }
 0x21d   :  { %v387_v3 = vadd.f32 %v386_v2, %v7011_v37  ;;  %v497_v4 = vadd.f32 %v6009_v31, %v7016_v45  ;;  %v388_v5 = vpop.f32.mrb[7].mxu0  ;;  %v491_v6 = vpop.f32.mrb[3].mxu1  ;;  %v568_v7 = vcombine.high %v560_v0, %v560_v0  ;;  %v576_v41 = vrot.slane %v560_v0, %v7025_v59 }
 0x21e   :  { %v389_v9 = vadd.f32 %v388_v5, %v7013_v39  ;;  %v492_v12 = vadd.f32 %v491_v6, %v7016_v45  ;;  %v567_v13 = vrot.slane %v553_v1, %v7025_v59  ;;  %v1150_v25 = vld [vmem:[#allocation2 + $0x8] sm:$0xff] }
 0x21f   :  { %523 = vst.msk [vmem:[#allocation2 + $0x18] sm:$0xff] %vm51_vm0, %v387_v3  ;;  %539 = vst.msk [vmem:[#allocation4 + $0x18] sm:$0xff] %vm51_vm0, %v497_v4  ;;  %v590_v14 = vrot.slane %v568_v7, %v7025_v59  ;;  %v605_v47 = vrot.slane %v576_v41, %v7005_v33  ;;  %v598_v15 = vcombine.high %v576_v41, %v576_v41 }
 0x220   :  { %531 = vst.msk [vmem:[#allocation3 + $0x18] sm:$0xff] %vm51_vm0, %v389_v9  ;;  %538 = vst.msk [vmem:[#allocation4 + $0x10] sm:$0xff] %vm51_vm0, %v492_v12  ;;  %v392_v16 = vpop.f32.mrb[8].mxu0  ;;  %v6012_v17 = vpop.f32.mrb[4].mxu1  ;;  %v583_v21 = vrot.slane %v567_v13, %v7025_v59  ;;  %v569_v23 = vcombine.high %v567_v13, %v567_v13  ;;  %v1163_v46 = vrot.slane %v1150_v25, %v7025_v59 }
 0x221   :  { %v393_v10 = vadd.f32 %v392_v16, %v7011_v37  ;;  %v507_v28 = vadd.f32 %v6012_v17, %v7016_v45  ;;  %v394_v30 = vpop.f32.mrb[9].mxu0  ;;  %v501_v32 = vpop.f32.mrb[5].mxu1  ;;  %v642_v35 = vmul.f32 %v605_v47, %v7048_v19  ;;  %v609_v36 = vrot.slane %v590_v14, %v7005_v33 }
 0x222   :  { %v395_v38 = vadd.f32 %v394_v30, %v7013_v39  ;;  %v502_v40 = vadd.f32 %v501_v32, %v7016_v45  ;;  %v613_v42 = vrot.slane %v598_v15, %v7005_v33  ;;  %v600_v43 = vcombine.high %v590_v14, %v590_v14 }
 0x223   :  { %524 = vst.msk [vmem:[#allocation2 + $0x20] sm:$0xff] %vm51_vm0, %v393_v10  ;;  %541 = vst.msk [vmem:[#allocation4 + $0x28] sm:$0xff] %vm51_vm0, %v507_v28  ;;  %6024 = vmatprep.mubr.msk.f32.mxu1 %vm51_vm0, %v642_v35  ;;  %v643_v44 = vmul.f32 %v609_v36, %v7048_v19  ;;  %v597_v20 = vrot.slane %v569_v23, %v7025_v59  ;;  %v621_v54 = vrot.slane %v583_v21, %v7005_v33  ;;  %v1152_v10 = vld [vmem:[#allocation3 + $0x8] sm:$0xff]  ;;  %v1746_v35 = vld [vmem:[#allocation2 + $0x10] sm:$0xff] }
 0x224   :  { %532 = vst.msk [vmem:[#allocation3 + $0x20] sm:$0xff] %vm51_vm0, %v395_v38  ;;  %540 = vst.msk [vmem:[#allocation4 + $0x20] sm:$0xff] %vm51_vm0, %v502_v40  ;;  %v398_v48 = vpop.f32.mrb[10].mxu0  ;;  %v6015_v50 = vpop.f32.mrb[6].mxu1  ;;  %v644_v51 = vmul.f32 %v613_v42, %v7048_v19  ;;  %v617_v53 = vrot.slane %v600_v43, %v7005_v33  ;;  %v599_v55 = vcombine.high %v583_v21, %v583_v21 }
 0x225   :  { %v399_v56 = vadd.f32 %v398_v48, %v7011_v37  ;;  %v517_v27 = vadd.f32 %v6015_v50, %v7016_v45  ;;  %v400_v57 = vpop.f32.mrb[11].mxu0  ;;  %v511_v60 = vpop.f32.mrb[7].mxu1  ;;  %6025 = vmatmul.mubr.msk.f32.vlgmr.msra.gmra.mrb[8].mxu1 %vm51_vm0, %v643_v44  ;;  %v1156_v62 = vcombine.high %v1150_v25, %v1150_v25  ;;  %v625_v0 = vrot.slane %v597_v20, %v7005_v33 }
 0x226   :  { %v401_v24 = vadd.f32 %v400_v57, %v7013_v39  ;;  %v512_v61 = vadd.f32 %v511_v60, %v7016_v45  ;;  %6335 = vmatpush3.bf16.msra.mxu1 %v6990_v26  ;;  %6027 = vmatprep.mubr.msk.f32.mxu1 %vm51_vm0, %v644_v51  ;;  %v645_v34 = vmul.f32 %v617_v53, %v7048_v19 }
 0x227   :  { %525 = vst.msk [vmem:[#allocation2 + $0x28] sm:$0xff] %vm51_vm0, %v399_v56  ;;  %543 = vst.msk [vmem:[#allocation4 + $0x38] sm:$0xff] %vm51_vm0, %v517_v27  ;;  %6337 = vmatprep.subr.bf16.mxu1 %v7000_v29  ;;  %v601_v1 = vcombine.high %v597_v20, %v597_v20  ;;  %v1171_v2 = vcombine.high %v1163_v46, %v1163_v46  ;;  %v646_v31 = vmul.f32 %v621_v54, %v7048_v19 }
 0x228   :  { %533 = vst.msk [vmem:[#allocation3 + $0x28] sm:$0xff] %vm51_vm0, %v401_v24  ;;  %542 = vst.msk [vmem:[#allocation4 + $0x30] sm:$0xff] %vm51_vm0, %v512_v61  ;;  %v404_v45 = vpop.f32.mrb[12].mxu0  ;;  %v629_v3 = vrot.slane %v599_v55, %v7005_v33  ;;  %v1179_v4 = vrot.slane %v1163_v46, %v7025_v59  ;;  %v647_v41 = vmul.f32 %v625_v0, %v7048_v19 }
 0x229   :  { %v405_v5 = vadd.f32 %v404_v45, %v7011_v37  ;;  %v406_v6 = vpop.f32.mrb[13].mxu0  ;;  %6028 = vmatmul.mubr.msk.f32.gmra.mrb[10].mxu1 %vm51_vm0, %v645_v34  ;;  %v633_v9 = vrot.slane %v601_v1, %v7005_v33  ;;  %v1193_v12 = vrot.slane %v1171_v2, %v7025_v59  ;;  %v1170_v13 = vrot.slane %v1156_v62, %v7025_v59  ;;  %v1748_v1 = vld [vmem:[#allocation3 + $0x10] sm:$0xff] }
 0x22a   :  { %v407_v7 = vadd.f32 %v406_v6, %v7013_v39  ;;  %6030 = vmatprep.mubr.msk.f32.mxu1 %vm51_vm0, %v646_v31  ;;  %6339 = vmatpush3.bf16.msra.mxu1 %v7000_v29  ;;  %v648_v47 = vmul.f32 %v629_v3, %v7048_v19  ;;  %v1208_v15 = vrot.slane %v1179_v4, %v7005_v33  ;;  %v2342_v3 = vld [vmem:[#allocation2 + $0x18] sm:$0xff] }
 0x22b   :  { %526 = vst.msk [vmem:[#allocation2 + $0x30] sm:$0xff] %vm51_vm0, %v405_v5  ;;  %6341 = vmatprep.subr.bf16.mxu1 %v6990_v26  ;;  %v1201_v16 = vcombine.high %v1179_v4, %v1179_v4  ;;  %v649_v25 = vmul.f32 %v633_v9, %v7048_v19  ;;  %v1212_v28 = vrot.slane %v1193_v12, %v7005_v33 }
 0x22c   :  { %534 = vst.msk [vmem:[#allocation3 + $0x30] sm:$0xff] %vm51_vm0, %v407_v7  ;;  %v410_v14 = vpop.f32.mrb[14].mxu0  ;;  %v1203_v30 = vcombine.high %v1193_v12, %v1193_v12  ;;  %v1172_v32 = vcombine.high %v1170_v13, %v1170_v13  ;;  %v1186_v38 = vrot.slane %v1170_v13, %v7025_v59  ;;  %v1752_v53 = vcombine.high %v1746_v35, %v1746_v35 }
 0x22d   :  { %v411_v17 = vadd.f32 %v410_v14, %v7011_v37  ;;  %v412_v21 = vpop.f32.mrb[15].mxu0  ;;  %6031 = vmatmul.mubr.msk.f32.gmra.mrb[12].mxu1 %vm51_vm0, %v647_v41  ;;  %v1245_v37 = vmul.f32 %v1208_v15, %v1152_v10  ;;  %v1216_v36 = vrot.slane %v1201_v16, %v7005_v33  ;;  %v1246_v19 = vmul.f32 %v1212_v28, %v1152_v10 }
 0x22e   :  { %v413_v23 = vadd.f32 %v412_v21, %v7013_v39  ;;  %6033 = vmatprep.mubr.msk.f32.mxu1 %vm51_vm0, %v648_v47  ;;  %v1759_v39 = vrot.slane %v1746_v35, %v7025_v59  ;;  %v1220_v40 = vrot.slane %v1203_v30, %v7005_v33  ;;  %v1200_v42 = vrot.slane %v1172_v32, %v7025_v59 }
 0x22f   :  { %527 = vst.msk [vmem:[#allocation2 + $0x38] sm:$0xff] %vm51_vm0, %v411_v17  ;;  %v1247_v43 = vmul.f32 %v1216_v36, %v1152_v10  ;;  %v1224_v44 = vrot.slane %v1186_v38, %v7005_v33  ;;  %v1202_v20 = vcombine.high %v1186_v38, %v1186_v38  ;;  %v1766_v24 = vrot.slane %v1752_v53, %v7025_v59 }
 0x230   :  { %535 = vst.msk [vmem:[#allocation3 + $0x38] sm:$0xff] %vm51_vm0, %v413_v23  ;;  %v1767_v46 = vcombine.high %v1759_v39, %v1759_v39  ;;  %v1248_v48 = vmul.f32 %v1220_v40, %v1152_v10  ;;  %v1228_v50 = vrot.slane %v1200_v42, %v7005_v33  ;;  %v1204_v51 = vcombine.high %v1200_v42, %v1200_v42  ;;  %v2344_v42 = vld [vmem:[#allocation3 + $0x18] sm:$0xff] }
 0x231   :  { %6034 = vmatmul.mubr.msk.f32.gmra.mrb[14].mxu1 %vm51_vm0, %v649_v25  ;;  %v1249_v54 = vmul.f32 %v1224_v44, %v1152_v10  ;;  %v1232_v55 = vrot.slane %v1202_v20, %v7005_v33  ;;  %v1775_v56 = vrot.slane %v1759_v39, %v7025_v59  ;;  %v1768_v31 = vcombine.high %v1766_v24, %v1766_v24 }
 0x232   :  { %6058 = vmatprep.mubr.msk.f32.mxu1 %vm51_vm0, %v1245_v37  ;;  %v1250_v27 = vmul.f32 %v1228_v50, %v1152_v10  ;;  %v1236_v57 = vrot.slane %v1204_v51, %v7005_v33  ;;  %v1789_v60 = vrot.slane %v1767_v46, %v7025_v59  ;;  %v1782_v6 = vrot.slane %v1766_v24, %v7025_v59  ;;  %v2938_v50 = vld [vmem:[#allocation2 + $0x20] sm:$0xff] }
 0x233   :  { %v1251_v61 = vmul.f32 %v1232_v55, %v1152_v10  ;;  %v1804_v62 = vrot.slane %v1775_v56, %v7005_v33  ;;  %v1797_v34 = vcombine.high %v1775_v56, %v1775_v56  ;;  %v2355_v7 = vrot.slane %v2342_v3, %v7025_v59 }
 0x234   :  { %v1252_v0 = vmul.f32 %v1236_v57, %v1152_v10  ;;  %v1808_v2 = vrot.slane %v1789_v60, %v7005_v33  ;;  %v1799_v45 = vcombine.high %v1789_v60, %v1789_v60  ;;  %v1796_v12 = vrot.slane %v1768_v31, %v7025_v59 }
 0x235   :  { %6059 = vmatmul.mubr.msk.f32.vlgmr.msra.gmra.mrb[16].mxu1 %vm51_vm0, %v1246_v19  ;;  %v1841_v4 = vmul.f32 %v1804_v62, %v1748_v1  ;;  %v1812_v5 = vrot.slane %v1797_v34, %v7005_v33  ;;  %v1820_v14 = vrot.slane %v1782_v6, %v7005_v33  ;;  %v1798_v47 = vcombine.high %v1782_v6, %v1782_v6 }
 0x236   :  { %6343 = vmatpush3.bf16.msra.mxu1 %v6990_v26  ;;  %6061 = vmatprep.mubr.msk.f32.mxu1 %vm51_vm0, %v1247_v43  ;;  %v1842_v41 = vmul.f32 %v1808_v2, %v1748_v1  ;;  %v1816_v9 = vrot.slane %v1799_v45, %v7005_v33  ;;  %v2363_v15 = vcombine.high %v2355_v7, %v2355_v7 }
 0x237   :  { %6345 = vmatprep.subr.bf16.mxu1 %v7000_v29  ;;  %v1843_v13 = vmul.f32 %v1812_v5, %v1748_v1  ;;  %v1824_v17 = vrot.slane %v1796_v12, %v7005_v33  ;;  %v1800_v21 = vcombine.high %v1796_v12, %v1796_v12  ;;  %v2348_v23 = vcombine.high %v2342_v3, %v2342_v3 }
 0x238   :  { %v1844_v16 = vmul.f32 %v1816_v9, %v1748_v1  ;;  %v1845_v25 = vmul.f32 %v1820_v14, %v1748_v1  ;;  %v1828_v10 = vrot.slane %v1798_v47, %v7005_v33  ;;  %v2371_v28 = vrot.slane %v2355_v7, %v7025_v59  ;;  %v2940_v9 = vld [vmem:[#allocation3 + $0x20] sm:$0xff]  ;;  %v3534_v47 = vld [vmem:[#allocation2 + $0x28] sm:$0xff] }
 0x239   :  { %6062 = vmatmul.mubr.msk.f32.gmra.mrb[18].mxu1 %vm51_vm0, %v1248_v48  ;;  %v2385_v30 = vrot.slane %v2363_v15, %v7025_v59  ;;  %v1846_v32 = vmul.f32 %v1824_v17, %v1748_v1  ;;  %v1832_v35 = vrot.slane %v1800_v21, %v7005_v33  ;;  %v2362_v37 = vrot.slane %v2348_v23, %v7025_v59 }
 0x23a   :  { %6064 = vmatprep.mubr.msk.f32.mxu1 %vm51_vm0, %v1249_v54  ;;  %6347 = vmatpush3.bf16.msra.mxu1 %v7000_v29  ;;  %v1847_v36 = vmul.f32 %v1828_v10, %v1748_v1  ;;  %v2400_v38 = vrot.slane %v2371_v28, %v7005_v33  ;;  %v2393_v39 = vcombine.high %v2371_v28, %v2371_v28 }
 0x23b   :  { %6349 = vmatprep.subr.bf16.mxu1 %v6990_v26  ;;  %v2395_v19 = vcombine.high %v2385_v30, %v2385_v30  ;;  %v1848_v40 = vmul.f32 %v1832_v35, %v1748_v1  ;;  %v2404_v43 = vrot.slane %v2385_v30, %v7005_v33  ;;  %v2364_v44 = vcombine.high %v2362_v37, %v2362_v37 }
 0x23c   :  { %v2437_v20 = vmul.f32 %v2400_v38, %v2344_v42  ;;  %v2408_v46 = vrot.slane %v2393_v39, %v7005_v33  ;;  %v2378_v48 = vrot.slane %v2362_v37, %v7025_v59  ;;  %v2951_v55 = vrot.slane %v2938_v50, %v7025_v59 }
 0x23d   :  { %6065 = vmatmul.mubr.msk.f32.gmra.mrb[20].mxu1 %vm51_vm0, %v1250_v27  ;;  %v2412_v51 = vrot.slane %v2395_v19, %v7005_v33  ;;  %v2438_v53 = vmul.f32 %v2404_v43, %v2344_v42  ;;  %v2392_v54 = vrot.slane %v2364_v44, %v7025_v59  ;;  %v2944_v34 = vcombine.high %v2938_v50, %v2938_v50 }
 0x23e   :  { %6067 = vmatprep.mubr.msk.f32.mxu1 %vm51_vm0, %v1251_v61  ;;  %v2439_v56 = vmul.f32 %v2408_v46, %v2344_v42  ;;  %v2416_v27 = vrot.slane %v2378_v48, %v7005_v33  ;;  %v2394_v57 = vcombine.high %v2378_v48, %v2378_v48  ;;  %v2959_v62 = vcombine.high %v2951_v55, %v2951_v55 }
 0x23f   :  { %v2440_v60 = vmul.f32 %v2412_v51, %v2344_v42  ;;  %v2420_v24 = vrot.slane %v2392_v54, %v7005_v33  ;;  %v2396_v61 = vcombine.high %v2392_v54, %v2392_v54  ;;  %v2967_v2 = vrot.slane %v2951_v55, %v7025_v59  ;;  %v3536_v55 = vld [vmem:[#allocation3 + $0x28] sm:$0xff] }
 0x240   :  { %v2424_v1 = vrot.slane %v2394_v57, %v7005_v33  ;;  %v2981_v3 = vrot.slane %v2959_v62, %v7025_v59  ;;  %v3547_v21 = vrot.slane %v3534_v47, %v7025_v59  ;;  %v3540_v39 = vcombine.high %v3534_v47, %v3534_v47 }
 0x241   :  { %6068 = vmatmul.mubr.msk.f32.gmra.mrb[22].mxu1 %vm51_vm0, %v1252_v0  ;;  %v2441_v0 = vmul.f32 %v2416_v27, %v2344_v42  ;;  %v2442_v45 = vmul.f32 %v2420_v24, %v2344_v42  ;;  %v2428_v31 = vrot.slane %v2396_v61, %v7005_v33  ;;  %v2996_v6 = vrot.slane %v2967_v2, %v7005_v33  ;;  %v4130_v61 = vld [vmem:[#allocation2 + $0x30] sm:$0xff] }
 0x242   :  { %6092 = vmatprep.mubr.msk.f32.mxu1 %vm51_vm0, %v1841_v4  ;;  %v2958_v4 = vrot.slane %v2944_v34, %v7025_v59  ;;  %v2443_v5 = vmul.f32 %v2424_v1, %v2344_v42  ;;  %v2989_v7 = vcombine.high %v2967_v2, %v2967_v2  ;;  %v3000_v12 = vrot.slane %v2981_v3, %v7005_v33 }
 0x243   :  { %v3033_v15 = vmul.f32 %v2996_v6, %v2940_v9  ;;  %v3555_v35 = vcombine.high %v3547_v21, %v3547_v21  ;;  %v3554_v46 = vrot.slane %v3540_v39, %v7025_v59  ;;  %v4143_v1 = vrot.slane %v4130_v61, %v7025_v59 }
 0x244   :  { %v2960_v14 = vcombine.high %v2958_v4, %v2958_v4  ;;  %v2974_v17 = vrot.slane %v2958_v4, %v7025_v59  ;;  %v3034_v23 = vmul.f32 %v3000_v12, %v2940_v9 }
 0x245   :  { %6093 = vmatmul.mubr.msk.f32.vlgmr.msra.gmra.mrb[24].mxu1 %vm51_vm0, %v1842_v41  ;;  %v2444_v41 = vmul.f32 %v2428_v31, %v2344_v42  ;;  %v3563_v42 = vrot.slane %v3547_v21, %v7025_v59  ;;  %v3577_v43 = vrot.slane %v3555_v35, %v7025_v59  ;;  %v3556_v27 = vcombine.high %v3554_v46, %v3554_v46 }
 0x246   :  { %6351 = vmatpush3.bf16.msra.mxu1 %v6990_v26  ;;  %6095 = vmatprep.mubr.msk.f32.mxu1 %vm51_vm0, %v1843_v13  ;;  %v2991_v13 = vcombine.high %v2981_v3, %v2981_v3  ;;  %v2988_v10 = vrot.slane %v2960_v14, %v7025_v59  ;;  %v3012_v30 = vrot.slane %v2974_v17, %v7005_v33 }
 0x247   :  { %6353 = vmatprep.subr.bf16.mxu1 %v7000_v29  ;;  %v3592_v50 = vrot.slane %v3563_v42, %v7005_v33  ;;  %v3585_v51 = vcombine.high %v3563_v42, %v3563_v42  ;;  %v3570_v24 = vrot.slane %v3554_v46, %v7025_v59  ;;  %v4151_v6 = vcombine.high %v4143_v1, %v4143_v1 }
 0x248   :  { %v2992_v38 = vcombine.high %v2988_v10, %v2988_v10  ;;  %v3037_v19 = vmul.f32 %v3012_v30, %v2940_v9  ;;  %v4159_v12 = vrot.slane %v4143_v1, %v7025_v59 }
 0x249   :  { %6096 = vmatmul.mubr.msk.f32.gmra.mrb[26].mxu1 %vm51_vm0, %v1844_v16  ;;  %v3004_v16 = vrot.slane %v2989_v7, %v7005_v33  ;;  %v3629_v57 = vmul.f32 %v3592_v50, %v3536_v55  ;;  %v3586_v31 = vcombine.high %v3570_v24, %v3570_v24  ;;  %v4136_v7 = vcombine.high %v4130_v61, %v4130_v61 }
 0x24a   :  { %6098 = vmatprep.mubr.msk.f32.mxu1 %vm51_vm0, %v1845_v25  ;;  %6355 = vmatpush3.bf16.msra.mxu1 %v7000_v29  ;;  %v3008_v25 = vrot.slane %v2991_v13, %v7005_v33  ;;  %v4173_v47 = vrot.slane %v4151_v6, %v7025_v59  ;;  %v4181_v21 = vcombine.high %v4159_v12, %v4159_v12 }
 0x24b   :  { %6357 = vmatprep.subr.bf16.mxu1 %v6990_v26  ;;  %v3035_v28 = vmul.f32 %v3004_v16, %v2940_v9 }
 0x24c   :  { %v3036_v37 = vmul.f32 %v3008_v25, %v2940_v9  ;;  %v4132_v25 = vld [vmem:[#allocation3 + $0x30] sm:$0xff]  ;;  %v4196_v35 = vrot.slane %v4181_v21, %v7005_v33  ;;  %v7283_v21 = vld [vmem:[%s8564_s11] sm:$0xff] }
 0x24d   :  { %6099 = vmatmul.mubr.msk.f32.gmra.mrb[28].mxu1 %vm51_vm0, %v1846_v32  ;;  %v2990_v32 = vcombine.high %v2974_v17, %v2974_v17  ;;  %v4188_v17 = vrot.slane %v4159_v12, %v7005_v33  ;;  %6036 = vmatprep.subr.mxu0 %v7283_v21 }
 0x24e   :  { %6101 = vmatprep.mubr.msk.f32.mxu1 %vm51_vm0, %v1847_v36  ;;  %v3016_v36 = vrot.slane %v2988_v10, %v7005_v33  ;;  %v4192_v10 = vrot.slane %v4173_v47, %v7005_v33  ;;  %v4227_v42 = vmul.f32 %v4196_v35, %v4132_v25  ;;  %6037 = vmatpush3.msra.mxu0 %v7283_v21 }
 0x24f   :  { %6070 = vmatprep.subr.mxu0 %v7283_v21 }
 0x250   :  { %v3038_v44 = vmul.f32 %v3016_v36, %v2940_v9  ;;  %v4726_v36 = vld [vmem:[#allocation2 + $0x38] sm:$0xff] }
 0x251   :  { %6102 = vmatmul.mubr.msk.f32.gmra.mrb[30].mxu1 %vm51_vm0, %v1848_v40  ;;  %v3020_v40 = vrot.slane %v2990_v32, %v7005_v33  ;;  %v4225_v32 = vmul.f32 %v4188_v17, %v4132_v25 }
 0x252   :  { %6126 = vmatprep.mubr.msk.f32.mxu1 %vm51_vm0, %v2437_v20  ;;  %v3024_v20 = vrot.slane %v2992_v38, %v7005_v33  ;;  %v4226_v38 = vmul.f32 %v4192_v10, %v4132_v25 }
 0x253   :  { %v3039_v48 = vmul.f32 %v3020_v40, %v2940_v9  ;;  %v4739_v40 = vrot.slane %v4726_v36, %v7025_v59 }
 0x254   :  { %v3040_v54 = vmul.f32 %v3024_v20, %v2940_v9  ;;  %v3616_v9 = vrot.slane %v3586_v31, %v7005_v33  ;;  %v4732_v20 = vcombine.high %v4726_v36, %v4726_v36 }
 0x255   :  { %6127 = vmatmul.mubr.msk.f32.vlgmr.msra.gmra.mrb[32].mxu1 %vm51_vm0, %v2438_v53  ;;  %v3587_v53 = vcombine.high %v3577_v43, %v3577_v43 }
 0x256   :  { %6359 = vmatpush3.bf16.msra.mxu1 %v6990_v26  ;;  %6129 = vmatprep.mubr.msk.f32.mxu1 %vm51_vm0, %v2439_v56  ;;  %v3596_v56 = vrot.slane %v3577_v43, %v7005_v33  ;;  %v3635_v16 = vmul.f32 %v3616_v9, %v3536_v55 }
 0x257   :  { %6361 = vmatprep.subr.bf16.mxu1 %v7000_v29  ;;  %v3604_v62 = vrot.slane %v3587_v53, %v7005_v33 }
 0x258   :  { %v3630_v34 = vmul.f32 %v3596_v56, %v3536_v55 }
 0x259   :  { %6130 = vmatmul.mubr.msk.f32.gmra.mrb[34].mxu1 %vm51_vm0, %v2440_v60  ;;  %v3600_v60 = vrot.slane %v3585_v51, %v7005_v33  ;;  %v3632_v3 = vmul.f32 %v3604_v62, %v3536_v55  ;;  %v4747_v51 = vcombine.high %v4739_v40, %v4739_v40 }
 0x25a   :  { %6132 = vmatprep.mubr.msk.f32.mxu1 %vm51_vm0, %v2441_v0  ;;  %6363 = vmatpush3.bf16.msra.mxu1 %v7000_v29  ;;  %v3584_v0 = vrot.slane %v3556_v27, %v7025_v59 }
 0x25b   :  { %6365 = vmatprep.subr.bf16.mxu1 %v6990_v26  ;;  %v3631_v2 = vmul.f32 %v3600_v60, %v3536_v55  ;;  %v4769_v27 = vrot.slane %v4747_v51, %v7025_v59 }
 0x25c   :  { %v3612_v4 = vrot.slane %v3584_v0, %v7005_v33 }
 0x25d   :  { %6133 = vmatmul.mubr.msk.f32.gmra.mrb[36].mxu1 %vm51_vm0, %v2442_v45  ;;  %v3608_v45 = vrot.slane %v3570_v24, %v7005_v33 }
 0x25e   :  { %6135 = vmatprep.mubr.msk.f32.mxu1 %vm51_vm0, %v2443_v5  ;;  %v3588_v5 = vcombine.high %v3584_v0, %v3584_v0  ;;  %v3634_v13 = vmul.f32 %v3612_v4, %v3536_v55  ;;  %v4788_v0 = vrot.slane %v4769_v27, %v7005_v33 }
 0x260   :  { %v3620_v14 = vrot.slane %v3588_v5, %v7005_v33 }
 0x261   :  { %6136 = vmatmul.mubr.msk.f32.gmra.mrb[38].mxu1 %vm51_vm0, %v2444_v41  ;;  %v3633_v41 = vmul.f32 %v3608_v45, %v3536_v55 }
 0x262   :  { %6160 = vmatprep.mubr.msk.f32.mxu1 %vm51_vm0, %v3033_v15  ;;  %v4150_v15 = vrot.slane %v4136_v7, %v7025_v59 }
 0x264   :  { %v4152_v30 = vcombine.high %v4150_v15, %v4150_v15 }
 0x265   :  { %6161 = vmatmul.mubr.msk.f32.vlgmr.msra.gmra.mrb[40].mxu1 %vm51_vm0, %v3034_v23  ;;  %v3636_v23 = vmul.f32 %v3620_v14, %v3536_v55  ;;  %v4755_v55 = vrot.slane %v4739_v40, %v7025_v59 }
 0x266   :  { %6367 = vmatpush3.bf16.msra.mxu1 %v6990_v26  ;;  %6163 = vmatprep.mubr.msk.f32.mxu1 %vm51_vm0, %v3035_v28  ;;  %v4183_v28 = vcombine.high %v4173_v47, %v4173_v47 }
 0x267   :  { %6369 = vmatprep.subr.bf16.mxu1 %v7000_v29  ;;  %v4784_v24 = vrot.slane %v4755_v55, %v7005_v33  ;;  %v4777_v61 = vcombine.high %v4755_v55, %v4755_v55 }
 0x268   :  { %v4200_v39 = vrot.slane %v4183_v28, %v7005_v33 }
 0x269   :  { %6164 = vmatmul.mubr.msk.f32.gmra.mrb[42].mxu1 %vm51_vm0, %v3036_v37  ;;  %v4166_v37 = vrot.slane %v4150_v15, %v7025_v59  ;;  %v4792_v45 = vrot.slane %v4777_v61, %v7005_v33 }
 0x26a   :  { %6166 = vmatprep.mubr.msk.f32.mxu1 %vm51_vm0, %v3037_v19  ;;  %6371 = vmatpush3.bf16.msra.mxu1 %v7000_v29  ;;  %v4180_v19 = vrot.slane %v4152_v30, %v7025_v59  ;;  %v4228_v46 = vmul.f32 %v4200_v39, %v4132_v25 }
 0x26b   :  { %6373 = vmatprep.subr.bf16.mxu1 %v6990_v26  ;;  %v4204_v43 = vrot.slane %v4166_v37, %v7005_v33 }
 0x26c   :  { %v4184_v50 = vcombine.high %v4180_v19, %v4180_v19 }
 0x26d   :  { %6167 = vmatmul.mubr.msk.f32.gmra.mrb[44].mxu1 %vm51_vm0, %v3038_v44  ;;  %v4182_v44 = vcombine.high %v4166_v37, %v4166_v37  ;;  %v4229_v53 = vmul.f32 %v4204_v43, %v4132_v25 }
 0x26e   :  { %6169 = vmatprep.mubr.msk.f32.mxu1 %vm51_vm0, %v3039_v48  ;;  %v4208_v48 = vrot.slane %v4180_v19, %v7005_v33  ;;  %v4216_v56 = vrot.slane %v4184_v50, %v7005_v33 }
 0x270   :  { %v4232_v62 = vmul.f32 %v4216_v56, %v4132_v25 }
 0x271   :  { %6170 = vmatmul.mubr.msk.f32.gmra.mrb[46].mxu1 %vm51_vm0, %v3040_v54  ;;  %v4212_v54 = vrot.slane %v4182_v44, %v7005_v33 }
 0x272   :  { %6194 = vmatprep.mubr.msk.f32.mxu1 %vm51_vm0, %v3629_v57  ;;  %v4746_v57 = vrot.slane %v4732_v20, %v7025_v59 }
 0x273   :  { %v4231_v60 = vmul.f32 %v4212_v54, %v4132_v25 }
 0x274   :  { %v4748_v1 = vcombine.high %v4746_v57, %v4746_v57  ;;  %v4762_v31 = vrot.slane %v4746_v57, %v7025_v59 }
 0x275   :  { %6195 = vmatmul.mubr.msk.f32.vlgmr.msra.gmra.mrb[48].mxu1 %vm51_vm0, %v3630_v34  ;;  %v4728_v34 = vld [vmem:[#allocation3 + $0x38] sm:$0xff] }
 0x276   :  { %6375 = vmatpush3.bf16.msra.mxu1 %v6990_v26  ;;  %6197 = vmatprep.mubr.msk.f32.mxu1 %vm51_vm0, %v3631_v2  ;;  %v4821_v2 = vmul.f32 %v4784_v24, %v4728_v34  ;;  %v4776_v5 = vrot.slane %v4748_v1, %v7025_v59  ;;  %v4823_v6 = vmul.f32 %v4792_v45, %v4728_v34 }
 0x277   :  { %6377 = vmatprep.subr.bf16.mxu1 %v7000_v29  ;;  %v4800_v7 = vrot.slane %v4762_v31, %v7005_v33 }
 0x278   :  { %v4804_v12 = vrot.slane %v4776_v5, %v7005_v33 }
 0x279   :  { %6198 = vmatmul.mubr.msk.f32.gmra.mrb[50].mxu1 %vm51_vm0, %v3632_v3  ;;  %v4822_v3 = vmul.f32 %v4788_v0, %v4728_v34  ;;  %v4825_v14 = vmul.f32 %v4800_v7, %v4728_v34 }
 0x27a   :  { %6200 = vmatprep.mubr.msk.f32.mxu1 %vm51_vm0, %v3633_v41  ;;  %6379 = vmatpush3.bf16.msra.mxu1 %v7000_v29  ;;  %v4778_v41 = vcombine.high %v4762_v31, %v4762_v31  ;;  %v4826_v59 = vmul.f32 %v4804_v12, %v4728_v34 }
 0x27b   :  { %6381 = vmatprep.subr.bf16.mxu1 %v6990_v26 }
 0x27c   :  { %v4808_v47 = vrot.slane %v4778_v41, %v7005_v33 }
 0x27d   :  { %6201 = vmatmul.mubr.msk.f32.gmra.mrb[52].mxu1 %vm51_vm0, %v3634_v13  ;;  %v4780_v13 = vcombine.high %v4776_v5, %v4776_v5 }
 0x27e   :  { %6203 = vmatprep.mubr.msk.f32.mxu1 %vm51_vm0, %v3635_v16  ;;  %v4827_v16 = vmul.f32 %v4808_v47, %v4728_v34 }
 0x27f   :  { %v4812_v15 = vrot.slane %v4780_v13, %v7005_v33 }
 0x281   :  { %6204 = vmatmul.mubr.msk.f32.gmra.mrb[54].mxu1 %vm51_vm0, %v3636_v23  ;;  %v4828_v17 = vmul.f32 %v4812_v15, %v4728_v34 }
 0x282   :  { %6228 = vmatprep.mubr.msk.f32.mxu1 %vm51_vm0, %v4225_v32 }
 0x285   :  { %6229 = vmatmul.mubr.msk.f32.vlgmr.msra.gmra.mrb[56].mxu1 %vm51_vm0, %v4226_v38 }
 0x286   :  { %6383 = vmatpush3.bf16.msra.mxu1 %v6990_v26  ;;  %6231 = vmatprep.mubr.msk.f32.mxu1 %vm51_vm0, %v4227_v42  ;;  %v4230_v26 = vmul.f32 %v4208_v48, %v4132_v25 }
 0x287   :  { %6385 = vmatprep.subr.bf16.mxu1 %v7000_v29 }
 0x289   :  { %6232 = vmatmul.mubr.msk.f32.gmra.mrb[58].mxu1 %vm51_vm0, %v4228_v46 }
 0x28a   :  { %6234 = vmatprep.mubr.msk.f32.mxu1 %vm51_vm0, %v4229_v53  ;;  %6387 = vmatpush3.bf16.msra.mxu1 %v7000_v29  ;;  %v4779_v29 = vcombine.high %v4769_v27, %v4769_v27 }
 0x28c   :  { %v4796_v4 = vrot.slane %v4779_v29, %v7005_v33 }
 0x28d   :  { %6235 = vmatmul.mubr.msk.f32.gmra.mrb[60].mxu1 %vm51_vm0, %v4230_v26 }
 0x28e   :  { %6237 = vmatprep.mubr.msk.f32.mxu1 %vm51_vm0, %v4231_v60  ;;  %v4824_v9 = vmul.f32 %v4796_v4, %v4728_v34 }
 0x291   :  { %6238 = vmatmul.mubr.msk.f32.gmra.mrb[62].mxu1 %vm51_vm0, %v4232_v62 }
 0x292   :  { %6262 = vmatprep.mubr.msk.f32.mxu1 %vm51_vm0, %v4821_v2 }
 0x295   :  { %6263 = vmatmul.mubr.msk.f32.vlgmr.msra.gmra.mrb[64].mxu1 %vm51_vm0, %v4822_v3 }
 0x296   :  { %6265 = vmatprep.mubr.msk.f32.mxu1 %vm51_vm0, %v4823_v6 }
 0x299   :  { %6266 = vmatmul.mubr.msk.f32.gmra.mrb[66].mxu1 %vm51_vm0, %v4824_v9 }
 0x29a   :  { %6268 = vmatprep.mubr.msk.f32.mxu1 %vm51_vm0, %v4825_v14 }
 0x29d   :  { %6269 = vmatmul.mubr.msk.f32.gmra.mrb[68].mxu1 %vm51_vm0, %v4826_v59 }
 0x29e   :  { %6271 = vmatprep.mubr.msk.f32.mxu1 %vm51_vm0, %v4827_v16 }
 0x2a1   :  { %6272 = vmatmul.mubr.msk.f32.gmra.mrb[70].mxu1 %vm51_vm0, %v4828_v17 }
 0x2f8   :  { %v6026_v33 = vpop.f32.mrb[8].mxu1 }
 0x2f9   :  { %v787_v23 = vsel %vm779_vm1, %v6026_v33, -inf  ;;  %v740_v25 = vpop.f32.mrb[9].mxu1 }
 0x2fa   :  { %v788_v10 = vrot.slane %v787_v23, 4  ;;  %v780_v28 = vsel %vm779_vm1, %v740_v25, -inf }
 0x2fb   :  { %v781_v30 = vrot.slane %v780_v28, 4 }
 0x2fc   :  { %v789_v32 = vmax.f32 %v787_v23, %v788_v10  ;;  %v7290_v35 = vpop.f32.mrb[10].mxu1 }
 0x2fd   :  { %v782_v37 = vmax.f32 %v780_v28, %v781_v30  ;;  %v801_v36 = vsel %vm779_vm1, %v7290_v35, -inf  ;;  %v7294_v38 = vpop.f32.mrb[11].mxu1 }
 0x2fe   :  { %v790_v39 = vrot.slane %v789_v32, 2  ;;  %v802_v19 = vrot.slane %v801_v36, 4  ;;  %v794_v40 = vsel %vm779_vm1, %v7294_v38, -inf }
 0x2ff   :  { %v783_v42 = vrot.slane %v782_v37, 2  ;;  %v795_v43 = vrot.slane %v794_v40, 4 }
 0x300   :  { %v791_v44 = vmax.f32 %v789_v32, %v790_v39  ;;  %v803_v20 = vmax.f32 %v801_v36, %v802_v19  ;;  %v7298_v46 = vpop.f32.mrb[12].mxu1 }
 0x301   :  { %v784_v48 = vmax.f32 %v782_v37, %v783_v42  ;;  %v796_v50 = vmax.f32 %v794_v40, %v795_v43  ;;  %v815_v51 = vsel %vm779_vm1, %v7298_v46, -inf  ;;  %v7302_v53 = vpop.f32.mrb[13].mxu1 }
 0x302   :  { %v792_v54 = vrot.slane %v791_v44, 1  ;;  %v804_v55 = vrot.slane %v803_v20, 2  ;;  %v816_v26 = vrot.slane %v815_v51, 4  ;;  %v808_v56 = vsel %vm779_vm1, %v7302_v53, -inf }
 0x303   :  { %v785_v27 = vrot.slane %v784_v48, 1  ;;  %v797_v57 = vrot.slane %v796_v50, 2  ;;  %v809_v60 = vrot.slane %v808_v56, 4 }
 0x304   :  { %v793_v24 = vmax.f32 %v791_v44, %v792_v54  ;;  %v805_v61 = vmax.f32 %v803_v20, %v804_v55  ;;  %v817_v62 = vmax.f32 %v815_v51, %v816_v26  ;;  %v7306_v34 = vpop.f32.mrb[14].mxu1 }
 0x305   :  { %v786_v0 = vmax.f32 %v784_v48, %v785_v27  ;;  %v798_v29 = vmax.f32 %v796_v50, %v797_v57  ;;  %v810_v1 = vmax.f32 %v808_v56, %v809_v60  ;;  %v829_v2 = vsel %vm779_vm1, %v7306_v34, -inf  ;;  %v7310_v45 = vpop.f32.mrb[15].mxu1 }
 0x306   :  { %v837_v31 = vsub.f32 %v6026_v33, %v793_v24  ;;  %v806_v3 = vrot.slane %v805_v61, 1  ;;  %v818_v4 = vrot.slane %v817_v62, 2  ;;  %v830_v6 = vrot.slane %v829_v2, 4 }
 0x307   :  { %v836_v5 = vsub.f32 %v740_v25, %v786_v0  ;;  %v799_v41 = vrot.slane %v798_v29, 1  ;;  %v811_v9 = vrot.slane %v810_v1, 2  ;;  %v822_v16 = vsel %vm779_vm1, %v7310_v45, -inf }
 0x308   :  { %v7312_v7 = vpop.f32.mrb[16].mxu1  ;;  %v846_v13 = vmul.f32 1.442695, %v837_v31  ;;  %v807_v14 = vmax.f32 %v805_v61, %v806_v3  ;;  %v819_v47 = vmax.f32 %v817_v62, %v818_v4  ;;  %v831_v15 = vmax.f32 %v829_v2, %v830_v6 }
 0x309   :  { %v7314_v12 = vpop.f32.mrb[17].mxu1  ;;  %v844_v59 = vmul.f32 1.442695, %v836_v5  ;;  %v1389_v17 = vsel %vm779_vm1, %v7312_v7, -inf  ;;  %v800_v23 = vmax.f32 %v798_v29, %v799_v41  ;;  %v812_v25 = vmax.f32 %v810_v1, %v811_v9 }
 0x30a   :  { %v1390_v10 = vrot.slane %v1389_v17, 4  ;;  %6421 = vpow2.f32 %v846_v13  ;;  %v839_v30 = vsub.f32 %v7290_v35, %v807_v14  ;;  %v820_v32 = vrot.slane %v819_v47, 1 }
 0x30b   :  { %v823_v37 = vrot.slane %v822_v16, 4  ;;  %6423 = vpow2.f32 %v844_v59  ;;  %v832_v39 = vrot.slane %v831_v15, 2  ;;  %v838_v40 = vsub.f32 %v7294_v38, %v800_v23 }
 0x30c   :  { %v7320_v33 = vpop.f32.mrb[18].mxu1  ;;  %v1391_v36 = vmax.f32 %v1389_v17, %v1390_v10  ;;  %v813_v42 = vrot.slane %v812_v25, 1  ;;  %v1382_v44 = vsel %vm779_vm1, %v7314_v12, -inf  ;;  %v850_v48 = vmul.f32 1.442695, %v839_v30 }
 0x30d   :  { %v7322_v28 = vpop.f32.mrb[19].mxu1  ;;  %v821_v50 = vmax.f32 %v819_v47, %v820_v32  ;;  %v824_v51 = vmax.f32 %v822_v16, %v823_v37  ;;  %v1403_v35 = vsel %vm779_vm1, %v7320_v33, -inf  ;;  %v1383_v55 = vrot.slane %v1382_v44, 4 }
 0x30e   :  { %v1392_v43 = vrot.slane %v1391_v36, 2  ;;  %v848_v56 = vmul.f32 1.442695, %v838_v40  ;;  %v814_v27 = vmax.f32 %v812_v25, %v813_v42  ;;  %v833_v38 = vmax.f32 %v831_v15, %v832_v39 }
 0x30f   :  { %v1404_v60 = vrot.slane %v1403_v35, 4  ;;  %6425 = vpow2.f32 %v850_v48  ;;  %v841_v24 = vsub.f32 %v7298_v46, %v821_v50  ;;  %v825_v61 = vrot.slane %v824_v51, 2 }
 0x310   :  { %v7325_v19 = vpop.f32.mrb[20].mxu1  ;;  %v1393_v54 = vmax.f32 %v1391_v36, %v1392_v43  ;;  %v1384_v29 = vmax.f32 %v1382_v44, %v1383_v55  ;;  %6427 = vpow2.f32 %v848_v56  ;;  %v840_v2 = vsub.f32 %v7302_v53, %v814_v27 }
 0x311   :  { %v7330_v20 = vpop.f32.mrb[21].mxu1  ;;  %v834_v31 = vrot.slane %v833_v38, 1  ;;  %v1405_v5 = vmax.f32 %v1403_v35, %v1404_v60  ;;  %v854_v46 = vmul.f32 1.442695, %v841_v24  ;;  %v826_v41 = vmax.f32 %v824_v51, %v825_v61 }
 0x312   :  { %v1394_v0 = vrot.slane %v1393_v54, 1  ;;  %v1385_v13 = vrot.slane %v1384_v29, 2  ;;  %v852_v47 = vmul.f32 1.442695, %v840_v2  ;;  %v1396_v23 = vsel %vm779_vm1, %v7322_v28, -inf }
 0x313   :  { %v835_v59 = vmax.f32 %v833_v38, %v834_v31  ;;  %v1406_v17 = vrot.slane %v1405_v5, 2  ;;  %6429 = vpow2.f32 %v854_v46  ;;  %v827_v25 = vrot.slane %v826_v41, 1 }
 0x314   :  { %v7334_v26 = vpop.f32.mrb[22].mxu1  ;;  %v7339_v62 = vpop.eup %6421  ;;  %v1395_v9 = vmax.f32 %v1393_v54, %v1394_v0  ;;  %v1386_v30 = vmax.f32 %v1384_v29, %v1385_v13  ;;  %v1397_v40 = vrot.slane %v1396_v23, 4  ;;  %6431 = vpow2.f32 %v852_v47 }
 0x315   :  { %v7336_v57 = vpop.f32.mrb[23].mxu1  ;;  %v7346_v4 = vpop.eup %6423  ;;  %v867_v6 = vsel %vm779_vm1, %v7339_v62, 0.0  ;;  %v843_v39 = vsub.f32 %v7306_v34, %v835_v59  ;;  %v1407_v44 = vmax.f32 %v1405_v5, %v1406_v17  ;;  %v828_v50 = vmax.f32 %v826_v41, %v827_v25 }
 0x316   :  { %v868_v53 = vrot.slane %v867_v6, 4  ;;  %v860_v16 = vsel %vm779_vm1, %v7346_v4, 0.0  ;;  %v1439_v10 = vsub.f32 %v7312_v7, %v1395_v9  ;;  %v1387_v35 = vrot.slane %v1386_v30, 1 }
 0x317   :  { %v861_v36 = vrot.slane %v860_v16, 4  ;;  %v1417_v54 = vsel %vm779_vm1, %v7325_v19, -inf  ;;  %v858_v56 = vmul.f32 1.442695, %v843_v39  ;;  %v1398_v27 = vmax.f32 %v1396_v23, %v1397_v40 }
 0x318   :  { %v7341_v1 = vpop.f32.mrb[24].mxu1  ;;  %v869_v43 = vadd.f32 %v868_v53, %v867_v6  ;;  %v1448_v51 = vmul.f32 1.442695, %v1439_v10  ;;  %v1408_v61 = vrot.slane %v1407_v44, 1  ;;  %v1418_v29 = vrot.slane %v1417_v54, 4 }
 0x319   :  { %v7344_v3 = vpop.f32.mrb[25].mxu1  ;;  %v7361_v37 = vpop.eup %6425  ;;  %v862_v34 = vadd.f32 %v861_v36, %v860_v16  ;;  %v1410_v2 = vsel %vm779_vm1, %v7330_v20, -inf  ;;  %v842_v31 = vsub.f32 %v7310_v45, %v828_v50  ;;  %v1388_v5 = vmax.f32 %v1386_v30, %v1387_v35 }
 0x31a   :  { %8645 = vst [vmem:[#allocation14_spill] sm:$0xff] %v7361_v37  ;;  %v7366_v48 = vpop.eup %6427  ;;  %v881_v7 = vsel %vm779_vm1, %v7361_v37, 0.0  ;;  %v870_v60 = vrot.slane %v869_v43, 2  ;;  %6433 = vpow2.f32 %v1448_v51  ;;  %v1399_v13 = vrot.slane %v1398_v27, 2 }
 0x31b   :  { %v874_v24 = vsel %vm779_vm1, %v7366_v48, 0.0  ;;  %v882_v0 = vrot.slane %v881_v7, 4  ;;  %v863_v41 = vrot.slane %v862_v34, 2  ;;  %6435 = vpow2.f32 %v858_v56 }
 0x31c   :  { %v7350_v14 = vpop.f32.mrb[26].mxu1  ;;  %v875_v9 = vrot.slane %v874_v24, 4  ;;  %v871_v59 = vadd.f32 %v870_v60, %v869_v43  ;;  %v1409_v53 = vmax.f32 %v1407_v44, %v1408_v61  ;;  %v1411_v16 = vrot.slane %v1410_v2, 4 }
 0x31d   :  { %v7352_v15 = vpop.f32.mrb[27].mxu1  ;;  %v7383_v46 = vpop.eup %6429  ;;  %v1431_v17 = vsel %vm779_vm1, %v7334_v26, -inf  ;;  %v883_v23 = vadd.f32 %v882_v0, %v881_v7  ;;  %v1419_v45 = vmax.f32 %v1417_v54, %v1418_v29  ;;  %v856_v36 = vmul.f32 1.442695, %v842_v31 }
 0x31e   :  { %8646 = vst [vmem:[#allocation15_spill] sm:$0xff] %v7383_v46  ;;  %v1432_v25 = vrot.slane %v1431_v17, 4  ;;  %v7389_v10 = vpop.eup %6431  ;;  %v895_v30 = vsel %vm779_vm1, %v7383_v46, 0.0  ;;  %v1438_v39 = vsub.f32 %v7314_v12, %v1388_v5  ;;  %v1412_v40 = vmax.f32 %v1410_v2, %v1411_v16 }
 0x31f   :  { %8647 = vst [vmem:[#allocation16_spill] sm:$0xff] %v7389_v10  ;;  %v864_v43 = vadd.f32 %v863_v41, %v862_v34  ;;  %v1400_v44 = vmax.f32 %v1398_v27, %v1399_v13  ;;  %v1424_v51 = vsel %vm779_vm1, %v7336_v57, -inf  ;;  %v872_v7 = vrot.slane %v871_v59, 1 }
 0x320   :  { %v7359_v32 = vpop.f32.mrb[28].mxu1  ;;  %v876_v54 = vadd.f32 %v875_v9, %v874_v24  ;;  %v1441_v56 = vsub.f32 %v7320_v33, %v1409_v53  ;;  %v1433_v60 = vmax.f32 %v1431_v17, %v1432_v25  ;;  %v884_v61 = vrot.slane %v883_v23, 2 }
 0x321   :  { %v7364_v42 = vpop.f32.mrb[29].mxu1  ;;  %v896_v0 = vrot.slane %v895_v30, 4  ;;  %v888_v12 = vsel %vm779_vm1, %v7389_v10, 0.0  ;;  %v1420_v29 = vrot.slane %v1419_v45, 2  ;;  %6437 = vpow2.f32 %v856_v36 }
 0x322   :  { %v1446_v2 = vmul.f32 1.442695, %v1438_v39  ;;  %v1413_v34 = vrot.slane %v1412_v40, 2  ;;  %v1425_v27 = vrot.slane %v1424_v51, 4  ;;  %v865_v5 = vrot.slane %v864_v43, 1 }
 0x323   :  { %v1401_v41 = vrot.slane %v1400_v44, 1  ;;  %v1434_v13 = vrot.slane %v1433_v60, 2  ;;  %v1985_v24 = vsel %vm779_vm1, %v7341_v1, -inf  ;;  %v877_v53 = vrot.slane %v876_v54, 2 }
 0x324   :  { %v7372_v55 = vpop.f32.mrb[30].mxu1  ;;  %v7409_v9 = vpop.eup %6433  ;;  %v889_v16 = vrot.slane %v888_v12, 4  ;;  %v1452_v17 = vmul.f32 1.442695, %v1441_v56  ;;  %v1426_v25 = vmax.f32 %v1424_v51, %v1425_v27  ;;  %v873_v39 = vadd.f32 %v872_v7, %v871_v59 }
 0x325   :  { %v7374_v38 = vpop.f32.mrb[31].mxu1  ;;  %v7411_v36 = vpop.eup %6435  ;;  %v885_v18 = vadd.f32 %v884_v61, %v883_v23  ;;  %v897_v22 = vadd.f32 %v896_v0, %v895_v30  ;;  %v1421_v11 = vmax.f32 %v1419_v45, %v1420_v29  ;;  %6439 = vpow2.f32 %v1446_v2 }
 0x326   :  { %8648 = vst [vmem:[#allocation17_spill] sm:$0xff] %v7411_v36  ;;  %v1414_v52 = vmax.f32 %v1412_v40, %v1413_v34  ;;  %v1427_v63 = vrot.slane %v1426_v25, 2  ;;  %v1986_v8 = vrot.slane %v1985_v24, 4  ;;  %v1469_v58 = vsel %vm779_vm1, %v7409_v9, 0.0 }
 0x327   :  { %v1402_v46 = vmax.f32 %v1400_v44, %v1401_v41  ;;  %v1435_v10 = vmax.f32 %v1433_v60, %v1434_v13  ;;  %v1978_v51 = vsel %vm779_vm1, %v7344_v3, -inf  ;;  %v7421_v59 = vadd.f32 %v865_v5, %v864_v43 }
 0x328   :  { %v7381_v6 = vpop.f32.mrb[32].mxu1  ;;  %v878_v23 = vadd.f32 %v877_v53, %v876_v54  ;;  %v909_v45 = vsel %vm779_vm1, %v7411_v36, 0.0  ;;  %6441 = vpow2.f32 %v1452_v17  ;;  %v1422_v30 = vrot.slane %v1421_v11, 1 }
 0x329   :  { %v7385_v47 = vpop.f32.mrb[33].mxu1  ;;  %v1428_v40 = vmax.f32 %v1426_v25, %v1427_v63  ;;  %v1987_v7 = vmax.f32 %v1985_v24, %v1986_v8  ;;  %v1979_v61 = vrot.slane %v1978_v51, 4  ;;  %v886_v0 = vrot.slane %v885_v18, 1 }
 0x32a   :  { %v890_v29 = vadd.f32 %v889_v16, %v888_v12  ;;  %v1470_v44 = vrot.slane %v1469_v58, 4  ;;  %v1415_v60 = vrot.slane %v1414_v52, 1  ;;  %v1440_v34 = vsub.f32 %v7322_v28, %v1402_v46 }
 0x32b   :  { %v1436_v27 = vrot.slane %v1435_v10, 1  ;;  %v1988_v43 = vrot.slane %v1987_v7, 2  ;;  %v1999_v54 = vsel %vm779_vm1, %v7350_v14, -inf  ;;  %v7432_v41 = vpop.eup %6437  ;;  %6443 = vrcp.f32 %v873_v39 }
 0x32c   :  { %v7394_v50 = vpop.f32.mrb[34].mxu1  ;;  %8652 = vst [vmem:[#allocation21_spill] sm:$0xff] %v7432_v41  ;;  %v898_v63 = vrot.slane %v897_v22, 2  ;;  %v910_v8 = vrot.slane %v909_v45, 4  ;;  %v1980_v13 = vmax.f32 %v1978_v51, %v1979_v61  ;;  %v879_v12 = vrot.slane %v878_v23, 1 }
 0x32d   :  { %v7398_v35 = vpop.f32.mrb[35].mxu1  ;;  %v1423_v24 = vmax.f32 %v1421_v11, %v1422_v30  ;;  %v1429_v53 = vrot.slane %v1428_v40, 1  ;;  %v1989_v16 = vmax.f32 %v1987_v7, %v1988_v43  ;;  %v891_v17 = vrot.slane %v890_v29, 2 }
 0x32e   :  { %v1471_v25 = vadd.f32 %v1470_v44, %v1469_v58  ;;  %v1416_v28 = vmax.f32 %v1414_v52, %v1415_v60  ;;  %v2000_v46 = vrot.slane %v1999_v54, 4  ;;  %v7436_v37 = vadd.f32 %v886_v0, %v885_v18 }
 0x32f   :  { %v1992_v39 = vsel %vm779_vm1, %v7352_v15, -inf  ;;  %v7442_v51 = vpop.eup %6439  ;;  %v7444_v11 = vadd.f32 %v898_v63, %v897_v22  ;;  %v1990_v30 = vrot.slane %v1989_v16, 1  ;;  %v1981_v7 = vrot.slane %v1980_v13, 2 }
 0x330   :  { %v7403_v31 = vpop.f32.mrb[36].mxu1  ;;  %8654 = vst [vmem:[#allocation23_spill] sm:$0xff] %v7442_v51  ;;  %v1993_v58 = vrot.slane %v1992_v39, 4  ;;  %v911_v52 = vadd.f32 %v910_v8, %v909_v45  ;;  %v1443_v61 = vsub.f32 %v7325_v19, %v1423_v24  ;;  %v1430_v44 = vmax.f32 %v1428_v40, %v1429_v53 }
 0x331   :  { %v7407_v33 = vpop.f32.mrb[37].mxu1  ;;  %v2013_v18 = vsel %vm779_vm1, %v7359_v32, -inf  ;;  %v902_v0 = vsel %vm779_vm1, %v7432_v41, 0.0  ;;  %v1472_v60 = vrot.slane %v1471_v25, 2  ;;  %v2001_v22 = vmax.f32 %v1999_v54, %v2000_v46 }
 0x332   :  { %v7456_v43 = vadd.f32 %v879_v12, %v878_v23  ;;  %v1462_v19 = vsel %vm779_vm1, %v7442_v51, 0.0  ;;  %v1991_v63 = vmax.f32 %v1989_v16, %v1990_v30  ;;  %v1982_v8 = vmax.f32 %v1980_v13, %v1981_v7 }
 0x333   :  { %v1994_v24 = vmax.f32 %v1992_v39, %v1993_v58  ;;  %v2014_v53 = vrot.slane %v2013_v18, 4  ;;  %v903_v41 = vrot.slane %v902_v0, 4  ;;  %v1444_v54 = vsub.f32 %v7336_v57, %v1430_v44 }
 0x334   :  { %v7413_v49 = vpop.f32.mrb[38].mxu1  ;;  %v1473_v23 = vadd.f32 %v1472_v60, %v1471_v25  ;;  %v2002_v46 = vrot.slane %v2001_v22, 2  ;;  %v1463_v16 = vrot.slane %v1462_v19, 4  ;;  %v2035_v7 = vsub.f32 %v7341_v1, %v1991_v63 }
 0x335   :  { %v7419_v56 = vpop.f32.mrb[39].mxu1  ;;  %v2015_v39 = vmax.f32 %v2013_v18, %v2014_v53  ;;  %v1983_v58 = vrot.slane %v1982_v8, 1  ;;  %v1995_v57 = vrot.slane %v1994_v24, 2  ;;  %v2006_v25 = vsel %vm779_vm1, %v7364_v42, -inf }
 0x336   :  { %8649 = vst [vmem:[#allocation18_spill] sm:$0xff] %v7419_v56  ;;  %v1450_v56 = vmul.f32 1.442695, %v1440_v34  ;;  %v1442_v34 = vsub.f32 %v7330_v20, %v1416_v28  ;;  %v1456_v20 = vmul.f32 1.442695, %v1443_v61  ;;  %v904_v61 = vadd.f32 %v903_v41, %v902_v0 }
 0x337   :  { %v1458_v60 = vmul.f32 1.442695, %v1444_v54  ;;  %v1464_v18 = vadd.f32 %v1463_v16, %v1462_v19  ;;  %v2007_v53 = vrot.slane %v2006_v25, 4  ;;  %v2044_v63 = vmul.f32 1.442695, %v2035_v7 }
 0x338   :  { %v7425_v2 = vpop.f32.mrb[40].mxu1  ;;  %6445 = vpow2.f32 %v1450_v56  ;;  %v1454_v56 = vmul.f32 1.442695, %v1442_v34  ;;  %v1996_v51 = vmax.f32 %v1994_v24, %v1995_v57  ;;  %v2027_v41 = vsel %vm779_vm1, %v7372_v55, -inf }
 0x339   :  { %8650 = vst [vmem:[#allocation19_spill] sm:$0xff] %v7425_v2  ;;  %v7430_v5 = vpop.f32.mrb[41].mxu1  ;;  %6447 = vpow2.f32 %v1456_v20  ;;  %v1465_v16 = vrot.slane %v1464_v18, 2  ;;  %v2028_v24 = vrot.slane %v2027_v41, 4 }
 0x33a   :  { %8651 = vst [vmem:[#allocation20_spill] sm:$0xff] %v7430_v5  ;;  %v1437_v5 = vmax.f32 %v1435_v10, %v1436_v27  ;;  %v7449_v10 = vpop.eup %6441  ;;  %6449 = vpow2.f32 %v1454_v56 }
 0x33b   :  { %8655 = vst [vmem:[#allocation24_spill] sm:$0xff] %v7449_v10  ;;  %v7464_v28 = vpop.eup %6443  ;;  %v1483_v12 = vsel %vm779_vm1, %v7449_v10, 0.0  ;;  %v1474_v10 = vrot.slane %v1473_v23, 1 }
 0x33c   :  { %v7434_v36 = vpop.f32.mrb[42].mxu1  ;;  %v1445_v45 = vsub.f32 %v7334_v26, %v1437_v5  ;;  %v892_v5 = vadd.f32 %v891_v17, %v890_v29  ;;  %v1484_v44 = vrot.slane %v1483_v12, 4  ;;  %v2003_v29 = vmax.f32 %v2001_v22, %v2002_v46 }
 0x33d   :  { %v7440_v2 = vpop.f32.mrb[43].mxu1  ;;  %v1475_v54 = vadd.f32 %v1474_v10, %v1473_v23  ;;  %v2020_v10 = vsel %vm779_vm1, %v7374_v38, -inf }
 0x33e   :  { %8653 = vst [vmem:[#allocation22_spill] sm:$0xff] %v7440_v2  ;;  %v912_v2 = vrot.slane %v911_v52, 2  ;;  %v1460_v13 = vmul.f32 1.442695, %v1445_v45  ;;  %v2016_v45 = vrot.slane %v2015_v39, 2  ;;  %v1485_v22 = vadd.f32 %v1484_v44, %v1483_v12 }
 0x33f   :  { %v893_v20 = vrot.slane %v892_v5, 1  ;;  %v2004_v56 = vrot.slane %v2003_v29, 1  ;;  %v1997_v12 = vrot.slane %v1996_v51, 1 }
 0x340   :  { %v7454_v27 = vpop.f32.mrb[44].mxu1  ;;  %v913_v34 = vadd.f32 %v912_v2, %v911_v52  ;;  %6451 = vpow2.f32 %v1460_v13  ;;  %v900_v2 = vrot.slane %v7444_v11, 1  ;;  %v905_v52 = vrot.slane %v904_v61, 2 }
 0x341   :  { %v7461_v40 = vpop.f32.mrb[45].mxu1  ;;  %6453 = vpow2.f32 %v1458_v60  ;;  %v2017_v13 = vmax.f32 %v2015_v39, %v2016_v45  ;;  %v1486_v60 = vrot.slane %v1485_v22, 2  ;;  %v7496_v39 = vadd.f32 %v893_v20, %v892_v5 }
 0x342   :  { %v7481_v0 = vpop.eup %6445  ;;  %v914_v19 = vrot.slane %v913_v34, 1  ;;  %6455 = vpow2.f32 %v2044_v63  ;;  %v906_v44 = vadd.f32 %v905_v52, %v904_v61  ;;  %v7494_v23 = vadd.f32 %v900_v2, %v7444_v11 }
 0x343   :  { %8659 = vst [vmem:[#allocation28_spill] sm:$0xff] %v7481_v0  ;;  %6457 = vrcp.f32 %v1475_v54  ;;  %v1466_v63 = vadd.f32 %v1465_v16, %v1464_v18  ;;  %v2021_v2 = vrot.slane %v2020_v10, 4  ;;  %v1487_v54 = vadd.f32 %v1486_v60, %v1485_v22 }
 0x344   :  { %v7468_v26 = vpop.f32.mrb[46].mxu1  ;;  %v7512_v20 = vadd.f32 %v914_v19, %v913_v34  ;;  %v907_v18 = vrot.slane %v906_v44, 1 }
 0x345   :  { %v7470_v30 = vpop.f32.mrb[47].mxu1 }
 0x346   :  { %8656 = vst [vmem:[#allocation25_spill] sm:$0xff] %v7470_v30  ;;  %v1984_v30 = vmax.f32 %v1982_v8, %v1983_v58  ;;  %v2008_v8 = vmax.f32 %v2006_v25, %v2007_v53  ;;  %v1476_v58 = vsel %vm779_vm1, %v7481_v0, 0.0  ;;  %v2005_v25 = vmax.f32 %v2003_v29, %v2004_v56  ;;  %v7500_v53 = vpop.eup %6447 }
 0x347   :  { %8663 = vst [vmem:[#allocation32_spill] sm:$0xff] %v7500_v53  ;;  %v7510_v29 = vmul.f32 %v7464_v28, %v7339_v62  ;;  %v1497_v56 = vsel %vm779_vm1, %v7500_v53, 0.0 }
 0x348   :  { %v7475_v17 = vpop.f32.mrb[48].mxu1  ;;  %v2034_v57 = vsub.f32 %v7344_v3, %v1984_v30  ;;  %v1477_v3 = vrot.slane %v1476_v58, 4  ;;  %v2018_v30 = vrot.slane %v2017_v13, 1  ;;  %v2009_v61 = vrot.slane %v2008_v8, 2 }
 0x349   :  { %8657 = vst [vmem:[#allocation26_spill] sm:$0xff] %v7475_v17  ;;  %v7477_v1 = vpop.f32.mrb[49].mxu1  ;;  %v2037_v16 = vsub.f32 %v7350_v14, %v2005_v25  ;;  %v7526_v14 = vadd.f32 %v907_v18, %v906_v44  ;;  %v1498_v25 = vrot.slane %v1497_v56, 4 }
 0x34a   :  { %8658 = vst [vmem:[#allocation27_spill] sm:$0xff] %v7477_v1  ;;  %v2029_v1 = vmax.f32 %v2027_v41, %v2028_v24  ;;  %v7504_v41 = vpop.eup %6449  ;;  %v2042_v24 = vmul.f32 1.442695, %v2034_v57  ;;  %v1478_v62 = vadd.f32 %v1477_v3, %v1476_v58  ;;  %v2019_v28 = vmax.f32 %v2017_v13, %v2018_v30 }
 0x34b   :  { %8665 = vst [vmem:[#allocation34_spill] sm:$0xff] %v7504_v41  ;;  %v7506_v5 = vpop.eup %6451  ;;  %v2010_v34 = vmax.f32 %v2008_v8, %v2009_v61  ;;  %v2048_v58 = vmul.f32 1.442695, %v2037_v16 }
 0x34c   :  { %v7484_v46 = vpop.f32.mrb[50].mxu1  ;;  %v2030_v11 = vrot.slane %v2029_v1, 2  ;;  %8666 = vst [vmem:[#allocation35_spill] sm:$0xff] %v7506_v5  ;;  %6459 = vpow2.f32 %v2042_v24  ;;  %v1511_v13 = vsel %vm779_vm1, %v7506_v5, 0.0  ;;  %v1479_v24 = vrot.slane %v1478_v62, 2 }
 0x34d   :  { %8660 = vst [vmem:[#allocation29_spill] sm:$0xff] %v7484_v46  ;;  %v7486_v7 = vpop.f32.mrb[51].mxu1  ;;  %6461 = vpow2.f32 %v2048_v58 }
 0x34e   :  { %8661 = vst [vmem:[#allocation30_spill] sm:$0xff] %v7486_v7  ;;  %v1998_v7 = vmax.f32 %v1996_v51, %v1997_v12  ;;  %v2581_v51 = vsel %vm779_vm1, %v7381_v6, -inf  ;;  %v7521_v12 = vpop.eup %6453  ;;  %v2031_v60 = vmax.f32 %v2029_v1, %v2030_v11  ;;  %v2039_v1 = vsub.f32 %v7359_v32, %v2019_v28 }
 0x34f   :  { %8668 = vst [vmem:[#allocation37_spill] sm:$0xff] %v7521_v12  ;;  %v7528_v46 = vpop.eup %6455  ;;  %v1504_v8 = vsel %vm779_vm1, %v7521_v12, 0.0 }
 0x350   :  { %v7498_v45 = vpop.f32.mrb[52].mxu1  ;;  %v2036_v22 = vsub.f32 %v7352_v15, %v1998_v7  ;;  %v2011_v7 = vrot.slane %v2010_v34, 1  ;;  %v6458_v30 = vpop.eup %6457  ;;  %v2032_v18 = vrot.slane %v2031_v60, 1  ;;  %v2065_v16 = vsel %vm779_vm1, %v7528_v46, 0.0 }
 0x351   :  { %8662 = vst [vmem:[#allocation31_spill] sm:$0xff] %v7498_v45  ;;  %v7502_v52 = vpop.f32.mrb[53].mxu1  ;;  %v1467_v45 = vrot.slane %v1466_v63, 1  ;;  %v1505_v32 = vrot.slane %v1504_v8, 4 }
 0x352   :  { %8664 = vst [vmem:[#allocation33_spill] sm:$0xff] %v7502_v52  ;;  %v2022_v52 = vmax.f32 %v2020_v10, %v2021_v2  ;;  %v1488_v10 = vrot.slane %v1487_v54, 1  ;;  %v2582_v2 = vrot.slane %v2581_v51, 4  ;;  %v2046_v11 = vmul.f32 1.442695, %v2036_v22 }
 0x353   :  { %v7539_v61 = vadd.f32 %v1467_v45, %v1466_v63  ;;  %v2052_v45 = vmul.f32 1.442695, %v2039_v1  ;;  %v2012_v63 = vmax.f32 %v2010_v34, %v2011_v7  ;;  %v1480_v22 = vadd.f32 %v1479_v24, %v1478_v62 }
 0x354   :  { %v7519_v57 = vpop.f32.mrb[54].mxu1  ;;  %v2023_v53 = vrot.slane %v2022_v52, 2  ;;  %v2583_v3 = vmax.f32 %v2581_v51, %v2582_v2  ;;  %v7543_v5 = vadd.f32 %v1488_v10, %v1487_v54  ;;  %v2066_v54 = vrot.slane %v2065_v16, 4 }
 0x355   :  { %8667 = vst [vmem:[#allocation36_spill] sm:$0xff] %v7519_v57  ;;  %v7523_v19 = vpop.f32.mrb[55].mxu1  ;;  %v1490_v57 = vsel %vm779_vm1, %v7504_v41, 0.0  ;;  %v1499_v41 = vadd.f32 %v1498_v25, %v1497_v56  ;;  %6463 = vpow2.f32 %v2046_v11  ;;  %v2033_v56 = vmax.f32 %v2031_v60, %v2032_v18 }
 0x356   :  { %8669 = vst [vmem:[#allocation38_spill] sm:$0xff] %v7523_v19  ;;  %v2024_v44 = vmax.f32 %v2022_v52, %v2023_v53  ;;  %v1491_v12 = vrot.slane %v1490_v57, 4  ;;  %v2584_v28 = vrot.slane %v2583_v3, 2  ;;  %v2574_v53 = vsel %vm779_vm1, %v7385_v47, -inf  ;;  %v7556_v0 = vpop.eup %6459 }
 0x357   :  { %v7554_v25 = vmul.f32 %v6458_v30, %v7409_v9  ;;  %v1500_v2 = vrot.slane %v1499_v41, 2  ;;  %v2575_v17 = vrot.slane %v2574_v53, 4  ;;  %v1506_v1 = vadd.f32 %v1505_v32, %v1504_v8 }
 0x358   :  { %v7536_v15 = vpop.f32.mrb[56].mxu1  ;;  %v2025_v52 = vrot.slane %v2024_v44, 1  ;;  %v2585_v34 = vmax.f32 %v2583_v3, %v2584_v28  ;;  %v2595_v7 = vsel %vm779_vm1, %v7394_v50, -inf  ;;  %6465 = vpow2.f32 %v2052_v45 }
 0x359   :  { %8670 = vst [vmem:[#allocation39_spill] sm:$0xff] %v7536_v15  ;;  %v7541_v19 = vpop.f32.mrb[57].mxu1  ;;  %v1512_v15 = vrot.slane %v1511_v13, 4  ;;  %v2038_v62 = vsub.f32 %v7364_v42, %v2012_v63  ;;  %v2588_v24 = vsel %vm779_vm1, %v7398_v35, -inf  ;;  %v1481_v30 = vrot.slane %v1480_v22, 1 }
 0x35a   :  { %8671 = vst [vmem:[#allocation40_spill] sm:$0xff] %v7541_v19  ;;  %v1492_v19 = vadd.f32 %v1491_v12, %v1490_v57  ;;  %v2026_v60 = vmax.f32 %v2024_v44, %v2025_v52  ;;  %v2067_v57 = vadd.f32 %v2066_v54, %v2065_v16  ;;  %v2041_v12 = vsub.f32 %v7372_v55, %v2033_v56  ;;  %v7576_v56 = vpop.eup %6461 }
 0x35b   :  { %v1513_v58 = vadd.f32 %v1512_v15, %v1511_v13  ;;  %v2596_v11 = vrot.slane %v2595_v7, 4  ;;  %v7568_v8 = vadd.f32 %v1500_v2, %v1499_v41  ;;  %v2058_v3 = vsel %vm779_vm1, %v7556_v0, 0.0  ;;  %8676 = vst [vmem:[#allocation45_spill] sm:$0xff] %v7576_v56 }
 0x35c   :  { %v7549_v51 = vpop.f32.mrb[58].mxu1  ;;  %v1493_v15 = vrot.slane %v1492_v19, 2  ;;  %v2576_v42 = vmax.f32 %v2574_v53, %v2575_v17  ;;  %v2586_v44 = vrot.slane %v2585_v34, 1  ;;  %v2589_v32 = vrot.slane %v2588_v24, 4 }
 0x35d   :  { %8672 = vst [vmem:[#allocation41_spill] sm:$0xff] %v7549_v51  ;;  %v7551_v10 = vpop.f32.mrb[59].mxu1  ;;  %v2597_v18 = vmax.f32 %v2595_v7, %v2596_v11  ;;  %6467 = vrcp.f32 %v7421_v59  ;;  %v1514_v28 = vrot.slane %v1513_v58, 2  ;;  %v1507_v45 = vrot.slane %v1506_v1, 2 }
 0x35e   :  { %8673 = vst [vmem:[#allocation42_spill] sm:$0xff] %v7551_v10  ;;  %v2050_v16 = vmul.f32 1.442695, %v2038_v62  ;;  %v2040_v55 = vsub.f32 %v7374_v38, %v2026_v60  ;;  %v2068_v63 = vrot.slane %v2067_v57, 2  ;;  %v2059_v52 = vrot.slane %v2058_v3, 4 }
 0x35f   :  { %v2056_v54 = vmul.f32 1.442695, %v2041_v12  ;;  %v2609_v41 = vsel %vm779_vm1, %v7403_v31, -inf  ;;  %v7578_v2 = vadd.f32 %v1481_v30, %v1480_v22  ;;  %v1502_v17 = vrot.slane %v7568_v8, 1  ;;  %v7581_v59 = vpop.eup %6463 }
 0x360   :  { %v7563_v9 = vpop.f32.mrb[60].mxu1  ;;  %v1494_v53 = vadd.f32 %v1493_v15, %v1492_v19  ;;  %v2577_v7 = vrot.slane %v2576_v42, 2  ;;  %8677 = vst [vmem:[#allocation46_spill] sm:$0xff] %v7581_v59  ;;  %v2587_v11 = vmax.f32 %v2585_v34, %v2586_v44  ;;  %v2598_v62 = vrot.slane %v2597_v18, 2 }
 0x361   :  { %8674 = vst [vmem:[#allocation43_spill] sm:$0xff] %v7563_v9  ;;  %v7566_v13 = vpop.f32.mrb[61].mxu1  ;;  %v2590_v9 = vmax.f32 %v2588_v24, %v2589_v32  ;;  %v2610_v38 = vrot.slane %v2609_v41, 4  ;;  %v1515_v60 = vadd.f32 %v1514_v28, %v1513_v58  ;;  %6469 = vpow2.f32 %v2050_v16 }
 0x362   :  { %8675 = vst [vmem:[#allocation44_spill] sm:$0xff] %v7566_v13  ;;  %v1508_v13 = vadd.f32 %v1507_v45, %v1506_v1  ;;  %v2054_v12 = vmul.f32 1.442695, %v2040_v55  ;;  %v2069_v10 = vadd.f32 %v2068_v63, %v2067_v57  ;;  %v2060_v51 = vadd.f32 %v2059_v52, %v2058_v3  ;;  %v7585_v30 = vpop.eup %6465 }
 0x363   :  { %v2079_v22 = vsel %vm779_vm1, %v7576_v56, 0.0  ;;  %6471 = vpow2.f32 %v2056_v54  ;;  %8678 = vst [vmem:[#allocation47_spill] sm:$0xff] %v7585_v30  ;;  %v2072_v19 = vsel %vm779_vm1, %v7581_v59, 0.0  ;;  %v2578_v15 = vmax.f32 %v2576_v42, %v2577_v7 }
 0x364   :  { %v2602_v34 = vsel %vm779_vm1, %v7407_v33, -inf  ;;  %6473 = vrcp.f32 %v7456_v43  ;;  %v2631_v58 = vsub.f32 %v7381_v6, %v2587_v11  ;;  %v2599_v1 = vmax.f32 %v2597_v18, %v2598_v62  ;;  %v7596_v6 = vpop.f32.mrb[62].mxu1 }
 0x365   :  { %v2591_v24 = vrot.slane %v2590_v9, 2  ;;  %v2611_v57 = vmax.f32 %v2609_v41, %v2610_v38  ;;  %v1495_v3 = vrot.slane %v1494_v53, 1  ;;  %v2080_v44 = vrot.slane %v2079_v22, 4  ;;  %8679 = vst [vmem:[#allocation48_spill] sm:$0xff] %v7596_v6  ;;  %v8711_v6 = vld [vmem:[#allocation34_spill] sm:$0xff] }
 0x366   :  { %6475 = vpow2.f32 %v2054_v12  ;;  %v2603_v32 = vrot.slane %v2602_v34, 4  ;;  %v1516_v45 = vrot.slane %v1515_v60, 1  ;;  %v1509_v16 = vrot.slane %v1508_v13, 1 }
 0x367   :  { %v6468_v28 = vpop.eup %6467  ;;  %v2061_v55 = vrot.slane %v2060_v51, 2  ;;  %v2093_v42 = vsel %vm779_vm1, %v7585_v30, 0.0  ;;  %v2070_v63 = vrot.slane %v2069_v10, 1  ;;  %v2073_v52 = vrot.slane %v2072_v19, 4 }
 0x368   :  { %v2579_v54 = vrot.slane %v2578_v15, 1  ;;  %v917_v43 = vmul.f32 %v6468_v28, %v7346_v4  ;;  %v2640_v18 = vmul.f32 1.442695, %v2631_v58  ;;  %v2600_v41 = vrot.slane %v2599_v1, 1 }
 0x369   :  { %v2592_v7 = vmax.f32 %v2590_v9, %v2591_v24  ;;  %v2612_v11 = vrot.slane %v2611_v57, 2  ;;  %v2081_v62 = vadd.f32 %v2080_v44, %v2079_v22  ;;  %v2094_v38 = vrot.slane %v2093_v42, 4 }
 0x36a   :  { %6038 = vmatprep.mubr.msk.f32.mxu0 %vm779_vm1, %v917_v43  ;;  %v2604_v12 = vmax.f32 %v2602_v34, %v2603_v32  ;;  %6477 = vrcp.f32 %v7436_v37  ;;  %v7601_v30 = vadd.f32 %v1502_v17, %v7568_v8  ;;  %v7603_v56 = vadd.f32 %v1495_v3, %v1494_v53  ;;  %v7614_v8 = vpop.f32.mrb[63].mxu1 }
 0x36b   :  { %v7605_v59 = vadd.f32 %v1516_v45, %v1515_v60  ;;  %v2062_v4 = vadd.f32 %v2061_v55, %v2060_v51  ;;  %6039 = vmatmul.mubr.msk.f32.vlgmr.msra.gmra.mrb[16].mxu0 %vm779_vm1, %v7510_v29  ;;  %v7609_v9 = vpop.eup %6469  ;;  %v2071_v22 = vadd.f32 %v2070_v63, %v2069_v10  ;;  %v2074_v58 = vadd.f32 %v2073_v52, %v2072_v19  ;;  %v7623_v28 = vpop.f32.mrb[64].mxu1  ;;  %v8682_v63 = vld [vmem:[#allocation19_spill] sm:$0xff] }
 0x36c   :  { %v2580_v24 = vmax.f32 %v2578_v15, %v2579_v54  ;;  %6071 = vmatpush3.msra.mxu0 %v7283_v21  ;;  %v2623_v37 = vsel %vm779_vm1, %v7413_v49, -inf  ;;  %8680 = vst [vmem:[#allocation49_spill] sm:$0xff] %v7614_v8  ;;  %6479 = vpow2.f32 %v2640_v18  ;;  %v2601_v53 = vmax.f32 %v2599_v1, %v2600_v41  ;;  %8681 = vst [vmem:[#allocation50_spill] sm:$0xff] %v7623_v28  ;;  %v7637_v54 = vpop.f32.mrb[65].mxu1 }
 0x36d   :  { %v7616_v17 = vpop.eup %6471  ;;  %v2593_v51 = vrot.slane %v2592_v7, 1  ;;  %v2613_v60 = vmax.f32 %v2611_v57, %v2612_v11  ;;  %6104 = vmatprep.subr.mxu0 %v7283_v21  ;;  %v7619_v34 = vadd.f32 %v1509_v16, %v1508_v13  ;;  %v2082_v10 = vrot.slane %v2081_v62, 2  ;;  %8683 = vst [vmem:[#allocation19_spill] sm:$0xff] %v7637_v54 }
 0x36e   :  { %v6474_v29 = vpop.eup %6473  ;;  %v2095_v19 = vadd.f32 %v2094_v38, %v2093_v42  ;;  %v2605_v15 = vrot.slane %v2604_v12, 2  ;;  %v2063_v3 = vrot.slane %v2062_v4, 1  ;;  %v2624_v32 = vrot.slane %v2623_v37, 4  ;;  %v8684_v38 = vld [vmem:[#allocation18_spill] sm:$0xff] }
 0x36f   :  { %v921_v44 = vmul.f32 %v6474_v29, %v7366_v48  ;;  %6481 = vrcp.f32 %v7496_v39  ;;  %v2075_v1 = vrot.slane %v2074_v58, 2  ;;  %v2086_v21 = vsel %vm779_vm1, %v7609_v9, 0.0 }
 0x370   :  { %v7625_v45 = vpop.eup %6475  ;;  %6483 = vrcp.f32 %v2071_v22  ;;  %v2630_v13 = vsub.f32 %v7385_v47, %v2580_v24  ;;  %v2107_v57 = vsel %vm779_vm1, %v7616_v17, 0.0  ;;  %v2633_v16 = vsub.f32 %v7394_v50, %v2601_v53  ;;  %v8685_v53 = vld [vmem:[#allocation14_spill] sm:$0xff] }
 0x371   :  { %v2594_v48 = vmax.f32 %v2592_v7, %v2593_v51  ;;  %v2614_v55 = vrot.slane %v2613_v60, 1  ;;  %6041 = vmatprep.mubr.msk.f32.mxu0 %vm779_vm1, %v921_v44  ;;  %v2096_v39 = vrot.slane %v2095_v19, 2  ;;  %v2606_v42 = vmax.f32 %v2604_v12, %v2605_v15 }
 0x372   :  { %v3177_v52 = vsel %vm779_vm1, %v8682_v63, -inf  ;;  %6485 = vrcp.f32 %v7494_v23  ;;  %v2087_v43 = vrot.slane %v2086_v21, 4  ;;  %v2100_v47 = vsel %vm779_vm1, %v7625_v45, 0.0 }
 0x373   :  { %v2625_v18 = vmax.f32 %v2623_v37, %v2624_v32  ;;  %v3178_v41 = vrot.slane %v3177_v52, 4  ;;  %v2108_v7 = vrot.slane %v2107_v57, 4  ;;  %v2638_v11 = vmul.f32 1.442695, %v2630_v13 }
 0x374   :  { %v6478_v50 = vpop.eup %6477  ;;  %v2616_v22 = vsel %vm779_vm1, %v8684_v38, -inf  ;;  %6487 = vrcp.f32 %v7526_v14  ;;  %v2644_v12 = vmul.f32 1.442695, %v2633_v16  ;;  %v2632_v24 = vsub.f32 %v7398_v35, %v2594_v48 }
 0x375   :  { %v2615_v23 = vmax.f32 %v2613_v60, %v2614_v55  ;;  %v923_v51 = vmul.f32 %v6478_v50, %v8685_v53  ;;  %v2083_v29 = vadd.f32 %v2082_v10, %v2081_v62  ;;  %v2101_v15 = vrot.slane %v2100_v47, 4 }
 0x376   :  { %v2607_v44 = vrot.slane %v2606_v42, 1  ;;  %v3179_v54 = vmax.f32 %v3177_v52, %v3178_v41  ;;  %v7646_v37 = vpop.eup %6479  ;;  %v7648_v32 = vadd.f32 %v2063_v3, %v2062_v4  ;;  %v2076_v13 = vadd.f32 %v2075_v1, %v2074_v58  ;;  %v8686_v3 = vld [vmem:[#allocation16_spill] sm:$0xff] }
 0x377   :  { %v2626_v28 = vrot.slane %v2625_v18, 2  ;;  %6042 = vmatmul.mubr.msk.f32.gmra.mrb[18].mxu0 %vm779_vm1, %v923_v51  ;;  %v2617_v8 = vrot.slane %v2616_v22, 4  ;;  %v2088_v14 = vadd.f32 %v2087_v43, %v2086_v21  ;;  %v2109_v16 = vadd.f32 %v2108_v7, %v2107_v57 }
 0x378   :  { %6489 = vpow2.f32 %v2638_v11  ;;  %v3180_v35 = vrot.slane %v3179_v54, 2  ;;  %v2097_v48 = vadd.f32 %v2096_v39, %v2095_v19  ;;  %v2642_v62 = vmul.f32 1.442695, %v2632_v24  ;;  %v8687_v39 = vld [vmem:[#allocation20_spill] sm:$0xff]  ;;  %v8689_v24 = vld [vmem:[#allocation15_spill] sm:$0xff] }
 0x379   :  { %v6482_v60 = vpop.eup %6481  ;;  %6491 = vpow2.f32 %v2644_v12  ;;  %v2635_v10 = vsub.f32 %v7403_v31, %v2615_v23  ;;  %v2102_v52 = vadd.f32 %v2101_v15, %v2100_v47  ;;  %v2661_v4 = vsel %vm779_vm1, %v7646_v37, 0.0  ;;  %v7658_v47 = vpop.f32.mrb[66].mxu1 }
 0x37a   :  { %v6484_v55 = vpop.eup %6483  ;;  %v2608_v58 = vmax.f32 %v2606_v42, %v2607_v44  ;;  %v925_v1 = vmul.f32 %v6482_v60, %v8686_v3  ;;  %v2084_v41 = vrot.slane %v2083_v29, 1  ;;  %v2077_v50 = vrot.slane %v2076_v13, 1  ;;  %8688 = vst [vmem:[#allocation18_spill] sm:$0xff] %v7658_v47  ;;  %v8690_v44 = vld [vmem:[#allocation21_spill] sm:$0xff] }
 0x37b   :  { %v2627_v21 = vmax.f32 %v2625_v18, %v2626_v28  ;;  %v2618_v57 = vmax.f32 %v2616_v22, %v2617_v8  ;;  %v2089_v7 = vrot.slane %v2088_v14, 2  ;;  %v2110_v11 = vrot.slane %v2109_v16, 2 }
 0x37c   :  { %v6486_v43 = vpop.eup %6485  ;;  %6044 = vmatprep.mubr.msk.f32.mxu0 %vm779_vm1, %v925_v1  ;;  %v3181_v19 = vmax.f32 %v3179_v54, %v3180_v35  ;;  %v3170_v31 = vsel %vm779_vm1, %v8687_v39, -inf  ;;  %v2662_v12 = vrot.slane %v2661_v4, 4  ;;  %6493 = vpow2.f32 %v2642_v62  ;;  %v7668_v1 = vpop.f32.mrb[67].mxu1 }
 0x37d   :  { %v2648_v42 = vmul.f32 1.442695, %v2635_v10  ;;  %v927_v23 = vmul.f32 %v6486_v43, %v8689_v24  ;;  %v2098_v51 = vrot.slane %v2097_v48, 1  ;;  %v2103_v28 = vrot.slane %v2102_v52, 2  ;;  %8691 = vst [vmem:[#allocation14_spill] sm:$0xff] %v7668_v1 }
 0x37e   :  { %v6488_v53 = vpop.eup %6487  ;;  %v2634_v8 = vsub.f32 %v7407_v33, %v2608_v58  ;;  %v3191_v18 = vsel %vm779_vm1, %v7434_v36, -inf  ;;  %v2628_v22 = vrot.slane %v2627_v21, 1  ;;  %v2619_v54 = vrot.slane %v2618_v57, 2 }
 0x37f   :  { %6045 = vmatmul.mubr.msk.f32.gmra.mrb[20].mxu0 %vm779_vm1, %v927_v23  ;;  %v3171_v15 = vrot.slane %v3170_v31, 4  ;;  %v929_v35 = vmul.f32 %v6488_v53, %v8690_v44  ;;  %v7666_v60 = vadd.f32 %v2084_v41, %v2083_v29  ;;  %v2090_v62 = vadd.f32 %v2089_v7, %v2088_v14 }
 0x380   :  { %v2111_v10 = vadd.f32 %v2110_v11, %v2109_v16  ;;  %v3182_v3 = vrot.slane %v3181_v19, 1  ;;  %v7670_v43 = vadd.f32 %v2077_v50, %v2076_v13  ;;  %v2663_v33 = vadd.f32 %v2662_v12, %v2661_v4  ;;  %v7683_v4 = vpop.f32.mrb[68].mxu1 }
 0x381   :  { %6495 = vpow2.f32 %v2648_v42  ;;  %6047 = vmatprep.mubr.msk.f32.mxu0 %vm779_vm1, %v929_v35  ;;  %v3192_v58 = vrot.slane %v3191_v18, 4  ;;  %v7676_v23 = vmul.f32 %v6484_v55, %v7528_v46  ;;  %v7678_v53 = vadd.f32 %v2098_v51, %v2097_v48  ;;  %8694 = vst [vmem:[#allocation15_spill] sm:$0xff] %v7683_v4  ;;  %v8695_v42 = vld [vmem:[#allocation22_spill] sm:$0xff]  ;;  %v7687_v55 = vpop.f32.mrb[69].mxu1 }
 0x382   :  { %v7673_v24 = vpop.eup %6489  ;;  %v2104_v29 = vadd.f32 %v2103_v28, %v2102_v52  ;;  %v2646_v14 = vmul.f32 1.442695, %v2634_v8  ;;  %v2629_v41 = vmax.f32 %v2627_v21, %v2628_v22  ;;  %v2620_v7 = vmax.f32 %v2618_v57, %v2619_v54  ;;  %8696 = vst [vmem:[#allocation21_spill] sm:$0xff] %v7687_v55 }
 0x383   :  { %8692 = vst [vmem:[#allocation16_spill] sm:$0xff] %v7673_v24  ;;  %v7680_v16 = vpop.eup %6491  ;;  %v3172_v13 = vmax.f32 %v3170_v31, %v3171_v15  ;;  %6497 = vrcp.f32 %v7512_v20  ;;  %v2091_v50 = vrot.slane %v2090_v62, 1  ;;  %v2112_v11 = vrot.slane %v2111_v10, 1 }
 0x384   :  { %8693 = vst [vmem:[#allocation20_spill] sm:$0xff] %v7680_v16  ;;  %v3183_v12 = vmax.f32 %v3181_v19, %v3182_v3  ;;  %v3184_v46 = vsel %vm779_vm1, %v8695_v42, -inf  ;;  %v2664_v48 = vrot.slane %v2663_v33, 2  ;;  %v2654_v52 = vsel %vm779_vm1, %v7673_v24, 0.0 }
 0x385   :  { %v3193_v51 = vmax.f32 %v3191_v18, %v3192_v58  ;;  %6499 = vrcp.f32 %v7539_v61  ;;  %v2105_v21 = vrot.slane %v2104_v29, 1  ;;  %v2675_v20 = vsel %vm779_vm1, %v7680_v16, 0.0 }
 0x386   :  { %v3185_v57 = vrot.slane %v3184_v46, 4  ;;  %v3205_v19 = vsel %vm779_vm1, %v7454_v27, -inf  ;;  %v7696_v31 = vpop.eup %6493  ;;  %6501 = vpow2.f32 %v2646_v14  ;;  %v2637_v28 = vsub.f32 %v7413_v49, %v2629_v41 }
 0x387   :  { %8697 = vst [vmem:[#allocation22_spill] sm:$0xff] %v7696_v31  ;;  %v2621_v8 = vrot.slane %v2620_v7, 1  ;;  %v3173_v22 = vrot.slane %v3172_v13, 2  ;;  %v2655_v54 = vrot.slane %v2654_v52, 4  ;;  %v3227_v18 = vsub.f32 %v8682_v63, %v3183_v12 }
 0x388   :  { %v3206_v15 = vrot.slane %v3205_v19, 4  ;;  %6503 = vrcp.f32 %v7578_v2  ;;  %v7701_v61 = vadd.f32 %v2091_v50, %v2090_v62  ;;  %v7703_v44 = vadd.f32 %v2112_v11, %v2111_v10 }
 0x389   :  { %v2665_v35 = vadd.f32 %v2664_v48, %v2663_v33  ;;  %v3194_v3 = vrot.slane %v3193_v51, 2  ;;  %v2676_v58 = vrot.slane %v2675_v20, 4  ;;  %v2668_v14 = vsel %vm779_vm1, %v7696_v31, 0.0 }
 0x38a   :  { %v3186_v55 = vmax.f32 %v3184_v46, %v3185_v57  ;;  %v3198_v49 = vsel %vm779_vm1, %v7461_v40, -inf  ;;  %v7711_v63 = vadd.f32 %v2105_v21, %v2104_v29  ;;  %v2652_v12 = vmul.f32 1.442695, %v2637_v28  ;;  %v8699_v29 = vld [vmem:[#allocation17_spill] sm:$0xff] }
 0x38b   :  { %v7709_v41 = vpop.eup %6495  ;;  %v2622_v2 = vmax.f32 %v2620_v7, %v2621_v8  ;;  %v3174_v62 = vmax.f32 %v3172_v13, %v3173_v22  ;;  %v2656_v50 = vadd.f32 %v2655_v54, %v2654_v52  ;;  %v3236_v10 = vmul.f32 1.442695, %v3227_v18  ;;  %v7719_v8 = vpop.f32.mrb[70].mxu1 }
 0x38c   :  { %8698 = vst [vmem:[#allocation51_spill] sm:$0xff] %v7709_v41  ;;  %v3207_v11 = vmax.f32 %v3205_v19, %v3206_v15  ;;  %v3219_v33 = vsel %vm779_vm1, %v7468_v26, -inf  ;;  %v2666_v4 = vrot.slane %v2665_v35, 1  ;;  %v2669_v1 = vrot.slane %v2668_v14, 4  ;;  %8700 = vst [vmem:[#allocation17_spill] sm:$0xff] %v7719_v8 }
 0x38d   :  { %v6498_v48 = vpop.eup %6497  ;;  %v3195_v46 = vmax.f32 %v3193_v51, %v3194_v3  ;;  %v3199_v57 = vrot.slane %v3198_v49, 4  ;;  %v2677_v47 = vadd.f32 %v2676_v58, %v2675_v20  ;;  %v2689_v16 = vsel %vm779_vm1, %v7709_v41, 0.0  ;;  %v8701_v51 = vld [vmem:[#allocation23_spill] sm:$0xff] }
 0x38e   :  { %v931_v21 = vmul.f32 %v6498_v48, %v8699_v29  ;;  %v3187_v28 = vrot.slane %v3186_v55, 2  ;;  %6505 = vpow2.f32 %v2652_v12  ;;  %v2636_v13 = vsub.f32 %v8684_v38, %v2622_v2 }
 0x38f   :  { %v6500_v7 = vpop.eup %6499  ;;  %v3175_v52 = vrot.slane %v3174_v62, 1  ;;  %v3220_v19 = vrot.slane %v3219_v33, 4  ;;  %v2657_v22 = vrot.slane %v2656_v50, 2  ;;  %6507 = vpow2.f32 %v3236_v10 }
 0x390   :  { %6048 = vmatmul.mubr.msk.f32.gmra.mrb[22].mxu0 %vm779_vm1, %v931_v21  ;;  %v1519_v20 = vmul.f32 %v6500_v7, %v8701_v51  ;;  %v3208_v54 = vrot.slane %v3207_v11, 2  ;;  %v7723_v18 = vpop.eup %6501  ;;  %v2667_v15 = vadd.f32 %v2666_v4, %v2665_v35  ;;  %v2670_v3 = vadd.f32 %v2669_v1, %v2668_v14  ;;  %v8703_v21 = vld [vmem:[#allocation28_spill] sm:$0xff]  ;;  %v7728_v51 = vpop.f32.mrb[71].mxu1 }
 0x391   :  { %8702 = vst [vmem:[#allocation23_spill] sm:$0xff] %v7723_v18  ;;  %v3196_v58 = vrot.slane %v3195_v46, 1  ;;  %v3200_v48 = vmax.f32 %v3198_v49, %v3199_v57  ;;  %v2678_v29 = vrot.slane %v2677_v47, 2  ;;  %v2690_v38 = vrot.slane %v2689_v16, 4  ;;  %8704 = vst [vmem:[#allocation28_spill] sm:$0xff] %v7728_v51  ;;  %v7741_v49 = vld [vmem:[%s8564_s11] sm:$0xff] }
 0x392   :  { %v6504_v12 = vpop.eup %6503  ;;  %v3188_v2 = vmax.f32 %v3186_v55, %v3187_v28  ;;  %6072 = vmatprep.mubr.msk.f32.mxu0 %vm779_vm1, %v1519_v20  ;;  %6509 = vrcp.f32 %v7543_v5  ;;  %v2650_v10 = vmul.f32 1.442695, %v2636_v13  ;;  %v3176_v8 = vmax.f32 %v3174_v62, %v3175_v52  ;;  %v8705_v55 = vld [vmem:[#allocation25_spill] sm:$0xff] }
 0x393   :  { %v1523_v41 = vmul.f32 %v6504_v12, %v8703_v21  ;;  %v3221_v7 = vmax.f32 %v3219_v33, %v3220_v19  ;;  %v7730_v31 = vadd.f32 %v2657_v22, %v2656_v50  ;;  %v2682_v1 = vsel %vm779_vm1, %v7723_v18, 0.0  ;;  %v8706_v19 = vld [vmem:[#allocation26_spill] sm:$0xff] }
 0x394   :  { %v3209_v4 = vmax.f32 %v3207_v11, %v3208_v54  ;;  %6073 = vmatmul.mubr.msk.f32.vlgmr.msra.gmra.mrb[24].mxu0 %vm779_vm1, %v7554_v25  ;;  %v3212_v35 = vsel %vm779_vm1, %v8705_v55, -inf  ;;  %v2671_v5 = vrot.slane %v2670_v3, 2  ;;  %v3197_v14 = vmax.f32 %v3195_v46, %v3196_v58 }
 0x395   :  { %6105 = vmatpush3.msra.mxu0 %v7741_v49  ;;  %v3201_v62 = vrot.slane %v3200_v48, 2  ;;  %6075 = vmatprep.mubr.msk.f32.mxu0 %vm779_vm1, %v1523_v41  ;;  %v3213_v50 = vrot.slane %v3212_v35, 4  ;;  %6511 = vrcp.f32 %v2667_v15  ;;  %v7745_v11 = vadd.f32 %v2678_v29, %v2677_v47 }
 0x396   :  { %v2691_v25 = vadd.f32 %v2690_v38, %v2689_v16  ;;  %v3189_v33 = vrot.slane %v3188_v2, 1  ;;  %6138 = vmatprep.subr.mxu0 %v7741_v49  ;;  %v2683_v57 = vrot.slane %v2682_v1, 4  ;;  %6513 = vpow2.f32 %v2650_v10 }
 0x397   :  { %v3226_v46 = vsub.f32 %v8687_v39, %v3176_v8  ;;  %v3222_v28 = vrot.slane %v3221_v7, 2  ;;  %v3210_v13 = vrot.slane %v3209_v4, 1  ;;  %v3214_v52 = vmax.f32 %v3212_v35, %v3213_v50  ;;  %v8708_v50 = vld [vmem:[#allocation27_spill] sm:$0xff] }
 0x398   :  { %6515 = vrcp.f32 %v7603_v56  ;;  %v3773_v41 = vsel %vm779_vm1, %v8706_v19, -inf  ;;  %v7752_v22 = vpop.eup %6505  ;;  %v2659_v47 = vrot.slane %v7730_v31, 1  ;;  %v7755_v16 = vadd.f32 %v2671_v5, %v2670_v3 }
 0x399   :  { %8707 = vst [vmem:[#allocation25_spill] sm:$0xff] %v7752_v22  ;;  %v3229_v20 = vsub.f32 %v7434_v36, %v3197_v14  ;;  %v3202_v54 = vmax.f32 %v3200_v48, %v3201_v62  ;;  %v7758_v15 = vpop.eup %6507  ;;  %v2680_v39 = vrot.slane %v7745_v11, 1  ;;  %v2692_v8 = vrot.slane %v2691_v25, 2 }
 0x39a   :  { %v3190_v58 = vmax.f32 %v3188_v2, %v3189_v33  ;;  %v3774_v12 = vrot.slane %v3773_v41, 4  ;;  %v2684_v56 = vadd.f32 %v2683_v57, %v2682_v1  ;;  %v3234_v29 = vmul.f32 1.442695, %v3226_v46  ;;  %v8709_v2 = vld [vmem:[#allocation24_spill] sm:$0xff] }
 0x39b   :  { %v3223_v38 = vmax.f32 %v3221_v7, %v3222_v28  ;;  %v3215_v10 = vrot.slane %v3214_v52, 2  ;;  %v2703_v35 = vsel %vm779_vm1, %v7752_v22, 0.0  ;;  %v3211_v3 = vmax.f32 %v3209_v4, %v3210_v13  ;;  %v8710_v28 = vld [vmem:[#allocation29_spill] sm:$0xff] }
 0x39c   :  { %v6510_v21 = vpop.eup %6509  ;;  %v3775_v5 = vmax.f32 %v3773_v41, %v3774_v12  ;;  %v3766_v36 = vsel %vm779_vm1, %v8708_v50, -inf  ;;  %v3257_v48 = vsel %vm779_vm1, %v7758_v15, 0.0  ;;  %v3240_v14 = vmul.f32 1.442695, %v3229_v20 }
 0x39d   :  { %v3203_v62 = vrot.slane %v3202_v54, 1  ;;  %v1525_v33 = vmul.f32 %v6510_v21, %v8709_v2  ;;  %v3228_v1 = vsub.f32 %v8695_v42, %v3190_v58  ;;  %6517 = vrcp.f32 %v7601_v30 }
 0x39e   :  { %v3776_v7 = vrot.slane %v3775_v5, 2  ;;  %v3767_v57 = vrot.slane %v3766_v36, 4  ;;  %6519 = vpow2.f32 %v3234_v29  ;;  %v3224_v46 = vrot.slane %v3223_v38, 1 }
 0x39f   :  { %6076 = vmatmul.mubr.msk.f32.gmra.mrb[26].mxu0 %vm779_vm1, %v1525_v33  ;;  %v3216_v4 = vmax.f32 %v3214_v52, %v3215_v10  ;;  %v3787_v13 = vsel %vm779_vm1, %v8710_v28, -inf  ;;  %v6512_v41 = vpop.eup %6511  ;;  %v3258_v12 = vrot.slane %v3257_v48, 4  ;;  %v3231_v20 = vsub.f32 %v7454_v27, %v3211_v3 }
 0x3a0   :  { %v3768_v51 = vmax.f32 %v3766_v36, %v3767_v57  ;;  %6521 = vrcp.f32 %v7619_v34  ;;  %v7775_v42 = vpop.eup %6513  ;;  %v2693_v58 = vadd.f32 %v2692_v8, %v2691_v25  ;;  %v2685_v30 = vrot.slane %v2684_v56, 2 }
 0x3a1   :  { %v3204_v21 = vmax.f32 %v3202_v54, %v3203_v62  ;;  %v3777_v29 = vmax.f32 %v3775_v5, %v3776_v7  ;;  %v2704_v22 = vrot.slane %v2703_v35, 4  ;;  %6523 = vpow2.f32 %v3240_v14 }
 0x3a2   :  { %v6516_v2 = vpop.eup %6515  ;;  %v3238_v52 = vmul.f32 1.442695, %v3228_v1  ;;  %v3788_v10 = vrot.slane %v3787_v13, 4  ;;  %v3225_v33 = vmax.f32 %v3223_v38, %v3224_v46  ;;  %v3217_v18 = vrot.slane %v3216_v4, 1 }
 0x3a3   :  { %v1527_v24 = vmul.f32 %v6516_v2, %v8711_v6  ;;  %6525 = vrcp.f32 %v7605_v59  ;;  %v7780_v27 = vadd.f32 %v2659_v47, %v7730_v31  ;;  %v3259_v34 = vadd.f32 %v3258_v12, %v3257_v48  ;;  %v8712_v12 = vld [vmem:[#allocation32_spill] sm:$0xff] }
 0x3a4   :  { %v3244_v3 = vmul.f32 1.442695, %v3231_v20  ;;  %v3769_v25 = vrot.slane %v3768_v51, 2  ;;  %v2673_v54 = vrot.slane %v7755_v16, 1  ;;  %v2696_v8 = vsel %vm779_vm1, %v7775_v42, 0.0 }
 0x3a5   :  { %v3230_v5 = vsub.f32 %v7461_v40, %v3204_v21  ;;  %6078 = vmatprep.mubr.msk.f32.mxu0 %vm779_vm1, %v1527_v24  ;;  %v3778_v38 = vrot.slane %v3777_v29, 1  ;;  %v7788_v6 = vadd.f32 %v2680_v39, %v7745_v11  ;;  %v2694_v59 = vrot.slane %v2693_v58, 1  ;;  %v8713_v39 = vld [vmem:[#allocation30_spill] sm:$0xff] }
 0x3a6   :  { %v2686_v36 = vadd.f32 %v2685_v30, %v2684_v56  ;;  %v3789_v31 = vmax.f32 %v3787_v13, %v3788_v10  ;;  %v2705_v47 = vadd.f32 %v2704_v22, %v2703_v35  ;;  %6527 = vpow2.f32 %v3238_v52 }
 0x3a7   :  { %v3233_v48 = vsub.f32 %v7468_v26, %v3225_v33  ;;  %v3218_v14 = vmax.f32 %v3216_v4, %v3217_v18  ;;  %v6518_v62 = vpop.eup %6517  ;;  %v2697_v1 = vrot.slane %v2696_v8, 4  ;;  %v3260_v7 = vrot.slane %v3259_v34, 2 }
 0x3a8   :  { %6529 = vpow2.f32 %v3244_v3  ;;  %v3770_v57 = vmax.f32 %v3768_v51, %v3769_v25  ;;  %v7791_v40 = vpop.eup %6519  ;;  %v3242_v24 = vmul.f32 1.442695, %v3230_v5  ;;  %v3779_v46 = vmax.f32 %v3777_v29, %v3778_v38  ;;  %v8715_v3 = vld [vmem:[#allocation35_spill] sm:$0xff] }
 0x3a9   :  { %v1529_v11 = vmul.f32 %v6518_v62, %v8712_v12  ;;  %v3780_v56 = vsel %vm779_vm1, %v8713_v39, -inf  ;;  %v7797_v22 = vmul.f32 %v6512_v41, %v7646_v37  ;;  %v7800_v26 = vadd.f32 %v2673_v54, %v7755_v16  ;;  %v8714_v37 = vld [vmem:[#allocation37_spill] sm:$0xff] }
 0x3aa   :  { %v6522_v13 = vpop.eup %6521  ;;  %v7802_v18 = vadd.f32 %v2694_v59, %v2693_v58  ;;  %v3790_v35 = vrot.slane %v3789_v31, 2  ;;  %v2687_v51 = vrot.slane %v2686_v36, 1  ;;  %v2706_v4 = vrot.slane %v2705_v47, 2 }
 0x3ab   :  { %v3248_v20 = vmul.f32 1.442695, %v3233_v48  ;;  %v3232_v30 = vsub.f32 %v8705_v55, %v3218_v14  ;;  %6079 = vmatmul.mubr.msk.f32.gmra.mrb[28].mxu0 %vm779_vm1, %v1529_v11  ;;  %v7806_v21 = vpop.eup %6523  ;;  %v7808_v29 = vadd.f32 %v2697_v1, %v2696_v8  ;;  %v3771_v2 = vrot.slane %v3770_v57, 1 }
 0x3ac   :  { %v1531_v41 = vmul.f32 %v6522_v13, %v8714_v37  ;;  %v3781_v52 = vrot.slane %v3780_v56, 4  ;;  %v7811_v10 = vadd.f32 %v3260_v7, %v3259_v34  ;;  %v3250_v58 = vsel %vm779_vm1, %v7791_v40, 0.0 }
 0x3ad   :  { %v6526_v16 = vpop.eup %6525  ;;  %6531 = vpow2.f32 %v3242_v24  ;;  %v3823_v33 = vsub.f32 %v8706_v19, %v3779_v46  ;;  %v3791_v55 = vmax.f32 %v3789_v31, %v3790_v35  ;;  %v7819_v8 = vadd.f32 %v2687_v51, %v2686_v36  ;;  %v8716_v19 = vld [vmem:[#allocation31_spill] sm:$0xff]  ;;  %v8717_v31 = vld [vmem:[#allocation33_spill] sm:$0xff]  ;;  %v8718_v35 = vld [vmem:[#allocation36_spill] sm:$0xff] }
 0x3ae   :  { %6081 = vmatprep.mubr.msk.f32.mxu0 %vm779_vm1, %v1531_v41  ;;  %v1533_v25 = vmul.f32 %v6526_v16, %v8715_v3  ;;  %v3782_v54 = vmax.f32 %v3780_v56, %v3781_v52  ;;  %6533 = vrcp.f32 %v7648_v32  ;;  %v3271_v34 = vsel %vm779_vm1, %v7806_v21, 0.0 }
 0x3af   :  { %6535 = vpow2.f32 %v3248_v20  ;;  %v3246_v5 = vmul.f32 1.442695, %v3232_v30  ;;  %v3772_v38 = vmax.f32 %v3770_v57, %v3771_v2  ;;  %v3801_v48 = vsel %vm779_vm1, %v8716_v19, -inf }
 0x3b0   :  { %6082 = vmatmul.mubr.msk.f32.gmra.mrb[30].mxu0 %vm779_vm1, %v1533_v25  ;;  %v3783_v59 = vrot.slane %v3782_v54, 2  ;;  %v3794_v14 = vsel %vm779_vm1, %v8717_v31, -inf  ;;  %v7828_v62 = vpop.eup %6527  ;;  %v7830_v32 = vadd.f32 %v2706_v4, %v2705_v47  ;;  %v2699_v36 = vrot.slane %v7808_v29, 2 }
 0x3b1   :  { %v3251_v1 = vrot.slane %v3250_v58, 4  ;;  %v3802_v7 = vrot.slane %v3801_v48, 4  ;;  %v3262_v57 = vrot.slane %v7811_v10, 1  ;;  %v3832_v46 = vmul.f32 1.442695, %v3823_v33 }
 0x3b2   :  { %v7833_v24 = vpop.eup %6529  ;;  %v3792_v12 = vrot.slane %v3791_v55, 1  ;;  %v3795_v11 = vrot.slane %v3794_v14, 4  ;;  %v3272_v56 = vrot.slane %v3271_v34, 4  ;;  %6537 = vrcp.f32 %v7670_v43 }
 0x3b3   :  { %v3803_v13 = vmax.f32 %v3801_v48, %v3802_v7  ;;  %v3815_v51 = vsel %vm779_vm1, %v8718_v35, -inf  ;;  %6539 = vpow2.f32 %v3246_v5  ;;  %v3822_v47 = vsub.f32 %v8708_v50, %v3772_v38  ;;  %v8719_v50 = vld [vmem:[#allocation38_spill] sm:$0xff] }
 0x3b4   :  { %v3784_v4 = vmax.f32 %v3782_v54, %v3783_v59  ;;  %v3796_v20 = vmax.f32 %v3794_v14, %v3795_v11  ;;  %v3264_v30 = vsel %vm779_vm1, %v7828_v62, 0.0  ;;  %v3816_v37 = vrot.slane %v3815_v51, 4 }
 0x3b5   :  { %v3804_v2 = vrot.slane %v3803_v13, 2  ;;  %6541 = vrcp.f32 %v7666_v60  ;;  %v3285_v41 = vsel %vm779_vm1, %v7833_v24, 0.0  ;;  %v3793_v43 = vmax.f32 %v3791_v55, %v3792_v12 }
 0x3b6   :  { %6543 = vpow2.f32 %v3832_v46  ;;  %v3797_v52 = vrot.slane %v3796_v20, 2  ;;  %v3252_v33 = vadd.f32 %v3251_v1, %v3250_v58  ;;  %v3808_v25 = vsel %vm779_vm1, %v8719_v50, -inf }
 0x3b7   :  { %v7845_v16 = vpop.eup %6531  ;;  %v3805_v3 = vmax.f32 %v3803_v13, %v3804_v2  ;;  %6545 = vrcp.f32 %v7701_v61  ;;  %v3273_v5 = vadd.f32 %v3272_v56, %v3271_v34  ;;  %v3265_v38 = vrot.slane %v3264_v30, 4 }
 0x3b8   :  { %v6534_v54 = vpop.eup %6533  ;;  %v3830_v59 = vmul.f32 1.442695, %v3822_v47  ;;  %v3785_v60 = vrot.slane %v3784_v4, 1  ;;  %v3286_v14 = vrot.slane %v3285_v41, 4  ;;  %v3817_v7 = vmax.f32 %v3815_v51, %v3816_v37 }
 0x3b9   :  { %v7850_v48 = vpop.eup %6535  ;;  %v2115_v55 = vmul.f32 %v6534_v54, %v7556_v0  ;;  %v3809_v46 = vrot.slane %v3808_v25, 4  ;;  %v2708_v58 = vrot.slane %v7830_v32, 1  ;;  %v3825_v1 = vsub.f32 %v8710_v28, %v3793_v43 }
 0x3ba   :  { %8720 = vst [vmem:[#allocation26_spill] sm:$0xff] %v7850_v48  ;;  %v3806_v12 = vrot.slane %v3805_v3, 1  ;;  %v3798_v11 = vmax.f32 %v3796_v20, %v3797_v52  ;;  %v7856_v61 = vadd.f32 %v2699_v36, %v7808_v29  ;;  %v3263_v34 = vadd.f32 %v3262_v57, %v7811_v10  ;;  %v8721_v52 = vld [vmem:[#allocation46_spill] sm:$0xff] }
 0x3bb   :  { %v3253_v56 = vrot.slane %v3252_v33, 2  ;;  %v3278_v13 = vsel %vm779_vm1, %v7845_v16, 0.0  ;;  %6106 = vmatprep.mubr.msk.f32.mxu0 %vm779_vm1, %v2115_v55  ;;  %v3299_v0 = vsel %vm779_vm1, %v7850_v48, 0.0  ;;  %6547 = vpow2.f32 %v3830_v59 }
 0x3bc   :  { %v3786_v51 = vmax.f32 %v3784_v4, %v3785_v60  ;;  %6107 = vmatmul.mubr.msk.f32.vlgmr.msra.gmra.mrb[32].mxu0 %vm779_vm1, %v7676_v23  ;;  %v3810_v28 = vmax.f32 %v3808_v25, %v3809_v46  ;;  %v6538_v47 = vpop.eup %6537  ;;  %v3274_v29 = vrot.slane %v3273_v5, 2  ;;  %v3266_v36 = vadd.f32 %v3265_v38, %v3264_v30  ;;  %v8723_v60 = vld [vmem:[#allocation45_spill] sm:$0xff] }
 0x3bd   :  { %v3287_v20 = vadd.f32 %v3286_v14, %v3285_v41  ;;  %6139 = vmatpush3.msra.mxu0 %v7741_v49  ;;  %v3818_v10 = vrot.slane %v3817_v7, 2  ;;  %v7867_v57 = vpop.eup %6539  ;;  %v3836_v2 = vmul.f32 1.442695, %v3825_v1  ;;  %v3807_v37 = vmax.f32 %v3805_v3, %v3806_v12 }
 0x3be   :  { %v3799_v43 = vrot.slane %v3798_v11, 1  ;;  %v2119_v54 = vmul.f32 %v6538_v47, %v8721_v52  ;;  %6172 = vmatprep.subr.mxu0 %v7741_v49  ;;  %v2701_v23 = vrot.slane %v7856_v61, 1  ;;  %6549 = vrcp.f32 %v3263_v34 }
 0x3bf   :  { %v6542_v4 = vpop.eup %6541  ;;  %v3279_v25 = vrot.slane %v3278_v13, 4  ;;  %v3300_v59 = vrot.slane %v3299_v0, 4  ;;  %v3254_v41 = vadd.f32 %v3253_v56, %v3252_v33  ;;  %v3824_v38 = vsub.f32 %v8713_v39, %v3786_v51 }
 0x3c0   :  { %v7872_v30 = vpop.eup %6543  ;;  %6109 = vmatprep.mubr.msk.f32.mxu0 %vm779_vm1, %v2119_v54  ;;  %v2121_v3 = vmul.f32 %v6542_v4, %v8723_v60  ;;  %v3811_v14 = vrot.slane %v3810_v28, 2  ;;  %v3275_v46 = vadd.f32 %v3274_v29, %v3273_v5  ;;  %v3267_v1 = vrot.slane %v3266_v36, 2 }
 0x3c1   :  { %8722 = vst [vmem:[#allocation27_spill] sm:$0xff] %v7872_v30  ;;  %v6546_v55 = vpop.eup %6545  ;;  %v3288_v12 = vrot.slane %v3287_v20, 2  ;;  %v3819_v47 = vmax.f32 %v3817_v7, %v3818_v10  ;;  %6551 = vpow2.f32 %v3836_v2  ;;  %v3827_v34 = vsub.f32 %v8716_v19, %v3807_v37  ;;  %v8724_v7 = vld [vmem:[#allocation39_spill] sm:$0xff] }
 0x3c2   :  { %v3800_v52 = vmax.f32 %v3798_v11, %v3799_v43  ;;  %6110 = vmatmul.mubr.msk.f32.gmra.mrb[34].mxu0 %vm779_vm1, %v2121_v3  ;;  %v2123_v33 = vmul.f32 %v6546_v55, %v7609_v9  ;;  %v3280_v56 = vadd.f32 %v3279_v25, %v3278_v13  ;;  %v3301_v39 = vadd.f32 %v3300_v59, %v3299_v0 }
 0x3c3   :  { %v3292_v51 = vsel %vm779_vm1, %v7867_v57, 0.0  ;;  %v3853_v54 = vsel %vm779_vm1, %v7872_v30, 0.0  ;;  %v3834_v5 = vmul.f32 1.442695, %v3824_v38  ;;  %v3812_v29 = vmax.f32 %v3810_v28, %v3811_v14  ;;  %v8726_v14 = vld [vmem:[#allocation40_spill] sm:$0xff] }
 0x3c4   :  { %6112 = vmatprep.mubr.msk.f32.mxu0 %vm779_vm1, %v2123_v33  ;;  %v4369_v19 = vsel %vm779_vm1, %v8724_v7, -inf  ;;  %6553 = vrcp.f32 %v7678_v53  ;;  %v3255_v11 = vrot.slane %v3254_v41, 1  ;;  %v3276_v10 = vrot.slane %v3275_v46, 1 }
 0x3c5   :  { %v3820_v9 = vrot.slane %v3819_v47, 1  ;;  %6555 = vrcp.f32 %v7711_v63  ;;  %v7889_v13 = vpop.eup %6547  ;;  %v3293_v0 = vrot.slane %v3292_v51, 4  ;;  %v3854_v2 = vrot.slane %v3853_v54, 4 }
 0x3c6   :  { %8725 = vst [vmem:[#allocation24_spill] sm:$0xff] %v7889_v13  ;;  %v3840_v37 = vmul.f32 1.442695, %v3827_v34  ;;  %v3826_v43 = vsub.f32 %v8717_v31, %v3800_v52  ;;  %v3268_v28 = vadd.f32 %v3267_v1, %v3266_v36  ;;  %v3289_v4 = vadd.f32 %v3288_v12, %v3287_v20 }
 0x3c7   :  { %v4370_v25 = vrot.slane %v4369_v19, 4  ;;  %6557 = vrcp.f32 %v7703_v44  ;;  %v3281_v59 = vrot.slane %v3280_v56, 2  ;;  %v3302_v38 = vrot.slane %v3301_v39, 2 }
 0x3c8   :  { %6559 = vpow2.f32 %v3834_v5  ;;  %v3813_v53 = vrot.slane %v3812_v29, 1  ;;  %v6550_v60 = vpop.eup %6549  ;;  %v3846_v63 = vsel %vm779_vm1, %v7889_v13, 0.0  ;;  %v3821_v3 = vmax.f32 %v3819_v47, %v3820_v9 }
 0x3c9   :  { %v4362_v55 = vsel %vm779_vm1, %v8726_v14, -inf  ;;  %6561 = vrcp.f32 %v7780_v27  ;;  %v3294_v31 = vadd.f32 %v3293_v0, %v3292_v51  ;;  %v3855_v36 = vadd.f32 %v3854_v2, %v3853_v54 }
 0x3ca   :  { %6563 = vpow2.f32 %v3840_v37  ;;  %v3838_v20 = vmul.f32 1.442695, %v3826_v43  ;;  %v7901_v44 = vadd.f32 %v2708_v58, %v7830_v32  ;;  %v7904_v1 = vadd.f32 %v2701_v23, %v7856_v61 }
 0x3cb   :  { %v7906_v12 = vadd.f32 %v3255_v11, %v3254_v41  ;;  %v4371_v47 = vmax.f32 %v4369_v19, %v4370_v25  ;;  %v7908_v34 = vpop.eup %6551  ;;  %v7910_v52 = vadd.f32 %v3276_v10, %v3275_v46  ;;  %v3847_v27 = vrot.slane %v3846_v63, 4  ;;  %v8728_v46 = vld [vmem:[#allocation47_spill] sm:$0xff]  ;;  %v8729_v10 = vld [vmem:[#allocation41_spill] sm:$0xff] }
 0x3cc   :  { %8727 = vst [vmem:[#allocation29_spill] sm:$0xff] %v7908_v34  ;;  %v3814_v33 = vmax.f32 %v3812_v29, %v3813_v53  ;;  %v4363_v51 = vrot.slane %v4362_v55, 4  ;;  %v3269_v54 = vrot.slane %v3268_v28, 1  ;;  %v3290_v5 = vrot.slane %v3289_v4, 1 }
 0x3cd   :  { %v3282_v9 = vadd.f32 %v3281_v59, %v3280_v56  ;;  %v3829_v0 = vsub.f32 %v8718_v35, %v3821_v3  ;;  %v3303_v58 = vadd.f32 %v3302_v38, %v3301_v39  ;;  %v3295_v2 = vrot.slane %v3294_v31, 2 }
 0x3ce   :  { %v6554_v32 = vpop.eup %6553  ;;  %v3856_v61 = vrot.slane %v3855_v36, 2  ;;  %6565 = vpow2.f32 %v3838_v20  ;;  %v3867_v41 = vsel %vm779_vm1, %v7908_v34, 0.0  ;;  %v4372_v19 = vrot.slane %v4371_v47, 2 }
 0x3cf   :  { %v6556_v23 = vpop.eup %6555  ;;  %v2125_v11 = vmul.f32 %v6554_v32, %v8728_v46  ;;  %v4383_v29 = vsel %vm779_vm1, %v8729_v10, -inf  ;;  %v3848_v37 = vadd.f32 %v3847_v27, %v3846_v63  ;;  %v3828_v56 = vsub.f32 %v8719_v50, %v3814_v33 }
 0x3d0   :  { %v4364_v43 = vmax.f32 %v4362_v55, %v4363_v51  ;;  %v2127_v35 = vmul.f32 %v6556_v23, %v7625_v45  ;;  %v7921_v25 = vmul.f32 %v6550_v60, %v7758_v15  ;;  %v7923_v59 = vadd.f32 %v3269_v54, %v3268_v28  ;;  %v8731_v55 = vld [vmem:[#allocation42_spill] sm:$0xff] }
 0x3d1   :  { %v6558_v39 = vpop.eup %6557  ;;  %v7925_v38 = vadd.f32 %v3290_v5, %v3289_v4  ;;  %v3844_v53 = vmul.f32 1.442695, %v3829_v0  ;;  %6113 = vmatmul.mubr.msk.f32.gmra.mrb[36].mxu0 %vm779_vm1, %v2125_v11  ;;  %v3857_v20 = vadd.f32 %v3856_v61, %v3855_v36  ;;  %v3868_v63 = vrot.slane %v3867_v41, 4  ;;  %v8733_v61 = vld [vmem:[#allocation16_spill] sm:$0xff] }
 0x3d2   :  { %v7928_v3 = vpop.eup %6559  ;;  %6115 = vmatprep.mubr.msk.f32.mxu0 %vm779_vm1, %v2127_v35  ;;  %v4384_v50 = vrot.slane %v4383_v29, 4  ;;  %v4376_v45 = vsel %vm779_vm1, %v8731_v55, -inf  ;;  %v3283_v15 = vrot.slane %v3282_v9, 1  ;;  %v3304_v60 = vrot.slane %v3303_v58, 1 }
 0x3d3   :  { %8730 = vst [vmem:[#allocation34_spill] sm:$0xff] %v7928_v3  ;;  %v6562_v27 = vpop.eup %6561  ;;  %v4373_v28 = vmax.f32 %v4371_v47, %v4372_v19  ;;  %v2129_v4 = vmul.f32 %v6558_v39, %v7616_v17  ;;  %v3296_v51 = vadd.f32 %v3295_v2, %v3294_v31  ;;  %v3849_v54 = vrot.slane %v3848_v37, 2  ;;  %v8734_v19 = vld [vmem:[#allocation44_spill] sm:$0xff] }
 0x3d4   :  { %v7934_v33 = vpop.eup %6563  ;;  %v3842_v5 = vmul.f32 1.442695, %v3828_v56  ;;  %v4365_v0 = vrot.slane %v4364_v43, 2  ;;  %v3860_v36 = vsel %vm779_vm1, %v7928_v3, 0.0  ;;  %6567 = vpow2.f32 %v3844_v53 }
 0x3d5   :  { %8732 = vst [vmem:[#allocation32_spill] sm:$0xff] %v7934_v33  ;;  %6116 = vmatmul.mubr.msk.f32.gmra.mrb[38].mxu0 %vm779_vm1, %v2129_v4  ;;  %v4377_v32 = vrot.slane %v4376_v45, 4  ;;  %v2711_v23 = vmul.f32 %v6562_v27, %v8733_v61  ;;  %v3858_v46 = vrot.slane %v3857_v20, 1  ;;  %v3869_v11 = vadd.f32 %v3868_v63, %v3867_v41 }
 0x3d6   :  { %v4385_v47 = vmax.f32 %v4383_v29, %v4384_v50  ;;  %v4390_v17 = vsel %vm779_vm1, %v8734_v19, -inf  ;;  %v7942_v35 = vadd.f32 %v3283_v15, %v3282_v9  ;;  %v7944_v31 = vadd.f32 %v3304_v60, %v3303_v58  ;;  %v8736_v50 = vld [vmem:[#allocation43_spill] sm:$0xff] }
 0x3d7   :  { %v3881_v2 = vsel %vm779_vm1, %v7934_v33, 0.0  ;;  %v4374_v56 = vrot.slane %v4373_v28, 1  ;;  %6140 = vmatprep.mubr.msk.f32.mxu0 %vm779_vm1, %v2711_v23  ;;  %v3297_v53 = vrot.slane %v3296_v51, 1  ;;  %v3861_v27 = vrot.slane %v3860_v36, 4 }
 0x3d8   :  { %v7949_v39 = vpop.eup %6565  ;;  %6569 = vpow2.f32 %v3842_v5  ;;  %v4366_v41 = vmax.f32 %v4364_v43, %v4365_v0  ;;  %v3850_v29 = vadd.f32 %v3849_v54, %v3848_v37  ;;  %v4378_v63 = vmax.f32 %v4376_v45, %v4377_v32  ;;  %v8737_v37 = vld [vmem:[#allocation48_spill] sm:$0xff] }
 0x3d9   :  { %8735 = vst [vmem:[#allocation30_spill] sm:$0xff] %v7949_v39  ;;  %v4397_v9 = vsel %vm779_vm1, %v8736_v50, -inf  ;;  %6141 = vmatmul.mubr.msk.f32.vlgmr.msra.gmra.mrb[40].mxu0 %vm779_vm1, %v7797_v22  ;;  %v4391_v58 = vrot.slane %v4390_v17, 4  ;;  %v3859_v15 = vadd.f32 %v3858_v46, %v3857_v20  ;;  %v3870_v60 = vrot.slane %v3869_v11, 2  ;;  %v8738_v20 = vld [vmem:[#allocation49_spill] sm:$0xff] }
 0x3da   :  { %v3882_v4 = vrot.slane %v3881_v2, 4  ;;  %v4386_v61 = vrot.slane %v4385_v47, 2  ;;  %6173 = vmatpush3.msra.mxu0 %v7741_v49  ;;  %v3874_v23 = vsel %vm779_vm1, %v7949_v39, 0.0  ;;  %v4375_v5 = vmax.f32 %v4373_v28, %v4374_v56 }
 0x3db   :  { %6571 = vrcp.f32 %v7800_v26  ;;  %v4411_v43 = vsel %vm779_vm1, %v8737_v37, -inf  ;;  %6206 = vmatprep.subr.mxu0 %v7741_v49  ;;  %v3862_v45 = vadd.f32 %v3861_v27, %v3860_v36  ;;  %v4367_v22 = vrot.slane %v4366_v41, 1 }
 0x3dc   :  { %v4398_v54 = vrot.slane %v4397_v9, 4  ;;  %v4404_v0 = vsel %vm779_vm1, %v8738_v20, -inf  ;;  %v3851_v32 = vrot.slane %v3850_v29, 1  ;;  %v4379_v46 = vrot.slane %v4378_v63, 2 }
 0x3dd   :  { %v4392_v33 = vmax.f32 %v4390_v17, %v4391_v58  ;;  %6573 = vrcp.f32 %v7788_v6  ;;  %v3883_v34 = vadd.f32 %v3882_v4, %v3881_v2  ;;  %v3875_v28 = vrot.slane %v3874_v23, 4 }
 0x3de   :  { %v4412_v56 = vrot.slane %v4411_v43, 4  ;;  %6575 = vrcp.f32 %v7819_v8  ;;  %v7966_v26 = vpop.eup %6567  ;;  %v7968_v39 = vadd.f32 %v3297_v53, %v3296_v51  ;;  %v4419_v49 = vsub.f32 %v8724_v7, %v4375_v5 }
 0x3df   :  { %8739 = vst [vmem:[#allocation37_spill] sm:$0xff] %v7966_v26  ;;  %v4387_v36 = vmax.f32 %v4385_v47, %v4386_v61  ;;  %v4405_v27 = vrot.slane %v4404_v0, 4  ;;  %v3871_v3 = vadd.f32 %v3870_v60, %v3869_v11  ;;  %v3863_v13 = vrot.slane %v3862_v45, 2 }
 0x3e0   :  { %v4368_v30 = vmax.f32 %v4366_v41, %v4367_v22  ;;  %v4399_v48 = vmax.f32 %v4397_v9, %v4398_v54  ;;  %6577 = vrcp.f32 %v3859_v15  ;;  %v7971_v17 = vadd.f32 %v3851_v32, %v3850_v29  ;;  %v8741_v54 = vld [vmem:[#allocation22_spill] sm:$0xff] }
 0x3e1   :  { %v4380_v6 = vmax.f32 %v4378_v63, %v4379_v46  ;;  %v4393_v2 = vrot.slane %v4392_v33, 2  ;;  %v3884_v8 = vrot.slane %v3883_v34, 2  ;;  %v3876_v4 = vadd.f32 %v3875_v28, %v3874_v23  ;;  %v8742_v46 = vld [vmem:[#allocation50_spill] sm:$0xff] }
 0x3e2   :  { %v7973_v58 = vpop.eup %6569  ;;  %v3895_v51 = vsel %vm779_vm1, %v7966_v26, 0.0  ;;  %v4413_v53 = vmax.f32 %v4411_v43, %v4412_v56  ;;  %v4428_v7 = vmul.f32 1.442695, %v4419_v49  ;;  %v4388_v47 = vrot.slane %v4387_v36, 1 }
 0x3e3   :  { %8740 = vst [vmem:[#allocation35_spill] sm:$0xff] %v7973_v58  ;;  %v4406_v61 = vmax.f32 %v4404_v0, %v4405_v27  ;;  %6579 = vrcp.f32 %v7802_v18  ;;  %v3872_v11 = vrot.slane %v3871_v3, 1  ;;  %v7978_v41 = vadd.f32 %v3863_v13, %v3862_v45 }
 0x3e4   :  { %v4418_v29 = vsub.f32 %v8726_v14, %v4368_v30  ;;  %v4400_v63 = vrot.slane %v4399_v48, 2  ;;  %v3896_v15 = vrot.slane %v3895_v51, 4  ;;  %v3888_v60 = vsel %vm779_vm1, %v7973_v58, 0.0 }
 0x3e5   :  { %v6572_v9 = vpop.eup %6571  ;;  %v4381_v23 = vrot.slane %v4380_v6, 1  ;;  %v4394_v5 = vmax.f32 %v4392_v33, %v4393_v2  ;;  %v7983_v22 = vadd.f32 %v3884_v8, %v3883_v34  ;;  %v3877_v43 = vrot.slane %v3876_v4, 2  ;;  %v8743_v33 = vld [vmem:[#allocation20_spill] sm:$0xff] }
 0x3e6   :  { %v2715_v0 = vmul.f32 %v6572_v9, %v8741_v54  ;;  %v4414_v32 = vrot.slane %v4413_v53, 2  ;;  %6581 = vpow2.f32 %v4428_v7  ;;  %v4389_v13 = vmax.f32 %v4387_v36, %v4388_v47  ;;  %v8744_v47 = vld [vmem:[#allocation23_spill] sm:$0xff] }
 0x3e7   :  { %v6574_v18 = vpop.eup %6573  ;;  %v4407_v45 = vrot.slane %v4406_v61, 2  ;;  %v4965_v30 = vsel %vm779_vm1, %v8742_v46, -inf  ;;  %v3889_v28 = vrot.slane %v3888_v60, 4  ;;  %v4426_v56 = vmul.f32 1.442695, %v4418_v29 }
 0x3e8   :  { %v6576_v14 = vpop.eup %6575  ;;  %v4401_v49 = vmax.f32 %v4399_v48, %v4400_v63  ;;  %6143 = vmatprep.mubr.msk.f32.mxu0 %vm779_vm1, %v2715_v0  ;;  %v2717_v34 = vmul.f32 %v6574_v18, %v8743_v33  ;;  %v7990_v27 = vadd.f32 %v3872_v11, %v3871_v3  ;;  %v3865_v2 = vrot.slane %v7978_v41, 1  ;;  %v8746_v18 = vld [vmem:[#allocation18_spill] sm:$0xff] }
 0x3e9   :  { %v4382_v8 = vmax.f32 %v4380_v6, %v4381_v23  ;;  %v4395_v9 = vrot.slane %v4394_v5, 1  ;;  %v3897_v7 = vadd.f32 %v3896_v15, %v3895_v51  ;;  %v4415_v36 = vmax.f32 %v4413_v53, %v4414_v32  ;;  %v8745_v23 = vld [vmem:[#allocation19_spill] sm:$0xff] }
 0x3ea   :  { %6144 = vmatmul.mubr.msk.f32.gmra.mrb[42].mxu0 %vm779_vm1, %v2717_v34  ;;  %v2719_v54 = vmul.f32 %v6576_v14, %v8744_v47  ;;  %v4966_v26 = vrot.slane %v4965_v30, 4  ;;  %v7995_v58 = vpop.eup %6577  ;;  %v3886_v48 = vrot.slane %v7983_v22, 1  ;;  %v3878_v29 = vadd.f32 %v3877_v43, %v3876_v4 }
 0x3eb   :  { %v4421_v63 = vsub.f32 %v8729_v10, %v4389_v13  ;;  %v4408_v3 = vmax.f32 %v4406_v61, %v4407_v45  ;;  %v3890_v11 = vadd.f32 %v3889_v28, %v3888_v60  ;;  %6583 = vpow2.f32 %v4426_v56  ;;  %v8747_v10 = vld [vmem:[#allocation51_spill] sm:$0xff] }
 0x3ec   :  { %v4402_v0 = vrot.slane %v4401_v49, 1  ;;  %6146 = vmatprep.mubr.msk.f32.mxu0 %vm779_vm1, %v2719_v54  ;;  %v4967_v6 = vmax.f32 %v4965_v30, %v4966_v26  ;;  %v4420_v53 = vsub.f32 %v8731_v55, %v4382_v8  ;;  %v4396_v15 = vmax.f32 %v4394_v5, %v4395_v9  ;;  %v8748_v26 = vld [vmem:[#allocation14_spill] sm:$0xff] }
 0x3ed   :  { %v6580_v51 = vpop.eup %6579  ;;  %v4958_v32 = vsel %vm779_vm1, %v8745_v23, -inf  ;;  %v4979_v14 = vsel %vm779_vm1, %v8746_v18, -inf  ;;  %v4416_v4 = vrot.slane %v4415_v36, 1  ;;  %v4409_v13 = vrot.slane %v4408_v3, 1 }
 0x3ee   :  { %v4968_v43 = vrot.slane %v4967_v6, 2  ;;  %v2721_v61 = vmul.f32 %v6580_v51, %v8747_v10  ;;  %v4959_v60 = vrot.slane %v4958_v32, 4  ;;  %6585 = vrcp.f32 %v7904_v1 }
 0x3ef   :  { %v4980_v45 = vrot.slane %v4979_v14, 4  ;;  %v4972_v30 = vsel %vm779_vm1, %v8748_v26, -inf  ;;  %v3898_v55 = vrot.slane %v3897_v7, 2  ;;  %v4403_v5 = vmax.f32 %v4401_v49, %v4402_v0 }
 0x3f0   :  { %6147 = vmatmul.mubr.msk.f32.gmra.mrb[44].mxu0 %vm779_vm1, %v2721_v61  ;;  %v4960_v28 = vmax.f32 %v4958_v32, %v4959_v60  ;;  %6587 = vrcp.f32 %v7901_v44  ;;  %v8011_v56 = vpop.eup %6581  ;;  %v4969_v33 = vmax.f32 %v4967_v6, %v4968_v43  ;;  %v4973_v8 = vrot.slane %v4972_v30, 4 }
 0x3f1   :  { %v4981_v34 = vmax.f32 %v4979_v14, %v4980_v45  ;;  %6589 = vrcp.f32 %v7906_v12  ;;  %v3891_v9 = vrot.slane %v3890_v11, 2  ;;  %v4430_v1 = vmul.f32 1.442695, %v4420_v53 }
 0x3f2   :  { %v4417_v47 = vmax.f32 %v4415_v36, %v4416_v4  ;;  %v4961_v54 = vrot.slane %v4960_v28, 2  ;;  %v8015_v51 = vadd.f32 %v3865_v2, %v7978_v41  ;;  %v3879_v49 = vrot.slane %v3878_v29, 1 }
 0x3f3   :  { %v4422_v0 = vsub.f32 %v8734_v19, %v4396_v15  ;;  %v4410_v32 = vmax.f32 %v4408_v3, %v4409_v13  ;;  %v4449_v44 = vsel %vm779_vm1, %v8011_v56, 0.0  ;;  %v4432_v10 = vmul.f32 1.442695, %v4421_v63 }
 0x3f4   :  { %v4423_v6 = vsub.f32 %v8736_v50, %v4403_v5  ;;  %v4974_v14 = vmax.f32 %v4972_v30, %v4973_v8  ;;  %v8022_v12 = vadd.f32 %v3886_v48, %v7983_v22  ;;  %v4970_v53 = vrot.slane %v4969_v33, 1  ;;  %v8749_v5 = vld [vmem:[#allocation15_spill] sm:$0xff] }
 0x3f5   :  { %v4962_v36 = vmax.f32 %v4960_v28, %v4961_v54  ;;  %v4982_v4 = vrot.slane %v4981_v34, 2  ;;  %v8024_v43 = vpop.eup %6583  ;;  %v3899_v41 = vadd.f32 %v3898_v55, %v3897_v7  ;;  %v3892_v2 = vadd.f32 %v3891_v9, %v3890_v11 }
 0x3f6   :  { %6591 = vpow2.f32 %v4430_v1  ;;  %v4425_v19 = vsub.f32 %v8737_v37, %v4417_v47  ;;  %v4450_v3 = vrot.slane %v4449_v44, 4  ;;  %v4434_v15 = vmul.f32 1.442695, %v4422_v0 }
 0x3f7   :  { %v4424_v63 = vsub.f32 %v8738_v20, %v4410_v32  ;;  %v4963_v61 = vrot.slane %v4962_v36, 1  ;;  %v8028_v50 = vadd.f32 %v3879_v49, %v3878_v29  ;;  %6593 = vpow2.f32 %v4432_v10  ;;  %v8751_v32 = vld [vmem:[#allocation21_spill] sm:$0xff] }
 0x3f8   :  { %v4436_v22 = vmul.f32 1.442695, %v4423_v6  ;;  %v4975_v48 = vrot.slane %v4974_v14, 2  ;;  %v6586_v60 = vpop.eup %6585  ;;  %v4971_v13 = vmax.f32 %v4969_v33, %v4970_v53  ;;  %v4983_v30 = vmax.f32 %v4981_v34, %v4982_v4  ;;  %v8750_v34 = vld [vmem:[#allocation25_spill] sm:$0xff] }
 0x3f9   :  { %v4964_v45 = vmax.f32 %v4962_v36, %v4963_v61  ;;  %v4993_v7 = vsel %vm779_vm1, %v8749_v5, -inf  ;;  %v3900_v55 = vrot.slane %v3899_v41, 1  ;;  %v3893_v37 = vrot.slane %v3892_v2, 1  ;;  %v8752_v61 = vld [vmem:[#allocation17_spill] sm:$0xff] }
 0x3fa   :  { %v6588_v11 = vpop.eup %6587  ;;  %v4440_v28 = vmul.f32 1.442695, %v4425_v19  ;;  %v2723_v8 = vmul.f32 %v6586_v60, %v7775_v42  ;;  %v8033_v9 = vadd.f32 %v4450_v3, %v4449_v44  ;;  %v4442_v29 = vsel %vm779_vm1, %v8024_v43, 0.0 }
 0x3fb   :  { %v6590_v20 = vpop.eup %6589  ;;  %6595 = vpow2.f32 %v4434_v15  ;;  %v4438_v1 = vmul.f32 1.442695, %v4424_v63  ;;  %v5014_v33 = vsub.f32 %v8745_v23, %v4964_v45  ;;  %v2725_v47 = vmul.f32 %v6588_v11, %v8750_v34 }
 0x3fc   :  { %6149 = vmatprep.mubr.msk.f32.mxu0 %vm779_vm1, %v2723_v8  ;;  %v4976_v54 = vmax.f32 %v4974_v14, %v4975_v48  ;;  %v4994_v49 = vrot.slane %v4993_v7, 4  ;;  %6597 = vpow2.f32 %v4436_v22  ;;  %v5015_v0 = vsub.f32 %v8742_v46, %v4971_v13 }
 0x3fd   :  { %v4984_v42 = vrot.slane %v4983_v30, 1  ;;  %v4986_v44 = vsel %vm779_vm1, %v8751_v32, -inf  ;;  %v8043_v10 = vadd.f32 %v3900_v55, %v3899_v41  ;;  %6599 = vpow2.f32 %v4440_v28  ;;  %6150 = vmatmul.mubr.msk.f32.gmra.mrb[46].mxu0 %vm779_vm1, %v2725_v47 }
 0x3fe   :  { %v4977_v6 = vrot.slane %v4976_v54, 1  ;;  %v3307_v23 = vmul.f32 %v6590_v20, %v7791_v40  ;;  %v8047_v53 = vadd.f32 %v3893_v37, %v3892_v2  ;;  %v4452_v14 = vrot.slane %v8033_v9, 2 }
 0x3ff   :  { %v4443_v36 = vrot.slane %v4442_v29, 4  ;;  %6601 = vpow2.f32 %v4438_v1  ;;  %v5022_v46 = vmul.f32 1.442695, %v5014_v33  ;;  %v4995_v41 = vmax.f32 %v4993_v7, %v4994_v49 }
 0x400   :  { %v8050_v4 = vpop.eup %6591  ;;  %v4978_v19 = vmax.f32 %v4976_v54, %v4977_v6  ;;  %6174 = vmatprep.mubr.msk.f32.mxu0 %vm779_vm1, %v3307_v23  ;;  %v4987_v3 = vrot.slane %v4986_v44, 4  ;;  %v5024_v15 = vmul.f32 1.442695, %v5015_v0  ;;  %v4985_v63 = vmax.f32 %v4983_v30, %v4984_v42 }
 0x401   :  { %6603 = vrcp.f32 %v7923_v59  ;;  %v5007_v40 = vsel %vm779_vm1, %v8752_v61, -inf  ;;  %v8056_v2 = vpop.eup %6593  ;;  %v4996_v48 = vrot.slane %v4995_v41, 2  ;;  %6175 = vmatmul.mubr.msk.f32.vlgmr.msra.gmra.mrb[48].mxu0 %vm779_vm1, %v7921_v25  ;;  %v8061_v45 = vadd.f32 %v4443_v36, %v4442_v29  ;;  %v8068_v59 = vld [vmem:[%s8564_s11] sm:$0xff] }
 0x402   :  { %v5016_v22 = vsub.f32 %v8748_v26, %v4978_v19  ;;  %v4988_v60 = vmax.f32 %v4986_v44, %v4987_v3  ;;  %v5008_v13 = vrot.slane %v5007_v40, 4  ;;  %v4456_v30 = vsel %vm779_vm1, %v8050_v4, 0.0  ;;  %6207 = vmatpush3.msra.mxu0 %v8068_v59  ;;  %v8753_v26 = vld [vmem:[#allocation28_spill] sm:$0xff] }
 0x403   :  { %6605 = vrcp.f32 %v7910_v52  ;;  %v5000_v7 = vsel %vm779_vm1, %v8753_v26, -inf  ;;  %v4997_v25 = vmax.f32 %v4995_v41, %v4996_v48  ;;  %6240 = vmatprep.subr.mxu0 %v8068_v59  ;;  %v5017_v28 = vsub.f32 %v8746_v18, %v4985_v63 }
 0x404   :  { %6607 = vpow2.f32 %v5022_v46  ;;  %v4989_v11 = vrot.slane %v4988_v60, 2  ;;  %v5009_v55 = vmax.f32 %v5007_v40, %v5008_v13  ;;  %v5026_v8 = vmul.f32 1.442695, %v5016_v22 }
 0x405   :  { %v8075_v37 = vpop.eup %6595  ;;  %v5001_v20 = vrot.slane %v5000_v7, 4  ;;  %6609 = vrcp.f32 %v7942_v35  ;;  %v4463_v52 = vsel %vm779_vm1, %v8056_v2, 0.0  ;;  %v4998_v29 = vrot.slane %v4997_v25, 1 }
 0x406   :  { %6611 = vpow2.f32 %v5024_v15  ;;  %v4990_v1 = vmax.f32 %v4988_v60, %v4989_v11  ;;  %v8081_v33 = vpop.eup %6597  ;;  %v4457_v34 = vrot.slane %v4456_v30, 4  ;;  %v5010_v47 = vrot.slane %v5009_v55, 2 }
 0x407   :  { %v5002_v54 = vmax.f32 %v5000_v7, %v5001_v20  ;;  %6613 = vrcp.f32 %v7925_v38  ;;  %v8084_v49 = vpop.eup %6599  ;;  %v4470_v18 = vsel %vm779_vm1, %v8075_v37, 0.0  ;;  %v4999_v0 = vmax.f32 %v4997_v25, %v4998_v29 }
 0x408   :  { %v4991_v35 = vrot.slane %v4990_v1, 1  ;;  %6615 = vrcp.f32 %v7968_v39  ;;  %v5028_v44 = vmul.f32 1.442695, %v5017_v28  ;;  %v5011_v6 = vmax.f32 %v5009_v55, %v5010_v47 }
 0x409   :  { %v8089_v42 = vpop.eup %6601  ;;  %6617 = vpow2.f32 %v5026_v8  ;;  %v5003_v23 = vrot.slane %v5002_v54, 2  ;;  %v4464_v36 = vrot.slane %v4463_v52, 4  ;;  %v5019_v46 = vsub.f32 %v8749_v5, %v4999_v0 }
 0x40a   :  { %v4992_v19 = vmax.f32 %v4990_v1, %v4991_v35  ;;  %6619 = vrcp.f32 %v7944_v31  ;;  %v4445_v41 = vrot.slane %v8061_v45, 2  ;;  %v4477_v3 = vsel %vm779_vm1, %v8081_v33, 0.0 }
 0x40b   :  { %v6604_v38 = vpop.eup %6603  ;;  %v5012_v15 = vrot.slane %v5011_v6, 1  ;;  %v5004_v39 = vmax.f32 %v5002_v54, %v5003_v23  ;;  %v4458_v63 = vadd.f32 %v4457_v34, %v4456_v30  ;;  %v4471_v40 = vrot.slane %v4470_v18, 4 }
 0x40c   :  { %v4484_v22 = vsel %vm779_vm1, %v8089_v42, 0.0  ;;  %v5018_v48 = vsub.f32 %v8751_v32, %v4992_v19  ;;  %6621 = vpow2.f32 %v5028_v44  ;;  %v3311_v5 = vmul.f32 %v6604_v38, %v7828_v62 }
 0x40d   :  { %v6606_v60 = vpop.eup %6605  ;;  %v5013_v31 = vmax.f32 %v5011_v6, %v5012_v15  ;;  %v5005_v13 = vrot.slane %v5004_v39, 1  ;;  %v4465_v25 = vadd.f32 %v4464_v36, %v4463_v52  ;;  %v4478_v11 = vrot.slane %v4477_v3, 4 }
 0x40e   :  { %v8100_v7 = vpop.eup %6607  ;;  %v5032_v55 = vmul.f32 1.442695, %v5019_v46  ;;  %v5030_v28 = vmul.f32 1.442695, %v5018_v48  ;;  %v4491_v30 = vsel %vm779_vm1, %v8084_v49, 0.0  ;;  %6177 = vmatprep.mubr.msk.f32.mxu0 %vm779_vm1, %v3311_v5  ;;  %v3313_v20 = vmul.f32 %v6606_v60, %v7806_v21 }
 0x40f   :  { %v6610_v8 = vpop.eup %6609  ;;  %v5021_v32 = vsub.f32 %v8752_v61, %v5013_v31  ;;  %v5006_v29 = vmax.f32 %v5004_v39, %v5005_v13  ;;  %v4472_v1 = vadd.f32 %v4471_v40, %v4470_v18  ;;  %v4485_v34 = vrot.slane %v4484_v22, 4 }
 0x410   :  { %v8107_v62 = vpop.eup %6611  ;;  %6623 = vpow2.f32 %v5030_v28  ;;  %v3315_v52 = vmul.f32 %v6610_v8, %v7845_v16  ;;  %v4446_v54 = vadd.f32 %v4445_v41, %v8061_v45  ;;  %v4459_v0 = vrot.slane %v4458_v63, 2  ;;  %6178 = vmatmul.mubr.msk.f32.gmra.mrb[50].mxu0 %vm779_vm1, %v3313_v20 }
 0x411   :  { %v6614_v47 = vpop.eup %6613  ;;  %v5036_v35 = vmul.f32 1.442695, %v5021_v32  ;;  %v5020_v44 = vsub.f32 %v8753_v26, %v5006_v29  ;;  %v4479_v6 = vadd.f32 %v4478_v11, %v4477_v3  ;;  %v4492_v21 = vrot.slane %v4491_v30, 4  ;;  %v8755_v32 = vld [vmem:[#allocation27_spill] sm:$0xff] }
 0x412   :  { %v6616_v61 = vpop.eup %6615  ;;  %v5038_v23 = vsel %vm779_vm1, %v8100_v7, 0.0  ;;  %6625 = vpow2.f32 %v5032_v55  ;;  %6180 = vmatprep.mubr.msk.f32.mxu0 %vm779_vm1, %v3315_v52  ;;  %v3317_v45 = vmul.f32 %v6614_v47, %v7833_v24  ;;  %v4453_v26 = vadd.f32 %v4452_v14, %v8033_v9  ;;  %v8754_v14 = vld [vmem:[#allocation26_spill] sm:$0xff] }
 0x413   :  { %v8116_v18 = vpop.eup %6617  ;;  %6627 = vpow2.f32 %v5036_v35  ;;  %v5034_v16 = vmul.f32 1.442695, %v5020_v44  ;;  %v3319_v36 = vmul.f32 %v6616_v61, %v7867_v57  ;;  %v4473_v19 = vrot.slane %v4472_v1, 2 }
 0x414   :  { %v6620_v46 = vpop.eup %6619  ;;  %v4486_v38 = vadd.f32 %v4485_v34, %v4484_v22  ;;  %6629 = vrcp.f32 %v7971_v17  ;;  %v4447_v41 = vrot.slane %v4446_v54, 1  ;;  %v4466_v3 = vrot.slane %v4465_v25, 2  ;;  %6181 = vmatmul.mubr.msk.f32.gmra.mrb[52].mxu0 %vm779_vm1, %v3317_v45 }
 0x415   :  { %v5039_v15 = vrot.slane %v5038_v23, 4  ;;  %6631 = vpow2.f32 %v5034_v16  ;;  %v4460_v39 = vadd.f32 %v4459_v0, %v4458_v63  ;;  %v4480_v40 = vrot.slane %v4479_v6, 2  ;;  %6183 = vmatprep.mubr.msk.f32.mxu0 %vm779_vm1, %v3319_v36  ;;  %v8756_v16 = vld [vmem:[#allocation24_spill] sm:$0xff] }
 0x416   :  { %v5045_v24 = vsel %vm779_vm1, %v8107_v62, 0.0  ;;  %6633 = vrcp.f32 %v8015_v51  ;;  %v8129_v57 = vpop.eup %6621  ;;  %v4493_v9 = vadd.f32 %v4492_v21, %v4491_v30  ;;  %v5052_v17 = vsel %vm779_vm1, %v8116_v18, 0.0 }
 0x417   :  { %v3321_v22 = vmul.f32 %v6620_v46, %v8754_v14  ;;  %6635 = vrcp.f32 %v7990_v27  ;;  %v4454_v48 = vrot.slane %v4453_v26, 1  ;;  %v4474_v63 = vadd.f32 %v4473_v19, %v4472_v1 }
 0x418   :  { %v4487_v60 = vrot.slane %v4486_v38, 2  ;;  %6637 = vrcp.f32 %v8028_v50  ;;  %v4448_v5 = vadd.f32 %v4447_v41, %v4446_v54  ;;  %v4467_v31 = vadd.f32 %v4466_v3, %v4465_v25 }
 0x419   :  { %v5046_v13 = vrot.slane %v5045_v24, 4  ;;  %v5040_v11 = vadd.f32 %v5039_v15, %v5038_v23  ;;  %6184 = vmatmul.mubr.msk.f32.gmra.mrb[54].mxu0 %vm779_vm1, %v3321_v22  ;;  %v4461_v55 = vrot.slane %v4460_v39, 1  ;;  %v5059_v28 = vsel %vm779_vm1, %v8129_v57, 0.0 }
 0x41a   :  { %v8137_v51 = vpop.eup %6623  ;;  %v5053_v8 = vrot.slane %v5052_v17, 4  ;;  %6639 = vrcp.f32 %v8047_v53  ;;  %v4481_v27 = vadd.f32 %v4480_v40, %v4479_v6  ;;  %v4494_v30 = vrot.slane %v4493_v9, 2 }
 0x41b   :  { %v5066_v50 = vsel %vm779_vm1, %v8137_v51, 0.0  ;;  %6641 = vrcp.f32 %v8022_v12  ;;  %v3905_v20 = vmul.f32 %v7995_v58, %v8755_v32  ;;  %v4455_v29 = vadd.f32 %v4454_v48, %v4453_v26  ;;  %v8758_v48 = vld [vmem:[#allocation30_spill] sm:$0xff] }
 0x41c   :  { %v8145_v25 = vpop.eup %6625  ;;  %v4475_v1 = vrot.slane %v4474_v63, 1  ;;  %v4488_v34 = vadd.f32 %v4487_v60, %v4486_v38  ;;  %v4468_v47 = vrot.slane %v4467_v31, 1  ;;  %v5047_v54 = vadd.f32 %v5046_v13, %v5045_v24 }
 0x41d   :  { %v8149_v52 = vpop.eup %6627  ;;  %v5041_v53 = vrot.slane %v5040_v11, 2  ;;  %v5060_v0 = vrot.slane %v5059_v28, 4  ;;  %v4462_v44 = vadd.f32 %v4461_v55, %v4460_v39  ;;  %v5054_v61 = vadd.f32 %v5053_v8, %v5052_v17  ;;  %v8757_v39 = vld [vmem:[#allocation34_spill] sm:$0xff]  ;;  %v8759_v55 = vld [vmem:[#allocation29_spill] sm:$0xff] }
 0x41e   :  { %v6630_v35 = vpop.eup %6629  ;;  %v5067_v6 = vrot.slane %v5066_v50, 4  ;;  %6643 = vrcp.f32 %v4448_v5  ;;  %v4482_v21 = vrot.slane %v4481_v27, 1  ;;  %v4495_v23 = vadd.f32 %v4494_v30, %v4493_v9 }
 0x41f   :  { %v8151_v12 = vpop.eup %6631  ;;  %v3903_v58 = vmul.f32 %v6630_v35, %v8756_v16  ;;  %6645 = vrcp.f32 %v8043_v10  ;;  %v4476_v36 = vadd.f32 %v4475_v1, %v4474_v63  ;;  %v4489_v46 = vrot.slane %v4488_v34, 1 }
 0x420   :  { %v6634_v45 = vpop.eup %6633  ;;  %v5073_v26 = vsel %vm779_vm1, %v8145_v25, 0.0  ;;  %v5080_v19 = vsel %vm779_vm1, %v8151_v12, 0.0  ;;  %v5048_v41 = vrot.slane %v5047_v54, 2  ;;  %v5042_v3 = vadd.f32 %v5041_v53, %v5040_v11  ;;  %v8760_v53 = vld [vmem:[#allocation35_spill] sm:$0xff] }
 0x421   :  { %v6636_v38 = vpop.eup %6635  ;;  %v5061_v15 = vadd.f32 %v5060_v0, %v5059_v28  ;;  %6208 = vmatprep.mubr.msk.f32.mxu0 %vm779_vm1, %v3903_v58  ;;  %v3907_v40 = vmul.f32 %v6634_v45, %v8757_v39  ;;  %v5055_v9 = vrot.slane %v5054_v61, 2  ;;  %v5068_v10 = vadd.f32 %v5067_v6, %v5066_v50 }
 0x422   :  { %v6638_v24 = vpop.eup %6637  ;;  %v5081_v17 = vrot.slane %v5080_v19, 4  ;;  %6209 = vmatmul.mubr.msk.f32.vlgmr.msra.gmra.mrb[56].mxu0 %vm779_vm1, %v3905_v20  ;;  %6647 = vrcp.f32 %v4462_v44  ;;  %v4469_v14 = vadd.f32 %v4468_v47, %v4467_v31  ;;  %v5074_v22 = vrot.slane %v5073_v26, 4  ;;  %v8761_v44 = vld [vmem:[#allocation32_spill] sm:$0xff] }
 0x423   :  { %6649 = vrcp.f32 %v4455_v29  ;;  %6241 = vmatpush3.msra.mxu0 %v8068_v59  ;;  %6211 = vmatprep.mubr.msk.f32.mxu0 %vm779_vm1, %v3907_v40  ;;  %v3911_v63 = vmul.f32 %v6638_v24, %v8758_v48  ;;  %v4483_v5 = vadd.f32 %v4482_v21, %v4481_v27  ;;  %v4496_v13 = vrot.slane %v4495_v23, 1 }
 0x424   :  { %v6640_v60 = vpop.eup %6639  ;;  %v5087_v11 = vsel %vm779_vm1, %v8149_v52, 0.0  ;;  %v3909_v28 = vmul.f32 %v6636_v38, %v8759_v55  ;;  %6274 = vmatprep.subr.mxu0 %v8068_v59  ;;  %v4490_v30 = vadd.f32 %v4489_v46, %v4488_v34  ;;  %v5049_v31 = vadd.f32 %v5048_v41, %v5047_v54  ;;  %v8762_v41 = vld [vmem:[#allocation37_spill] sm:$0xff] }
 0x425   :  { %v6642_v8 = vpop.eup %6641  ;;  %v5043_v50 = vrot.slane %v5042_v3, 1  ;;  %v5062_v32 = vrot.slane %v5061_v15, 2  ;;  %v5056_v20 = vadd.f32 %v5055_v9, %v5054_v61  ;;  %v5069_v29 = vrot.slane %v5068_v10, 2 }
 0x426   :  { %v5082_v1 = vadd.f32 %v5081_v17, %v5080_v19  ;;  %6212 = vmatmul.mubr.msk.f32.gmra.mrb[58].mxu0 %vm779_vm1, %v3909_v28  ;;  %6651 = vrcp.f32 %v4476_v36  ;;  %v5075_v27 = vadd.f32 %v5074_v22, %v5073_v26  ;;  %v5088_v47 = vrot.slane %v5087_v11, 4 }
 0x427   :  { %6214 = vmatprep.mubr.msk.f32.mxu0 %vm779_vm1, %v3911_v63  ;;  %v3915_v0 = vmul.f32 %v6640_v60, %v8760_v53  ;;  %6653 = vrcp.f32 %v4469_v14  ;;  %v3913_v6 = vmul.f32 %v6642_v8, %v8761_v44  ;;  %v4497_v54 = vadd.f32 %v4496_v13, %v4495_v23  ;;  %v5331_v53 = vld [vmem:[%s8565_s6 + $0x10] sm:$0xff] }
 0x428   :  { %v6644_v35 = vpop.eup %6643  ;;  %v5050_v21 = vrot.slane %v5049_v31, 1  ;;  %v5044_v16 = vadd.f32 %v5043_v50, %v5042_v3  ;;  %v5063_v61 = vadd.f32 %v5062_v32, %v5061_v15  ;;  %v5057_v58 = vrot.slane %v5056_v20, 1 }
 0x429   :  { %v6646_v34 = vpop.eup %6645  ;;  %v5070_v45 = vadd.f32 %v5069_v29, %v5068_v10  ;;  %v5083_v46 = vrot.slane %v5082_v1, 2  ;;  %6655 = vrcp.f32 %v4490_v30  ;;  %v5076_v36 = vrot.slane %v5075_v27, 2 }
 0x42a   :  { %6215 = vmatmul.mubr.msk.f32.gmra.mrb[60].mxu0 %vm779_vm1, %v3913_v6  ;;  %v5089_v26 = vadd.f32 %v5088_v47, %v5087_v11  ;;  %v4499_v19 = vmul.f32 %v6644_v35, %v8024_v43  ;;  %6657 = vrcp.f32 %v4483_v5  ;;  %v3917_v39 = vmul.f32 %v6646_v34, %v8762_v41 }
 0x42b   :  { %6217 = vmatprep.mubr.msk.f32.mxu0 %vm779_vm1, %v3915_v0  ;;  %v5051_v40 = vadd.f32 %v5050_v21, %v5049_v31  ;;  %v5064_v3 = vrot.slane %v5063_v61, 1  ;;  %v5058_v15 = vadd.f32 %v5057_v58, %v5056_v20  ;;  %v5071_v24 = vrot.slane %v5070_v45, 1 }
 0x42c   :  { %v6648_v38 = vpop.eup %6647  ;;  %v5084_v9 = vadd.f32 %v5083_v46, %v5082_v1  ;;  %6659 = vrcp.f32 %v5044_v16  ;;  %v5077_v10 = vadd.f32 %v5076_v36, %v5075_v27  ;;  %v5090_v17 = vrot.slane %v5089_v26, 2 }
 0x42d   :  { %v6650_v23 = vpop.eup %6649  ;;  %v4503_v14 = vmul.f32 %v6648_v38, %v8050_v4  ;;  %6661 = vrcp.f32 %v4497_v54  ;;  %v5072_v63 = vadd.f32 %v5071_v24, %v5070_v45  ;;  %v5065_v5 = vadd.f32 %v5064_v3, %v5063_v61 }
 0x42e   :  { %6218 = vmatmul.mubr.msk.f32.gmra.mrb[62].mxu0 %vm779_vm1, %v3917_v39  ;;  %v4501_v22 = vmul.f32 %v6650_v23, %v8011_v56  ;;  %6663 = vrcp.f32 %v5051_v40  ;;  %v5085_v60 = vrot.slane %v5084_v9, 1  ;;  %v5078_v13 = vrot.slane %v5077_v10, 1 }
 0x42f   :  { %6242 = vmatprep.mubr.msk.f32.mxu0 %vm779_vm1, %v4499_v19  ;;  %6665 = vrcp.f32 %v5058_v15  ;;  %v5091_v11 = vadd.f32 %v5090_v17, %v5089_v26 }
 0x430   :  { %v6652_v43 = vpop.eup %6651  ;;  %v5086_v8 = vadd.f32 %v5085_v60, %v5084_v9  ;;  %6667 = vrcp.f32 %v5072_v63  ;;  %v5079_v30 = vadd.f32 %v5078_v13, %v5077_v10 }
 0x431   :  { %v6654_v48 = vpop.eup %6653  ;;  %v4507_v4 = vmul.f32 %v6652_v43, %v8075_v37  ;;  %v5092_v31 = vrot.slane %v5091_v11, 1  ;;  %6669 = vrcp.f32 %v5065_v5 }
 0x432   :  { %6243 = vmatmul.mubr.msk.f32.vlgmr.msra.gmra.mrb[64].mxu0 %vm779_vm1, %v4501_v22  ;;  %v4505_v28 = vmul.f32 %v6654_v48, %v8056_v2  ;;  %6671 = vrcp.f32 %v5086_v8 }
 0x433   :  { %6275 = vmatpush3.msra.mxu0 %v8068_v59  ;;  %6245 = vmatprep.mubr.msk.f32.mxu0 %vm779_vm1, %v4503_v14  ;;  %v6656_v55 = vpop.eup %6655  ;;  %v5093_v37 = vadd.f32 %v5092_v31, %v5091_v11  ;;  %6673 = vrcp.f32 %v5079_v30 }
 0x434   :  { %v6658_v56 = vpop.eup %6657  ;;  %v4511_v50 = vmul.f32 %v6656_v55, %v8089_v42  ;;  %v5329_v42 = vld [vmem:[%s8565_s6] sm:$0xff] }
 0x435   :  { %v4509_v32 = vmul.f32 %v6658_v56, %v8081_v33  ;;  %v5330_v33 = vld [vmem:[%s8565_s6 + $0x8] sm:$0xff]  ;;  %6675 = vrcp.f32 %v5093_v37 }
 0x436   :  { %6246 = vmatmul.mubr.msk.f32.gmra.mrb[66].mxu0 %vm779_vm1, %v4505_v28  ;;  %v6660_v59 = vpop.eup %6659  ;;  %v6388_v47 = vpack.c.bf16 %v5330_v33, %v5329_v42 }
 0x437   :  { %6248 = vmatprep.mubr.msk.f32.mxu0 %vm779_vm1, %v4507_v4  ;;  %v6662_v20 = vpop.eup %6661  ;;  %v5095_v29 = vmul.f32 %v6660_v59, %v8100_v7  ;;  %v5332_v7 = vld [vmem:[%s8565_s6 + $0x18] sm:$0xff] }
 0x438   :  { %v6664_v2 = vpop.eup %6663  ;;  %v4513_v27 = vmul.f32 %v6662_v20, %v8084_v49  ;;  %v8207_v49 = vld [vmem:[#allocation4] sm:$0xff]  ;;  %v6392_v35 = vpack.c.bf16 %v5332_v7, %v5331_v53  ;;  %6389 = vmatprep.subr.bf16.mxu1 %v6388_v47 }
 0x439   :  { %v6666_v1 = vpop.eup %6665  ;;  %v5097_v21 = vmul.f32 %v6664_v2, %v8107_v62  ;;  %6391 = vmatpush3.bf16.msra.mxu1 %v6388_v47 }
 0x43a   :  { %6249 = vmatmul.mubr.msk.f32.gmra.mrb[68].mxu0 %vm779_vm1, %v4509_v32  ;;  %v5099_v44 = vmul.f32 %v6666_v1, %v8116_v18  ;;  %v6668_v54 = vpop.eup %6667  ;;  %6393 = vmatprep.subr.bf16.mxu1 %v6392_v35 }
 0x43b   :  { %6251 = vmatprep.mubr.msk.f32.mxu0 %vm779_vm1, %v4511_v50  ;;  %v6670_v61 = vpop.eup %6669  ;;  %v5103_v46 = vmul.f32 %v6668_v54, %v8137_v51 }
 0x43c   :  { %v6672_v26 = vpop.eup %6671  ;;  %v5101_v62 = vmul.f32 %v6670_v61, %v8129_v57 }
 0x43d   :  { %6395 = vmatpush3.bf16.msra.mxu1 %v6392_v35  ;;  %v6674_v38 = vpop.eup %6673  ;;  %v5107_v23 = vmul.f32 %v6672_v26, %v8151_v12 }
 0x43e   :  { %6252 = vmatmul.mubr.msk.f32.gmra.mrb[70].mxu0 %vm779_vm1, %v4513_v27  ;;  %v6040_v0 = vpop.f32.mrb[16].mxu0  ;;  %v5105_v3 = vmul.f32 %v6674_v38, %v8145_v25 }
 0x43f   :  { %6276 = vmatprep.mubr.msk.f32.mxu0 %vm779_vm1, %v5095_v29  ;;  %v1062_v6 = vmul.f32 %v6040_v0, %v8207_v49  ;;  %v1022_v34 = vpop.f32.mrb[17].mxu0  ;;  %v6676_v51 = vpop.eup %6675 }
 0x440   :  { %v1061_v16 = vmul.f32 %v1022_v34, %v8207_v49  ;;  %v5109_v43 = vmul.f32 %v6676_v51, %v8149_v52 }
 0x441   :  { %v1076_v58 = vsel %vm51_vm0, %v1062_v6, 0.0 }
 0x442   :  { %6277 = vmatmul.mubr.msk.f32.vlgmr.msra.gmra.mrb[72].mxu0 %vm779_vm1, %v5097_v21  ;;  %v1077_v45 = vrot.slane %v1076_v58, 4  ;;  %v1069_v18 = vsel %vm51_vm0, %v1061_v16, 0.0 }
 0x443   :  { %6279 = vmatprep.mubr.msk.f32.mxu0 %vm779_vm1, %v5099_v44  ;;  %v1070_v36 = vrot.slane %v1069_v18, 4 }
 0x444   :  { %v1078_v19 = vadd.f32 %v1077_v45, %v1076_v58 }
 0x445   :  { %v1071_v41 = vadd.f32 %v1070_v36, %v1069_v18 }
 0x446   :  { %6280 = vmatmul.mubr.msk.f32.gmra.mrb[74].mxu0 %vm779_vm1, %v5101_v62  ;;  %v1079_v39 = vrot.slane %v1078_v19, 2 }
 0x447   :  { %6282 = vmatprep.mubr.msk.f32.mxu0 %vm779_vm1, %v5103_v46  ;;  %v1072_v40 = vrot.slane %v1071_v41, 2 }
 0x448   :  { %v1080_v15 = vadd.f32 %v1079_v39, %v1078_v19  ;;  %v8245_v19 = vld [vmem:[#allocation4 + $0x8] sm:$0xff] }
 0x449   :  { %v1073_v24 = vadd.f32 %v1072_v40, %v1071_v41 }
 0x44a   :  { %6283 = vmatmul.mubr.msk.f32.gmra.mrb[76].mxu0 %vm779_vm1, %v5105_v3  ;;  %v1081_v57 = vrot.slane %v1080_v15, 1  ;;  %v6043_v9 = vpop.f32.mrb[18].mxu0 }
 0x44b   :  { %6285 = vmatprep.mubr.msk.f32.mxu0 %vm779_vm1, %v5107_v23  ;;  %v1074_v10 = vrot.slane %v1073_v24, 1  ;;  %v1064_v17 = vmul.f32 %v6043_v9, %v8207_v49  ;;  %v1032_v14 = vpop.f32.mrb[19].mxu0 }
 0x44c   :  { %v1082_v22 = vadd.f32 %v1081_v57, %v1080_v15  ;;  %v1063_v12 = vmul.f32 %v1032_v14, %v8207_v49 }
 0x44d   :  { %v1075_v25 = vadd.f32 %v1074_v10, %v1073_v24  ;;  %v1090_v48 = vsel %vm51_vm0, %v1064_v17, 0.0 }
 0x44e   :  { %6286 = vmatmul.mubr.msk.f32.gmra.mrb[78].mxu0 %vm779_vm1, %v5109_v43  ;;  %v1091_v63 = vrot.slane %v1090_v48, 4  ;;  %v1083_v60 = vsel %vm51_vm0, %v1063_v12, 0.0 }
 0x44f   :  { %v1134_v5 = vsel %vm1133_vm2, %v1082_v22, %v1075_v25  ;;  %v1084_v13 = vrot.slane %v1083_v60, 4 }
 0x450   :  { %v1092_v11 = vadd.f32 %v1091_v63, %v1090_v48 }
 0x451   :  { %v1085_v4 = vadd.f32 %v1084_v13, %v1083_v60 }
 0x452   :  { %v1093_v55 = vrot.slane %v1092_v11, 2  ;;  %v6046_v28 = vpop.f32.mrb[20].mxu0 }
 0x453   :  { %v1086_v52 = vrot.slane %v1085_v4, 2  ;;  %v1066_v56 = vmul.f32 %v6046_v28, %v8207_v49  ;;  %v1042_v8 = vpop.f32.mrb[21].mxu0 }
 0x454   :  { %v1094_v30 = vadd.f32 %v1093_v55, %v1092_v11  ;;  %v1065_v31 = vmul.f32 %v1042_v8, %v8207_v49 }
 0x455   :  { %v1087_v50 = vadd.f32 %v1086_v52, %v1085_v4  ;;  %v1104_v59 = vsel %vm51_vm0, %v1066_v56, 0.0 }
 0x456   :  { %v1095_v32 = vrot.slane %v1094_v30, 1  ;;  %v1105_v20 = vrot.slane %v1104_v59, 4  ;;  %v1097_v2 = vsel %vm51_vm0, %v1065_v31, 0.0 }
 0x457   :  { %v1088_v37 = vrot.slane %v1087_v50, 1  ;;  %v1098_v29 = vrot.slane %v1097_v2, 4 }
 0x458   :  { %v1106_v1 = vadd.f32 %v1105_v20, %v1104_v59  ;;  %v1096_v33 = vadd.f32 %v1095_v32, %v1094_v30 }
 0x459   :  { %v1089_v27 = vadd.f32 %v1088_v37, %v1087_v50  ;;  %v1099_v42 = vadd.f32 %v1098_v29, %v1097_v2 }
 0x45a   :  { %v1107_v47 = vrot.slane %v1106_v1, 2 }
 0x45b   :  { %v1136_v53 = vsel %vm1135_vm3, %v1089_v27, %v1134_v5  ;;  %v1100_v7 = vrot.slane %v1099_v42, 2 }
 0x45c   :  { %v1108_v0 = vadd.f32 %v1107_v47, %v1106_v1  ;;  %v1138_v35 = vsel %vm1137_vm4, %v1096_v33, %v1136_v53 }
 0x45d   :  { %v1101_v44 = vadd.f32 %v1100_v7, %v1099_v42 }
 0x45e   :  { %v1109_v6 = vrot.slane %v1108_v0, 1 }
 0x45f   :  { %v1102_v34 = vrot.slane %v1101_v44, 1 }
 0x460   :  { %v1110_v21 = vadd.f32 %v1109_v6, %v1108_v0 }
 0x461   :  { %v1103_v54 = vadd.f32 %v1102_v34, %v1101_v44 }
 0x463   :  { %v1140_v16 = vsel %vm1139_vm5, %v1103_v54, %v1138_v35  ;;  %v6049_v61 = vpop.f32.mrb[22].mxu0 }
 0x464   :  { %v1068_v58 = vmul.f32 %v6049_v61, %v8207_v49  ;;  %v1052_v45 = vpop.f32.mrb[23].mxu0  ;;  %v1142_v18 = vsel %vm1141_vm6, %v1110_v21, %v1140_v16 }
 0x465   :  { %v1067_v46 = vmul.f32 %v1052_v45, %v8207_v49 }
 0x466   :  { %v1118_v36 = vsel %vm51_vm0, %v1068_v58, 0.0 }
 0x467   :  { %v1119_v26 = vrot.slane %v1118_v36, 4  ;;  %v1111_v62 = vsel %vm51_vm0, %v1067_v46, 0.0  ;;  %v6074_v38 = vpop.f32.mrb[24].mxu0 }
 0x468   :  { %v1112_v41 = vrot.slane %v1111_v62, 4  ;;  %v1664_v39 = vmul.f32 %v6074_v38, %v8245_v19  ;;  %v1624_v23 = vpop.f32.mrb[25].mxu0 }
 0x469   :  { %v1120_v40 = vadd.f32 %v1119_v26, %v1118_v36  ;;  %v1663_v3 = vmul.f32 %v1624_v23, %v8245_v19 }
 0x46a   :  { %v1113_v15 = vadd.f32 %v1112_v41, %v1111_v62  ;;  %v1678_v51 = vsel %vm51_vm0, %v1664_v39, 0.0 }
 0x46b   :  { %v1121_v24 = vrot.slane %v1120_v40, 2  ;;  %v1679_v49 = vrot.slane %v1678_v51, 4  ;;  %v1671_v57 = vsel %vm51_vm0, %v1663_v3, 0.0 }
 0x46c   :  { %v1114_v9 = vrot.slane %v1113_v15, 2  ;;  %v1672_v10 = vrot.slane %v1671_v57, 4 }
 0x46d   :  { %v1122_v17 = vadd.f32 %v1121_v24, %v1120_v40  ;;  %v1680_v14 = vadd.f32 %v1679_v49, %v1678_v51 }
 0x46e   :  { %v1115_v43 = vadd.f32 %v1114_v9, %v1113_v15  ;;  %v1673_v22 = vadd.f32 %v1672_v10, %v1671_v57 }
 0x46f   :  { %v1123_v12 = vrot.slane %v1122_v17, 1  ;;  %v1681_v25 = vrot.slane %v1680_v14, 2 }
 0x470   :  { %v1116_v48 = vrot.slane %v1115_v43, 1  ;;  %v1674_v63 = vrot.slane %v1673_v22, 2 }
 0x471   :  { %v1682_v60 = vadd.f32 %v1681_v25, %v1680_v14  ;;  %v1124_v4 = vadd.f32 %v1123_v12, %v1122_v17 }
 0x472   :  { %v1117_v5 = vadd.f32 %v1116_v48, %v1115_v43  ;;  %v1675_v13 = vadd.f32 %v1674_v63, %v1673_v22  ;;  %v6077_v11 = vpop.f32.mrb[26].mxu0 }
 0x473   :  { %v1683_v55 = vrot.slane %v1682_v60, 1  ;;  %v1666_v28 = vmul.f32 %v6077_v11, %v8245_v19  ;;  %v1634_v52 = vpop.f32.mrb[27].mxu0 }
 0x474   :  { %v1144_v56 = vsel %vm1143_vm7, %v1117_v5, %v1142_v18  ;;  %v1676_v8 = vrot.slane %v1675_v13, 1  ;;  %v1665_v30 = vmul.f32 %v1634_v52, %v8245_v19 }
 0x475   :  { %v1146_v31 = vsel %vm1145_vm8, %v1124_v4, %v1144_v56  ;;  %v1684_v50 = vadd.f32 %v1683_v55, %v1682_v60  ;;  %v1692_v59 = vsel %vm51_vm0, %v1666_v28, 0.0 }
 0x476   :  { %1148 = vst.msk [vmem:[#allocation5] sm:$0xff] %vm51_vm0, %v1146_v31  ;;  %v1677_v32 = vadd.f32 %v1676_v8, %v1675_v13  ;;  %v1693_v20 = vrot.slane %v1692_v59, 4  ;;  %v1685_v2 = vsel %vm51_vm0, %v1665_v30, 0.0  ;;  %v1750_v13 = vld [vmem:[#allocation4 + $0x10] sm:$0xff] }
 0x477   :  { %v1686_v37 = vrot.slane %v1685_v2, 4 }
 0x478   :  { %v1735_v29 = vsel %vm1133_vm2, %v1684_v50, %v1677_v32  ;;  %v1694_v1 = vadd.f32 %v1693_v20, %v1692_v59 }
 0x479   :  { %v1687_v27 = vadd.f32 %v1686_v37, %v1685_v2 }
 0x47a   :  { %v1695_v42 = vrot.slane %v1694_v1, 2 }
 0x47b   :  { %v1688_v33 = vrot.slane %v1687_v27, 2 }
 0x47c   :  { %v1696_v47 = vadd.f32 %v1695_v42, %v1694_v1 }
 0x47d   :  { %v1689_v53 = vadd.f32 %v1688_v33, %v1687_v27  ;;  %v5321_v7 = vld [vmem:[#allocation5] sm:$0xff] }
 0x47e   :  { %v1697_v0 = vrot.slane %v1696_v47, 1  ;;  %v6080_v35 = vpop.f32.mrb[28].mxu0  ;;  %6296 = vmatprep.mubr.msk.f32.mxu1 %vm51_vm0, %v5321_v7 }
 0x47f   :  { %v1690_v44 = vrot.slane %v1689_v53, 1  ;;  %v1668_v6 = vmul.f32 %v6080_v35, %v8245_v19  ;;  %v1644_v34 = vpop.f32.mrb[29].mxu0 }
 0x480   :  { %v1667_v54 = vmul.f32 %v1644_v34, %v8245_v19  ;;  %v1698_v61 = vadd.f32 %v1697_v0, %v1696_v47 }
 0x481   :  { %v1691_v21 = vadd.f32 %v1690_v44, %v1689_v53  ;;  %v1706_v16 = vsel %vm51_vm0, %v1668_v6, 0.0 }
 0x482   :  { %v1707_v58 = vrot.slane %v1706_v16, 4  ;;  %v1699_v45 = vsel %vm51_vm0, %v1667_v54, 0.0 }
 0x483   :  { %v1736_v18 = vsel %vm1135_vm3, %v1691_v21, %v1735_v29  ;;  %v1700_v46 = vrot.slane %v1699_v45, 4  ;;  %v6083_v36 = vpop.f32.mrb[30].mxu0 }
 0x484   :  { %v1708_v26 = vadd.f32 %v1707_v58, %v1706_v16  ;;  %v1737_v62 = vsel %vm1137_vm4, %v1698_v61, %v1736_v18  ;;  %v1670_v38 = vmul.f32 %v6083_v36, %v8245_v19  ;;  %v1654_v41 = vpop.f32.mrb[31].mxu0 }
 0x485   :  { %v1701_v39 = vadd.f32 %v1700_v46, %v1699_v45  ;;  %v1669_v23 = vmul.f32 %v1654_v41, %v8245_v19 }
 0x486   :  { %v1709_v40 = vrot.slane %v1708_v26, 2  ;;  %v1720_v3 = vsel %vm51_vm0, %v1670_v38, 0.0 }
 0x487   :  { %v1702_v15 = vrot.slane %v1701_v39, 2  ;;  %v1721_v51 = vrot.slane %v1720_v3, 4  ;;  %v1713_v24 = vsel %vm51_vm0, %v1669_v23, 0.0 }
 0x488   :  { %v1710_v49 = vadd.f32 %v1709_v40, %v1708_v26  ;;  %v1714_v57 = vrot.slane %v1713_v24, 4 }
 0x489   :  { %v1703_v9 = vadd.f32 %v1702_v15, %v1701_v39  ;;  %v1722_v10 = vadd.f32 %v1721_v51, %v1720_v3 }
 0x48a   :  { %v1711_v17 = vrot.slane %v1710_v49, 1  ;;  %v1715_v14 = vadd.f32 %v1714_v57, %v1713_v24 }
 0x48b   :  { %v1704_v43 = vrot.slane %v1703_v9, 1  ;;  %v1723_v22 = vrot.slane %v1722_v10, 2 }
 0x48c   :  { %v1716_v12 = vrot.slane %v1715_v14, 2  ;;  %v1712_v63 = vadd.f32 %v1711_v17, %v1710_v49 }
 0x48d   :  { %v1705_v25 = vadd.f32 %v1704_v43, %v1703_v9  ;;  %v1724_v48 = vadd.f32 %v1723_v22, %v1722_v10 }
 0x48e   :  { %v1717_v19 = vadd.f32 %v1716_v12, %v1715_v14 }
 0x48f   :  { %v1738_v60 = vsel %vm1139_vm5, %v1705_v25, %v1737_v62  ;;  %v1725_v5 = vrot.slane %v1724_v48, 1  ;;  %v6108_v11 = vpop.f32.mrb[32].mxu0 }
 0x490   :  { %v1718_v4 = vrot.slane %v1717_v19, 1  ;;  %v1739_v55 = vsel %vm1141_vm6, %v1712_v63, %v1738_v60  ;;  %v2260_v28 = vmul.f32 %v6108_v11, %v1750_v13  ;;  %v2220_v52 = vpop.f32.mrb[33].mxu0 }
 0x491   :  { %v2259_v56 = vmul.f32 %v2220_v52, %v1750_v13  ;;  %v1726_v31 = vadd.f32 %v1725_v5, %v1724_v48 }
 0x492   :  { %v1719_v8 = vadd.f32 %v1718_v4, %v1717_v19  ;;  %v2274_v30 = vsel %vm51_vm0, %v2260_v28, 0.0  ;;  %v8287_v4 = vld [vmem:[#allocation4 + $0x18] sm:$0xff] }
 0x493   :  { %v2275_v50 = vrot.slane %v2274_v30, 4  ;;  %v2267_v59 = vsel %vm51_vm0, %v2259_v56, 0.0 }
 0x494   :  { %v1740_v32 = vsel %vm1143_vm7, %v1719_v8, %v1739_v55  ;;  %v2268_v20 = vrot.slane %v2267_v59, 4 }
 0x495   :  { %v1741_v2 = vsel %vm1145_vm8, %v1726_v31, %v1740_v32  ;;  %v2276_v37 = vadd.f32 %v2275_v50, %v2274_v30  ;;  %v6111_v29 = vpop.f32.mrb[34].mxu0 }
 0x496   :  { %1744 = vst.msk [vmem:[#allocation5 + $0x8] sm:$0xff] %vm51_vm0, %v1741_v2  ;;  %v2269_v1 = vadd.f32 %v2268_v20, %v2267_v59  ;;  %v2262_v27 = vmul.f32 %v6111_v29, %v1750_v13  ;;  %v2230_v42 = vpop.f32.mrb[35].mxu0 }
 0x497   :  { %v2277_v33 = vrot.slane %v2276_v37, 2  ;;  %v2261_v47 = vmul.f32 %v2230_v42, %v1750_v13 }
 0x498   :  { %v2270_v53 = vrot.slane %v2269_v1, 2  ;;  %v2288_v7 = vsel %vm51_vm0, %v2262_v27, 0.0 }
 0x499   :  { %v2278_v0 = vadd.f32 %v2277_v33, %v2276_v37  ;;  %v2289_v35 = vrot.slane %v2288_v7, 4  ;;  %v2281_v44 = vsel %vm51_vm0, %v2261_v47, 0.0 }
 0x49a   :  { %v2271_v6 = vadd.f32 %v2270_v53, %v2269_v1  ;;  %v2282_v34 = vrot.slane %v2281_v44, 4 }
 0x49b   :  { %v2279_v54 = vrot.slane %v2278_v0, 1  ;;  %v2290_v21 = vadd.f32 %v2289_v35, %v2288_v7 }
 0x49c   :  { %v2272_v16 = vrot.slane %v2271_v6, 1  ;;  %v2283_v61 = vadd.f32 %v2282_v34, %v2281_v44 }
 0x49d   :  { %v2280_v58 = vadd.f32 %v2279_v54, %v2278_v0  ;;  %v2291_v45 = vrot.slane %v2290_v21, 2  ;;  %v5322_v18 = vld [vmem:[#allocation5 + $0x8] sm:$0xff] }
 0x49e   :  { %v2273_v46 = vadd.f32 %v2272_v16, %v2271_v6  ;;  %v2284_v36 = vrot.slane %v2283_v61, 2  ;;  %6297 = vmatmul.mubr.msk.f32.vlgmr.msra.gmra.mrb[72].mxu1 %vm51_vm0, %v5322_v18 }
 0x49f   :  { %v2292_v26 = vadd.f32 %v2291_v45, %v2290_v21 }
 0x4a0   :  { %v2331_v62 = vsel %vm1133_vm2, %v2280_v58, %v2273_v46  ;;  %v2285_v38 = vadd.f32 %v2284_v36, %v2283_v61 }
 0x4a1   :  { %v2293_v41 = vrot.slane %v2292_v26, 1 }
 0x4a2   :  { %v2286_v39 = vrot.slane %v2285_v38, 1 }
 0x4a3   :  { %v2294_v3 = vadd.f32 %v2293_v41, %v2292_v26 }
 0x4a4   :  { %v2287_v23 = vadd.f32 %v2286_v39, %v2285_v38  ;;  %v6114_v40 = vpop.f32.mrb[36].mxu0 }
 0x4a5   :  { %v2264_v15 = vmul.f32 %v6114_v40, %v1750_v13  ;;  %v2240_v51 = vpop.f32.mrb[37].mxu0 }
 0x4a6   :  { %v2332_v24 = vsel %vm1135_vm3, %v2287_v23, %v2331_v62  ;;  %v2263_v49 = vmul.f32 %v2240_v51, %v1750_v13 }
 0x4a7   :  { %v2302_v57 = vsel %vm51_vm0, %v2264_v15, 0.0  ;;  %v2333_v9 = vsel %vm1137_vm4, %v2294_v3, %v2332_v24 }
 0x4a8   :  { %v2303_v10 = vrot.slane %v2302_v57, 4  ;;  %v2295_v17 = vsel %vm51_vm0, %v2263_v49, 0.0  ;;  %v6117_v14 = vpop.f32.mrb[38].mxu0 }
 0x4a9   :  { %v2296_v43 = vrot.slane %v2295_v17, 4  ;;  %v2266_v22 = vmul.f32 %v6117_v14, %v1750_v13  ;;  %v2250_v12 = vpop.f32.mrb[39].mxu0 }
 0x4aa   :  { %v2304_v25 = vadd.f32 %v2303_v10, %v2302_v57  ;;  %v2265_v48 = vmul.f32 %v2250_v12, %v1750_v13 }
 0x4ab   :  { %v2297_v63 = vadd.f32 %v2296_v43, %v2295_v17  ;;  %v2316_v19 = vsel %vm51_vm0, %v2266_v22, 0.0 }
 0x4ac   :  { %v2305_v60 = vrot.slane %v2304_v25, 2  ;;  %v2317_v5 = vrot.slane %v2316_v19, 4  ;;  %v2309_v11 = vsel %vm51_vm0, %v2265_v48, 0.0  ;;  %v6142_v55 = vpop.f32.mrb[40].mxu0 }
 0x4ad   :  { %v2298_v28 = vrot.slane %v2297_v63, 2  ;;  %v2310_v52 = vrot.slane %v2309_v11, 4  ;;  %v2856_v56 = vmul.f32 %v6142_v55, %v8287_v4  ;;  %v2816_v8 = vpop.f32.mrb[41].mxu0 }
 0x4ae   :  { %v2306_v30 = vadd.f32 %v2305_v60, %v2304_v25  ;;  %v2318_v31 = vadd.f32 %v2317_v5, %v2316_v19  ;;  %v2855_v50 = vmul.f32 %v2816_v8, %v8287_v4 }
 0x4af   :  { %v2299_v13 = vadd.f32 %v2298_v28, %v2297_v63  ;;  %v2311_v59 = vadd.f32 %v2310_v52, %v2309_v11  ;;  %v2870_v32 = vsel %vm51_vm0, %v2856_v56, 0.0 }
 0x4b0   :  { %v2307_v20 = vrot.slane %v2306_v30, 1  ;;  %v2319_v2 = vrot.slane %v2318_v31, 2  ;;  %v2871_v37 = vrot.slane %v2870_v32, 4  ;;  %v2863_v29 = vsel %vm51_vm0, %v2855_v50, 0.0 }
 0x4b1   :  { %v2300_v1 = vrot.slane %v2299_v13, 1  ;;  %v2312_v27 = vrot.slane %v2311_v59, 2  ;;  %v2864_v42 = vrot.slane %v2863_v29, 4 }
 0x4b2   :  { %v2320_v33 = vadd.f32 %v2319_v2, %v2318_v31  ;;  %v2872_v47 = vadd.f32 %v2871_v37, %v2870_v32  ;;  %v2308_v35 = vadd.f32 %v2307_v20, %v2306_v30 }
 0x4b3   :  { %v2301_v53 = vadd.f32 %v2300_v1, %v2299_v13  ;;  %v2313_v7 = vadd.f32 %v2312_v27, %v2311_v59  ;;  %v2865_v0 = vadd.f32 %v2864_v42, %v2863_v29 }
 0x4b4   :  { %v2321_v44 = vrot.slane %v2320_v33, 1  ;;  %v2873_v6 = vrot.slane %v2872_v47, 2 }
 0x4b5   :  { %v2334_v34 = vsel %vm1139_vm5, %v2301_v53, %v2333_v9  ;;  %v2314_v54 = vrot.slane %v2313_v7, 1  ;;  %v2866_v21 = vrot.slane %v2865_v0, 2 }
 0x4b6   :  { %v2335_v16 = vsel %vm1141_vm6, %v2308_v35, %v2334_v34  ;;  %v2874_v61 = vadd.f32 %v2873_v6, %v2872_v47  ;;  %v2322_v18 = vadd.f32 %v2321_v44, %v2320_v33  ;;  %v2942_v34 = vld [vmem:[#allocation4 + $0x20] sm:$0xff] }
 0x4b7   :  { %v2315_v58 = vadd.f32 %v2314_v54, %v2313_v7  ;;  %v2867_v45 = vadd.f32 %v2866_v21, %v2865_v0 }
 0x4b8   :  { %v2875_v46 = vrot.slane %v2874_v61, 1 }
 0x4b9   :  { %v2336_v36 = vsel %vm1143_vm7, %v2315_v58, %v2335_v16  ;;  %v2868_v26 = vrot.slane %v2867_v45, 1 }
 0x4ba   :  { %v2337_v62 = vsel %vm1145_vm8, %v2322_v18, %v2336_v36  ;;  %v2876_v38 = vadd.f32 %v2875_v46, %v2874_v61 }
 0x4bb   :  { %2340 = vst.msk [vmem:[#allocation5 + $0x10] sm:$0xff] %vm51_vm0, %v2337_v62  ;;  %v2869_v41 = vadd.f32 %v2868_v26, %v2867_v45 }
 0x4bd   :  { %v2927_v39 = vsel %vm1133_vm2, %v2876_v38, %v2869_v41  ;;  %v6145_v23 = vpop.f32.mrb[42].mxu0 }
 0x4be   :  { %v2858_v40 = vmul.f32 %v6145_v23, %v8287_v4  ;;  %v2826_v3 = vpop.f32.mrb[43].mxu0 }
 0x4bf   :  { %v2857_v15 = vmul.f32 %v2826_v3, %v8287_v4 }
 0x4c0   :  { %v2884_v51 = vsel %vm51_vm0, %v2858_v40, 0.0 }
 0x4c1   :  { %v2885_v24 = vrot.slane %v2884_v51, 4  ;;  %v2877_v49 = vsel %vm51_vm0, %v2857_v15, 0.0 }
 0x4c2   :  { %v2878_v57 = vrot.slane %v2877_v49, 4  ;;  %v5323_v9 = vld [vmem:[#allocation5 + $0x10] sm:$0xff] }
 0x4c3   :  { %v2886_v10 = vadd.f32 %v2885_v24, %v2884_v51  ;;  %v6148_v17 = vpop.f32.mrb[44].mxu0  ;;  %6299 = vmatprep.mubr.msk.f32.mxu1 %vm51_vm0, %v5323_v9 }
 0x4c4   :  { %v2879_v14 = vadd.f32 %v2878_v57, %v2877_v49  ;;  %v2860_v43 = vmul.f32 %v6148_v17, %v8287_v4  ;;  %v2836_v22 = vpop.f32.mrb[45].mxu0 }
 0x4c5   :  { %v2887_v12 = vrot.slane %v2886_v10, 2  ;;  %v2859_v25 = vmul.f32 %v2836_v22, %v8287_v4 }
 0x4c6   :  { %v2880_v48 = vrot.slane %v2879_v14, 2  ;;  %v2898_v63 = vsel %vm51_vm0, %v2860_v43, 0.0 }
 0x4c7   :  { %v2888_v19 = vadd.f32 %v2887_v12, %v2886_v10  ;;  %v2899_v60 = vrot.slane %v2898_v63, 4  ;;  %v2891_v5 = vsel %vm51_vm0, %v2859_v25, 0.0 }
 0x4c8   :  { %v2881_v11 = vadd.f32 %v2880_v48, %v2879_v14  ;;  %v2892_v55 = vrot.slane %v2891_v5, 4 }
 0x4c9   :  { %v2889_v28 = vrot.slane %v2888_v19, 1  ;;  %v2900_v52 = vadd.f32 %v2899_v60, %v2898_v63 }
 0x4ca   :  { %v2882_v56 = vrot.slane %v2881_v11, 1  ;;  %v2893_v8 = vadd.f32 %v2892_v55, %v2891_v5 }
 0x4cb   :  { %v2901_v30 = vrot.slane %v2900_v52, 2  ;;  %v2890_v13 = vadd.f32 %v2889_v28, %v2888_v19 }
 0x4cc   :  { %v2883_v31 = vadd.f32 %v2882_v56, %v2881_v11  ;;  %v2894_v50 = vrot.slane %v2893_v8, 2 }
 0x4cd   :  { %v2902_v59 = vadd.f32 %v2901_v30, %v2900_v52 }
 0x4ce   :  { %v2928_v32 = vsel %vm1135_vm3, %v2883_v31, %v2927_v39  ;;  %v2895_v20 = vadd.f32 %v2894_v50, %v2893_v8 }
 0x4cf   :  { %v2903_v2 = vrot.slane %v2902_v59, 1  ;;  %v2929_v37 = vsel %vm1137_vm4, %v2890_v13, %v2928_v32 }
 0x4d0   :  { %v2896_v29 = vrot.slane %v2895_v20, 1  ;;  %v6151_v1 = vpop.f32.mrb[46].mxu0 }
 0x4d1   :  { %v2862_v42 = vmul.f32 %v6151_v1, %v8287_v4  ;;  %v2846_v33 = vpop.f32.mrb[47].mxu0  ;;  %v2904_v47 = vadd.f32 %v2903_v2, %v2902_v59 }
 0x4d2   :  { %v2897_v27 = vadd.f32 %v2896_v29, %v2895_v20  ;;  %v2861_v53 = vmul.f32 %v2846_v33, %v8287_v4 }
 0x4d3   :  { %v2912_v0 = vsel %vm51_vm0, %v2862_v42, 0.0 }
 0x4d4   :  { %v2930_v7 = vsel %vm1139_vm5, %v2897_v27, %v2929_v37  ;;  %v2913_v35 = vrot.slane %v2912_v0, 4  ;;  %v2905_v44 = vsel %vm51_vm0, %v2861_v53, 0.0  ;;  %v6176_v54 = vpop.f32.mrb[48].mxu0 }
 0x4d5   :  { %v2931_v6 = vsel %vm1141_vm6, %v2904_v47, %v2930_v7  ;;  %v2906_v21 = vrot.slane %v2905_v44, 4  ;;  %v3452_v16 = vmul.f32 %v6176_v54, %v2942_v34  ;;  %v3412_v61 = vpop.f32.mrb[49].mxu0 }
 0x4d6   :  { %v2914_v58 = vadd.f32 %v2913_v35, %v2912_v0  ;;  %v3451_v45 = vmul.f32 %v3412_v61, %v2942_v34 }
 0x4d7   :  { %v2907_v18 = vadd.f32 %v2906_v21, %v2905_v44  ;;  %v3466_v46 = vsel %vm51_vm0, %v3452_v16, 0.0 }
 0x4d8   :  { %v2915_v4 = vrot.slane %v2914_v58, 2  ;;  %v3467_v36 = vrot.slane %v3466_v46, 4  ;;  %v3459_v26 = vsel %vm51_vm0, %v3451_v45, 0.0 }
 0x4d9   :  { %v2908_v62 = vrot.slane %v2907_v18, 2  ;;  %v3460_v38 = vrot.slane %v3459_v26, 4 }
 0x4da   :  { %v2916_v41 = vadd.f32 %v2915_v4, %v2914_v58  ;;  %v3468_v39 = vadd.f32 %v3467_v36, %v3466_v46 }
 0x4db   :  { %v2909_v23 = vadd.f32 %v2908_v62, %v2907_v18  ;;  %v3461_v40 = vadd.f32 %v3460_v38, %v3459_v26 }
 0x4dc   :  { %v2917_v3 = vrot.slane %v2916_v41, 1  ;;  %v3469_v15 = vrot.slane %v3468_v39, 2 }
 0x4dd   :  { %v2910_v51 = vrot.slane %v2909_v23, 1  ;;  %v3462_v24 = vrot.slane %v3461_v40, 2 }
 0x4de   :  { %v3470_v49 = vadd.f32 %v3469_v15, %v3468_v39  ;;  %v2918_v10 = vadd.f32 %v2917_v3, %v2916_v41 }
 0x4df   :  { %v2911_v57 = vadd.f32 %v2910_v51, %v2909_v23  ;;  %v3463_v9 = vadd.f32 %v3462_v24, %v3461_v40  ;;  %v3538_v40 = vld [vmem:[#allocation4 + $0x28] sm:$0xff] }
 0x4e0   :  { %v3471_v17 = vrot.slane %v3470_v49, 1 }
 0x4e1   :  { %v2932_v14 = vsel %vm1143_vm7, %v2911_v57, %v2931_v6  ;;  %v3464_v43 = vrot.slane %v3463_v9, 1 }
 0x4e2   :  { %v2933_v22 = vsel %vm1145_vm8, %v2918_v10, %v2932_v14  ;;  %v3472_v12 = vadd.f32 %v3471_v17, %v3470_v49 }
 0x4e3   :  { %2936 = vst.msk [vmem:[#allocation5 + $0x18] sm:$0xff] %vm51_vm0, %v2933_v22  ;;  %v3465_v25 = vadd.f32 %v3464_v43, %v3463_v9  ;;  %v6179_v48 = vpop.f32.mrb[50].mxu0 }
 0x4e4   :  { %v3454_v63 = vmul.f32 %v6179_v48, %v2942_v34  ;;  %v3422_v19 = vpop.f32.mrb[51].mxu0 }
 0x4e5   :  { %v3523_v60 = vsel %vm1133_vm2, %v3472_v12, %v3465_v25  ;;  %v3453_v5 = vmul.f32 %v3422_v19, %v2942_v34 }
 0x4e6   :  { %v3480_v11 = vsel %vm51_vm0, %v3454_v63, 0.0 }
 0x4e7   :  { %v3481_v55 = vrot.slane %v3480_v11, 4  ;;  %v3473_v28 = vsel %vm51_vm0, %v3453_v5, 0.0  ;;  %v6182_v52 = vpop.f32.mrb[52].mxu0 }
 0x4e8   :  { %v3474_v56 = vrot.slane %v3473_v28, 4  ;;  %v3456_v8 = vmul.f32 %v6182_v52, %v2942_v34  ;;  %v3432_v30 = vpop.f32.mrb[53].mxu0 }
 0x4e9   :  { %v3482_v31 = vadd.f32 %v3481_v55, %v3480_v11  ;;  %v3455_v50 = vmul.f32 %v3432_v30, %v2942_v34 }
 0x4ea   :  { %v3475_v13 = vadd.f32 %v3474_v56, %v3473_v28  ;;  %v3494_v59 = vsel %vm51_vm0, %v3456_v8, 0.0  ;;  %v5324_v32 = vld [vmem:[#allocation5 + $0x18] sm:$0xff] }
 0x4eb   :  { %v3483_v20 = vrot.slane %v3482_v31, 2  ;;  %v3495_v2 = vrot.slane %v3494_v59, 4  ;;  %v3487_v37 = vsel %vm51_vm0, %v3455_v50, 0.0  ;;  %6300 = vmatmul.mubr.msk.f32.gmra.mrb[74].mxu1 %vm51_vm0, %v5324_v32 }
 0x4ec   :  { %v6185_v29 = vpop.f32.mrb[54].mxu0  ;;  %v3476_v1 = vrot.slane %v3475_v13, 2  ;;  %v3488_v27 = vrot.slane %v3487_v37, 4 }
 0x4ed   :  { %v3458_v42 = vmul.f32 %v6185_v29, %v2942_v34  ;;  %v3442_v33 = vpop.f32.mrb[55].mxu0  ;;  %v3484_v47 = vadd.f32 %v3483_v20, %v3482_v31  ;;  %v3496_v53 = vadd.f32 %v3495_v2, %v3494_v59 }
 0x4ee   :  { %v3457_v7 = vmul.f32 %v3442_v33, %v2942_v34  ;;  %v3477_v0 = vadd.f32 %v3476_v1, %v3475_v13  ;;  %v3489_v35 = vadd.f32 %v3488_v27, %v3487_v37 }
 0x4ef   :  { %v3508_v44 = vsel %vm51_vm0, %v3458_v42, 0.0  ;;  %v3485_v6 = vrot.slane %v3484_v47, 1  ;;  %v3497_v54 = vrot.slane %v3496_v53, 2 }
 0x4f0   :  { %v3509_v21 = vrot.slane %v3508_v44, 4  ;;  %v3501_v16 = vsel %vm51_vm0, %v3457_v7, 0.0  ;;  %v3478_v61 = vrot.slane %v3477_v0, 1  ;;  %v3490_v58 = vrot.slane %v3489_v35, 2 }
 0x4f1   :  { %v3502_v45 = vrot.slane %v3501_v16, 4  ;;  %v3498_v18 = vadd.f32 %v3497_v54, %v3496_v53  ;;  %v3486_v62 = vadd.f32 %v3485_v6, %v3484_v47 }
 0x4f2   :  { %v3510_v46 = vadd.f32 %v3509_v21, %v3508_v44  ;;  %v3479_v4 = vadd.f32 %v3478_v61, %v3477_v0  ;;  %v3491_v36 = vadd.f32 %v3490_v58, %v3489_v35 }
 0x4f3   :  { %v3503_v26 = vadd.f32 %v3502_v45, %v3501_v16  ;;  %v3499_v38 = vrot.slane %v3498_v18, 1 }
 0x4f4   :  { %v3511_v34 = vrot.slane %v3510_v46, 2  ;;  %v3524_v41 = vsel %vm1135_vm3, %v3479_v4, %v3523_v60  ;;  %v3492_v39 = vrot.slane %v3491_v36, 1 }
 0x4f5   :  { %v3504_v23 = vrot.slane %v3503_v26, 2  ;;  %v6210_v3 = vpop.f32.mrb[56].mxu0  ;;  %v3525_v15 = vsel %vm1137_vm4, %v3486_v62, %v3524_v41  ;;  %v3500_v17 = vadd.f32 %v3499_v38, %v3498_v18 }
 0x4f6   :  { %v3512_v51 = vadd.f32 %v3511_v34, %v3510_v46  ;;  %v4048_v24 = vmul.f32 %v6210_v3, %v3538_v40  ;;  %v4008_v49 = vpop.f32.mrb[57].mxu0  ;;  %v3493_v57 = vadd.f32 %v3492_v39, %v3491_v36 }
 0x4f7   :  { %v3505_v9 = vadd.f32 %v3504_v23, %v3503_v26  ;;  %v4047_v10 = vmul.f32 %v4008_v49, %v3538_v40 }
 0x4f8   :  { %v3513_v14 = vrot.slane %v3512_v51, 1  ;;  %v4062_v43 = vsel %vm51_vm0, %v4048_v24, 0.0  ;;  %v3526_v22 = vsel %vm1139_vm5, %v3493_v57, %v3525_v15 }
 0x4f9   :  { %v3506_v12 = vrot.slane %v3505_v9, 1  ;;  %v4063_v25 = vrot.slane %v4062_v43, 4  ;;  %v4055_v48 = vsel %vm51_vm0, %v4047_v10, 0.0  ;;  %v6213_v63 = vpop.f32.mrb[58].mxu0  ;;  %v3527_v19 = vsel %vm1141_vm6, %v3500_v17, %v3526_v22 }
 0x4fa   :  { %v4056_v60 = vrot.slane %v4055_v48, 4  ;;  %v4050_v5 = vmul.f32 %v6213_v63, %v3538_v40  ;;  %v4018_v11 = vpop.f32.mrb[59].mxu0  ;;  %v3514_v56 = vadd.f32 %v3513_v14, %v3512_v51 }
 0x4fb   :  { %v3507_v55 = vadd.f32 %v3506_v12, %v3505_v9  ;;  %v4064_v28 = vadd.f32 %v4063_v25, %v4062_v43  ;;  %v4049_v52 = vmul.f32 %v4018_v11, %v3538_v40  ;;  %v8345_v9 = vld [vmem:[#allocation4 + $0x30] sm:$0xff] }
 0x4fc   :  { %v4057_v8 = vadd.f32 %v4056_v60, %v4055_v48  ;;  %v4076_v30 = vsel %vm51_vm0, %v4050_v5, 0.0 }
 0x4fd   :  { %v3528_v31 = vsel %vm1143_vm7, %v3507_v55, %v3527_v19  ;;  %v4065_v50 = vrot.slane %v4064_v28, 2  ;;  %v4077_v13 = vrot.slane %v4076_v30, 4  ;;  %v4069_v59 = vsel %vm51_vm0, %v4049_v52, 0.0  ;;  %v6216_v32 = vpop.f32.mrb[60].mxu0 }
 0x4fe   :  { %v3529_v20 = vsel %vm1145_vm8, %v3514_v56, %v3528_v31  ;;  %v4058_v2 = vrot.slane %v4057_v8, 2  ;;  %v4070_v37 = vrot.slane %v4069_v59, 4  ;;  %v4052_v29 = vmul.f32 %v6216_v32, %v3538_v40  ;;  %v4028_v1 = vpop.f32.mrb[61].mxu0 }
 0x4ff   :  { %3532 = vst.msk [vmem:[#allocation5 + $0x20] sm:$0xff] %vm51_vm0, %v3529_v20  ;;  %v4066_v27 = vadd.f32 %v4065_v50, %v4064_v28  ;;  %v4078_v42 = vadd.f32 %v4077_v13, %v4076_v30  ;;  %v4051_v33 = vmul.f32 %v4028_v1, %v3538_v40 }
 0x500   :  { %v4059_v47 = vadd.f32 %v4058_v2, %v4057_v8  ;;  %v4071_v53 = vadd.f32 %v4070_v37, %v4069_v59  ;;  %v4090_v7 = vsel %vm51_vm0, %v4052_v29, 0.0 }
 0x501   :  { %v4067_v0 = vrot.slane %v4066_v27, 1  ;;  %v4079_v35 = vrot.slane %v4078_v42, 2  ;;  %v4091_v44 = vrot.slane %v4090_v7, 4  ;;  %v4083_v6 = vsel %vm51_vm0, %v4051_v33, 0.0  ;;  %v6219_v54 = vpop.f32.mrb[62].mxu0 }
 0x502   :  { %v4060_v21 = vrot.slane %v4059_v47, 1  ;;  %v4072_v16 = vrot.slane %v4071_v53, 2  ;;  %v4084_v61 = vrot.slane %v4083_v6, 4  ;;  %v4054_v58 = vmul.f32 %v6219_v54, %v3538_v40  ;;  %v4038_v45 = vpop.f32.mrb[63].mxu0 }
 0x503   :  { %v4068_v18 = vadd.f32 %v4067_v0, %v4066_v27  ;;  %v4080_v46 = vadd.f32 %v4079_v35, %v4078_v42  ;;  %v4092_v4 = vadd.f32 %v4091_v44, %v4090_v7  ;;  %v4053_v36 = vmul.f32 %v4038_v45, %v3538_v40 }
 0x504   :  { %v4061_v26 = vadd.f32 %v4060_v21, %v4059_v47  ;;  %v4073_v62 = vadd.f32 %v4072_v16, %v4071_v53  ;;  %v4085_v38 = vadd.f32 %v4084_v61, %v4083_v6  ;;  %v4104_v34 = vsel %vm51_vm0, %v4054_v58, 0.0 }
 0x505   :  { %v4081_v41 = vrot.slane %v4080_v46, 1  ;;  %v4093_v39 = vrot.slane %v4092_v4, 2  ;;  %v4105_v23 = vrot.slane %v4104_v34, 4  ;;  %v4097_v3 = vsel %vm51_vm0, %v4053_v36, 0.0  ;;  %v6244_v15 = vpop.f32.mrb[64].mxu0 }
 0x506   :  { %v4119_v51 = vsel %vm1133_vm2, %v4068_v18, %v4061_v26  ;;  %v4074_v24 = vrot.slane %v4073_v62, 1  ;;  %v4086_v49 = vrot.slane %v4085_v38, 2  ;;  %v4098_v57 = vrot.slane %v4097_v3, 4  ;;  %v4604_v10 = vpop.f32.mrb[65].mxu0  ;;  %v5325_v40 = vld [vmem:[#allocation5 + $0x20] sm:$0xff] }
 0x507   :  { %v4094_v17 = vadd.f32 %v4093_v39, %v4092_v4  ;;  %v4106_v14 = vadd.f32 %v4105_v23, %v4104_v34  ;;  %v4644_v43 = vmul.f32 %v6244_v15, %v8345_v9  ;;  %6302 = vmatprep.mubr.msk.f32.mxu1 %vm51_vm0, %v5325_v40  ;;  %v4643_v48 = vmul.f32 %v4604_v10, %v8345_v9 }
 0x508   :  { %v4075_v22 = vadd.f32 %v4074_v24, %v4073_v62  ;;  %v4087_v12 = vadd.f32 %v4086_v49, %v4085_v38  ;;  %v4099_v25 = vadd.f32 %v4098_v57, %v4097_v3  ;;  %v4082_v63 = vadd.f32 %v4081_v41, %v4080_v46 }
 0x509   :  { %v4095_v19 = vrot.slane %v4094_v17, 1  ;;  %v4107_v60 = vrot.slane %v4106_v14, 2  ;;  %v4658_v5 = vsel %vm51_vm0, %v4644_v43, 0.0  ;;  %v6247_v11 = vpop.f32.mrb[66].mxu0  ;;  %v4651_v50 = vsel %vm51_vm0, %v4643_v48, 0.0 }
 0x50a   :  { %v4120_v55 = vsel %vm1135_vm3, %v4075_v22, %v4119_v51  ;;  %v4088_v28 = vrot.slane %v4087_v12, 1  ;;  %v4100_v52 = vrot.slane %v4099_v25, 2  ;;  %v4659_v56 = vrot.slane %v4658_v5, 4  ;;  %v4614_v8 = vpop.f32.mrb[67].mxu0 }
 0x50b   :  { %v4121_v30 = vsel %vm1137_vm4, %v4082_v63, %v4120_v55  ;;  %v4108_v31 = vadd.f32 %v4107_v60, %v4106_v14  ;;  %v4652_v20 = vrot.slane %v4651_v50, 4  ;;  %v4096_v2 = vadd.f32 %v4095_v19, %v4094_v17  ;;  %v8369_v17 = vld [vmem:[#allocation4 + $0x38] sm:$0xff] }
 0x50c   :  { %v4089_v13 = vadd.f32 %v4088_v28, %v4087_v12  ;;  %v4101_v59 = vadd.f32 %v4100_v52, %v4099_v25  ;;  %v4660_v32 = vadd.f32 %v4659_v56, %v4658_v5  ;;  %v4646_v29 = vmul.f32 %v6247_v11, %v8345_v9 }
 0x50d   :  { %v4109_v37 = vrot.slane %v4108_v31, 1  ;;  %v4645_v1 = vmul.f32 %v4614_v8, %v8345_v9  ;;  %v6250_v27 = vpop.f32.mrb[68].mxu0  ;;  %v4653_v53 = vadd.f32 %v4652_v20, %v4651_v50 }
 0x50e   :  { %v4122_v42 = vsel %vm1139_vm5, %v4089_v13, %v4121_v30  ;;  %v4102_v33 = vrot.slane %v4101_v59, 1  ;;  %v4661_v47 = vrot.slane %v4660_v32, 2  ;;  %v4624_v7 = vpop.f32.mrb[69].mxu0  ;;  %v4672_v35 = vsel %vm51_vm0, %v4646_v29, 0.0 }
 0x50f   :  { %v4123_v0 = vsel %vm1141_vm6, %v4096_v2, %v4122_v42  ;;  %v4665_v44 = vsel %vm51_vm0, %v4645_v1, 0.0  ;;  %v4654_v21 = vrot.slane %v4653_v53, 2  ;;  %v4673_v16 = vrot.slane %v4672_v35, 4 }
 0x510   :  { %v4103_v6 = vadd.f32 %v4102_v33, %v4101_v59  ;;  %v4662_v54 = vadd.f32 %v4661_v47, %v4660_v32  ;;  %v4110_v61 = vadd.f32 %v4109_v37, %v4108_v31  ;;  %v4666_v58 = vrot.slane %v4665_v44, 4 }
 0x511   :  { %v4648_v45 = vmul.f32 %v6250_v27, %v8345_v9  ;;  %v4647_v18 = vmul.f32 %v4624_v7, %v8345_v9  ;;  %v6253_v46 = vpop.f32.mrb[70].mxu0  ;;  %v4655_v26 = vadd.f32 %v4654_v21, %v4653_v53  ;;  %v4674_v62 = vadd.f32 %v4673_v16, %v4672_v35 }
 0x512   :  { %v4124_v4 = vsel %vm1143_vm7, %v4103_v6, %v4123_v0  ;;  %v4663_v36 = vrot.slane %v4662_v54, 1  ;;  %v4634_v38 = vpop.f32.mrb[71].mxu0  ;;  %v4667_v41 = vadd.f32 %v4666_v58, %v4665_v44  ;;  %v4650_v10 = vmul.f32 %v6253_v46, %v8345_v9 }
 0x513   :  { %v4125_v34 = vsel %vm1145_vm8, %v4110_v61, %v4124_v4  ;;  %v4686_v39 = vsel %vm51_vm0, %v4648_v45, 0.0  ;;  %v4679_v23 = vsel %vm51_vm0, %v4647_v18, 0.0  ;;  %v4656_v15 = vrot.slane %v4655_v26, 1 }
 0x514   :  { %4128 = vst.msk [vmem:[#allocation5 + $0x28] sm:$0xff] %vm51_vm0, %v4125_v34  ;;  %v4664_v3 = vadd.f32 %v4663_v36, %v4662_v54  ;;  %v4675_v51 = vrot.slane %v4674_v62, 2  ;;  %v4687_v24 = vrot.slane %v4686_v39, 4  ;;  %v4668_v49 = vrot.slane %v4667_v41, 2 }
 0x515   :  { %v4680_v57 = vrot.slane %v4679_v23, 4  ;;  %v4649_v40 = vmul.f32 %v4634_v38, %v8345_v9  ;;  %v6278_v14 = vpop.f32.mrb[72].mxu0  ;;  %v4657_v43 = vadd.f32 %v4656_v15, %v4655_v26  ;;  %v4700_v60 = vsel %vm51_vm0, %v4650_v10, 0.0 }
 0x516   :  { %v4676_v22 = vadd.f32 %v4675_v51, %v4674_v62  ;;  %v4688_v12 = vadd.f32 %v4687_v24, %v4686_v39  ;;  %v5240_v25 = vmul.f32 %v6278_v14, %v8369_v17  ;;  %v5200_v48 = vpop.f32.mrb[73].mxu0  ;;  %v4669_v63 = vadd.f32 %v4668_v49, %v4667_v41 }
 0x517   :  { %v4681_v19 = vadd.f32 %v4680_v57, %v4679_v23  ;;  %v4693_v5 = vsel %vm51_vm0, %v4649_v40, 0.0  ;;  %v4715_v11 = vsel %vm1133_vm2, %v4664_v3, %v4657_v43  ;;  %v4701_v9 = vrot.slane %v4700_v60, 4 }
 0x518   :  { %v4677_v55 = vrot.slane %v4676_v22, 1  ;;  %v4689_v28 = vrot.slane %v4688_v12, 2  ;;  %v4670_v52 = vrot.slane %v4669_v63, 1  ;;  %v4694_v8 = vrot.slane %v4693_v5, 4 }
 0x519   :  { %v4682_v56 = vrot.slane %v4681_v19, 2  ;;  %v5254_v30 = vsel %vm51_vm0, %v5240_v25, 0.0  ;;  %v6281_v31 = vpop.f32.mrb[74].mxu0  ;;  %v4702_v59 = vadd.f32 %v4701_v9, %v4700_v60  ;;  %v5239_v1 = vmul.f32 %v5200_v48, %v8369_v17 }
 0x51a   :  { %v4678_v50 = vadd.f32 %v4677_v55, %v4676_v22  ;;  %v4690_v13 = vadd.f32 %v4689_v28, %v4688_v12  ;;  %v5255_v32 = vrot.slane %v5254_v30, 4  ;;  %v5210_v20 = vpop.f32.mrb[75].mxu0  ;;  %v4671_v2 = vadd.f32 %v4670_v52, %v4669_v63 }
 0x51b   :  { %v4683_v37 = vadd.f32 %v4682_v56, %v4681_v19  ;;  %v4695_v29 = vadd.f32 %v4694_v8, %v4693_v5  ;;  %v5326_v27 = vld [vmem:[#allocation5 + $0x28] sm:$0xff]  ;;  %v4703_v33 = vrot.slane %v4702_v59, 2  ;;  %v5242_v53 = vmul.f32 %v6281_v31, %v8369_v17 }
 0x51c   :  { %v4691_v42 = vrot.slane %v4690_v13, 1  ;;  %v5256_v47 = vadd.f32 %v5255_v32, %v5254_v30  ;;  %6303 = vmatmul.mubr.msk.f32.gmra.mrb[76].mxu1 %vm51_vm0, %v5326_v27  ;;  %v4716_v7 = vsel %vm1135_vm3, %v4671_v2, %v4715_v11  ;;  %v5247_v44 = vsel %vm51_vm0, %v5239_v1, 0.0 }
 0x51d   :  { %v4684_v0 = vrot.slane %v4683_v37, 1  ;;  %v4696_v35 = vrot.slane %v4695_v29, 2  ;;  %v6284_v6 = vpop.f32.mrb[76].mxu0  ;;  %v4717_v21 = vsel %vm1137_vm4, %v4678_v50, %v4716_v7  ;;  %v4704_v16 = vadd.f32 %v4703_v33, %v4702_v59 }
 0x51e   :  { %v4692_v54 = vadd.f32 %v4691_v42, %v4690_v13  ;;  %v5257_v61 = vrot.slane %v5256_v47, 2  ;;  %v5220_v58 = vpop.f32.mrb[77].mxu0  ;;  %v5248_v46 = vrot.slane %v5247_v44, 4  ;;  %v5268_v4 = vsel %vm51_vm0, %v5242_v53, 0.0 }
 0x51f   :  { %v4685_v45 = vadd.f32 %v4684_v0, %v4683_v37  ;;  %v4697_v18 = vadd.f32 %v4696_v35, %v4695_v29  ;;  %v4705_v36 = vrot.slane %v4704_v16, 1  ;;  %v5269_v62 = vrot.slane %v5268_v4, 4 }
 0x520   :  { %v5258_v26 = vadd.f32 %v5257_v61, %v5256_v47  ;;  %v5241_v38 = vmul.f32 %v5210_v20, %v8369_v17  ;;  %v5249_v39 = vadd.f32 %v5248_v46, %v5247_v44  ;;  %v5244_v23 = vmul.f32 %v6284_v6, %v8369_v17 }
 0x521   :  { %v4718_v34 = vsel %vm1139_vm5, %v4685_v45, %v4717_v21  ;;  %v4698_v41 = vrot.slane %v4697_v18, 1  ;;  %v6287_v3 = vpop.f32.mrb[78].mxu0  ;;  %v4706_v15 = vadd.f32 %v4705_v36, %v4704_v16  ;;  %v5270_v49 = vadd.f32 %v5269_v62, %v5268_v4 }
 0x522   :  { %v4719_v51 = vsel %vm1141_vm6, %v4692_v54, %v4718_v34  ;;  %v5259_v24 = vrot.slane %v5258_v26, 1  ;;  %v5230_v57 = vpop.f32.mrb[79].mxu0  ;;  %v5250_v40 = vrot.slane %v5249_v39, 2  ;;  %v5261_v14 = vsel %vm51_vm0, %v5241_v38, 0.0 }
 0x523   :  { %v4699_v10 = vadd.f32 %v4698_v41, %v4697_v18  ;;  %v5282_v43 = vsel %vm51_vm0, %v5244_v23, 0.0  ;;  %v5271_v12 = vrot.slane %v5270_v49, 2  ;;  %v5262_v25 = vrot.slane %v5261_v14, 4 }
 0x524   :  { %v5260_v22 = vadd.f32 %v5259_v24, %v5258_v26  ;;  %v5283_v48 = vrot.slane %v5282_v43, 4  ;;  %v5251_v19 = vadd.f32 %v5250_v40, %v5249_v39  ;;  %v5243_v60 = vmul.f32 %v5220_v58, %v8369_v17 }
 0x525   :  { %v4720_v63 = vsel %vm1143_vm7, %v4699_v10, %v4719_v51  ;;  %v5246_v5 = vmul.f32 %v6287_v3, %v8369_v17  ;;  %v5272_v55 = vadd.f32 %v5271_v12, %v5270_v49  ;;  %v5263_v28 = vadd.f32 %v5262_v25, %v5261_v14  ;;  %v8763_v10 = vld [vmem:[#allocation7_spill] sm:$0xff]  ;;  %v8764_v14 = vld [vmem:[#allocation6_spill] sm:$0xff] }
 0x526   :  { %v4721_v11 = vsel %vm1145_vm8, %v4706_v15, %v4720_v63  ;;  %v5284_v9 = vadd.f32 %v5283_v48, %v5282_v43  ;;  %v5252_v52 = vrot.slane %v5251_v19, 1  ;;  %v5275_v56 = vsel %vm51_vm0, %v5243_v60, 0.0  ;;  %v5793_v15 = vld [vmem:[%s8566_s7] ss:$0 sm:$0xff]  ;;  %v8765_v60 = vld [vmem:[#allocation9_spill] sm:$0xff] }
 0x527   :  { %4724 = vst.msk [vmem:[#allocation5 + $0x30] sm:$0xff] %vm51_vm0, %v4721_v11  ;;  %v5296_v8 = vsel %vm51_vm0, %v5246_v5, 0.0  ;;  %v5245_v30 = vmul.f32 %v5230_v57, %v8369_v17  ;;  %v5264_v31 = vrot.slane %v5263_v28, 2  ;;  %v5276_v13 = vrot.slane %v5275_v56, 4  ;;  %v8766_v11 = vld [vmem:[#allocation8_spill] sm:$0xff] }
 0x528   :  { %v5285_v50 = vrot.slane %v5284_v9, 2  ;;  %v5253_v59 = vadd.f32 %v5252_v52, %v5251_v19  ;;  %v5297_v32 = vrot.slane %v5296_v8, 4  ;;  %v5273_v2 = vrot.slane %v5272_v55, 1 }
 0x529   :  { %v5289_v20 = vsel %vm51_vm0, %v5245_v30, 0.0  ;;  %v5265_v37 = vadd.f32 %v5264_v31, %v5263_v28  ;;  %v5277_v29 = vadd.f32 %v5276_v13, %v5275_v56  ;;  %v8767_v31 = vld [vmem:[#allocation11_spill] sm:$0xff]  ;;  %v8768_v13 = vld [vmem:[#allocation10_spill] sm:$0xff] }
 0x52a   :  { %v5311_v1 = vsel %vm1133_vm2, %v5260_v22, %v5253_v59  ;;  %v5286_v27 = vadd.f32 %v5285_v50, %v5284_v9  ;;  %v5298_v42 = vadd.f32 %v5297_v32, %v5296_v8  ;;  %v5290_v33 = vrot.slane %v5289_v20, 4 }
 0x52b   :  { %v5266_v47 = vrot.slane %v5265_v37, 1  ;;  %v5278_v53 = vrot.slane %v5277_v29, 2  ;;  %v5274_v6 = vadd.f32 %v5273_v2, %v5272_v55 }
 0x52c   :  { %v5299_v7 = vrot.slane %v5298_v42, 2  ;;  %v5291_v0 = vadd.f32 %v5290_v33, %v5289_v20  ;;  %v5287_v54 = vrot.slane %v5286_v27, 1 }
 0x52d   :  { %v5267_v17 = vadd.f32 %v5266_v47, %v5265_v37  ;;  %v5279_v35 = vadd.f32 %v5278_v53, %v5277_v29 }
 0x52e   :  { %v5327_v44 = vld [vmem:[#allocation5 + $0x30] sm:$0xff]  ;;  %v5300_v21 = vadd.f32 %v5299_v7, %v5298_v42  ;;  %v5292_v16 = vrot.slane %v5291_v0, 2  ;;  %v5288_v36 = vadd.f32 %v5287_v54, %v5286_v27 }
 0x52f   :  { %6305 = vmatprep.mubr.msk.f32.mxu1 %vm51_vm0, %v5327_v44  ;;  %v5312_v61 = vsel %vm1135_vm3, %v5267_v17, %v5311_v1  ;;  %v5280_v58 = vrot.slane %v5279_v35, 1  ;;  %v8770_v44 = vld [vmem:[#allocation12_spill] sm:$0xff] }
 0x530   :  { %v5313_v45 = vsel %vm1137_vm4, %v5274_v6, %v5312_v61  ;;  %v5293_v18 = vadd.f32 %v5292_v16, %v5291_v0  ;;  %v5301_v4 = vrot.slane %v5300_v21, 1  ;;  %v8769_v0 = vld [vmem:[#allocation13_spill] sm:$0xff] }
 0x531   :  { %v5281_v46 = vadd.f32 %v5280_v58, %v5279_v35 }
 0x532   :  { %v5294_v26 = vrot.slane %v5293_v18, 1  ;;  %v5302_v41 = vadd.f32 %v5301_v4, %v5300_v21 }
 0x533   :  { %v5314_v62 = vsel %vm1139_vm5, %v5281_v46, %v5313_v45 }
 0x534   :  { %v5295_v38 = vadd.f32 %v5294_v26, %v5293_v18  ;;  %v5315_v34 = vsel %vm1141_vm6, %v5288_v36, %v5314_v62 }
 0x536   :  { %v5316_v39 = vsel %vm1143_vm7, %v5295_v38, %v5315_v34 }
 0x537   :  { %v5317_v23 = vsel %vm1145_vm8, %v5302_v41, %v5316_v39 }
 0x538   :  { %5320 = vst.msk [vmem:[#allocation5 + $0x38] sm:$0xff] %vm51_vm0, %v5317_v23 }
 0x53f   :  { %v5328_v3 = vld [vmem:[#allocation5 + $0x38] sm:$0xff] }
 0x540   :  { %6306 = vmatmul.mubr.msk.f32.gmra.mrb[78].mxu1 %vm51_vm0, %v5328_v3 }
 0x571   :  { %v6298_v51 = vpop.f32.mrb[72].mxu1 }
 0x572   :  { %v5436_v24 = vadd.f32 %v6298_v51, %v5793_v15  ;;  %v5430_v49 = vpop.f32.mrb[73].mxu1 }
 0x573   :  { %v5431_v57 = vadd.f32 %v5793_v15, %v5430_v49 }
 0x574   :  { %v5470_v40 = vadd.f32 %v5436_v24, %v8763_v10 }
 0x575   :  { %v5469_v43 = vadd.f32 %v5431_v57, %v8764_v14 }
 0x576   :  { %v5482_v22 = vsel %vm51_vm0, %v5470_v40, 0.0 }
 0x577   :  { %5483 = vadd.xlane.f32.xlu1 %v5482_v22  ;;  %v5479_v12 = vsel %vm51_vm0, %v5469_v43, 0.0 }
 0x578   :  { %5480 = vadd.xlane.f32.xlu0 %v5479_v12 }
 0x5be   :  { %v6301_v25 = vpop.f32.mrb[74].mxu1 }
 0x5bf   :  { %v5446_v48 = vadd.f32 %v6301_v25, %v5793_v15  ;;  %v5440_v63 = vpop.f32.mrb[75].mxu1 }
 0x5c0   :  { %v5441_v19 = vadd.f32 %v5793_v15, %v5440_v63 }
 0x5c1   :  { %v5472_v5 = vadd.f32 %v5446_v48, %v8765_v60 }
 0x5c2   :  { %v5471_v55 = vadd.f32 %v5441_v19, %v8766_v11 }
 0x5c3   :  { %v5488_v28 = vsel %vm51_vm0, %v5472_v5, 0.0 }
 0x5c4   :  { %5489 = vadd.xlane.f32.xlu1 %v5488_v28  ;;  %v5485_v9 = vsel %vm51_vm0, %v5471_v55, 0.0 }
 0x5c5   :  { %5486 = vadd.xlane.f32.xlu0 %v5485_v9 }
 0x5ef   :  { %v6304_v52 = vpop.f32.mrb[76].mxu1 }
 0x5f0   :  { %v5456_v56 = vadd.f32 %v6304_v52, %v5793_v15  ;;  %v5450_v8 = vpop.f32.mrb[77].mxu1 }
 0x5f1   :  { %v5451_v30 = vadd.f32 %v5793_v15, %v5450_v8 }
 0x5f2   :  { %v5474_v50 = vadd.f32 %v5456_v56, %v8767_v31 }
 0x5f3   :  { %v5473_v59 = vadd.f32 %v5451_v30, %v8768_v13  ;;  %v8470_v30 = vld [vmem:[%s8567_s8] ss:$0 sm:$0xff] }
 0x5f4   :  { %v5494_v32 = vsel %vm51_vm0, %v5474_v50, 0.0  ;;  %v8476_v13 = vld [vmem:[%s8568_s9] ss:$0 sm:$0xff] }
 0x5f5   :  { %5495 = vadd.xlane.f32.xlu1 %v5494_v32  ;;  %v5491_v20 = vsel %vm51_vm0, %v5473_v59, 0.0 }
 0x5f6   :  { %5492 = vadd.xlane.f32.xlu0 %v5491_v20  ;;  %v5612_v20 = vld [vmem:[%s8557_s0 + $0x8] sm:$0xff] }
 0x604   :  { %v5484_v2 = vpop.xlane.xlu1 %5483 }
 0x605   :  { %v5481_v37 = vpop.xlane.xlu0 %5480  ;;  %v5504_v29 = vmul.f32 0.03125, %v5484_v2 }
 0x606   :  { %v5503_v1 = vmul.f32 0.03125, %v5481_v37 }
 0x607   :  { %v8423_v27 = vsub.f32 %v5470_v40, %v5504_v29  ;;  %v5611_v29 = vld [vmem:[%s8557_s0] sm:$0xff] }
 0x608   :  { %v8425_v33 = vsub.f32 %v5469_v43, %v5503_v1 }
 0x609   :  { %v5520_v35 = vmul.f32 %v8423_v27, %v8423_v27 }
 0x60a   :  { %v5519_v54 = vmul.f32 %v8425_v33, %v8425_v33 }
 0x60b   :  { %v5530_v61 = vsel %vm51_vm0, %v5520_v35, 0.0 }
 0x60c   :  { %v5527_v58 = vsel %vm51_vm0, %v5519_v54, 0.0 }
 0x613   :  { %v6307_v42 = vpop.f32.mrb[78].mxu1 }
 0x614   :  { %v5466_v47 = vadd.f32 %v6307_v42, %v5793_v15  ;;  %v5460_v53 = vpop.f32.mrb[79].mxu1 }
 0x615   :  { %v5461_v7 = vadd.f32 %v5793_v15, %v5460_v53 }
 0x616   :  { %v5476_v17 = vadd.f32 %v5466_v47, %v8769_v0 }
 0x617   :  { %v5475_v6 = vadd.f32 %v5461_v7, %v8770_v44 }
 0x618   :  { %v5500_v21 = vsel %vm51_vm0, %v5476_v17, 0.0 }
 0x619   :  { %5501 = vadd.xlane.f32.xlu1 %v5500_v21  ;;  %v5497_v16 = vsel %vm51_vm0, %v5475_v6, 0.0 }
 0x61a   :  { %5498 = vadd.xlane.f32.xlu0 %v5497_v16  ;;  %v5614_v16 = vld [vmem:[%s8557_s0 + $0x18] sm:$0xff] }
 0x61d   :  { %5531 = vadd.xlane.f32.xlu1 %v5530_v61 }
 0x61e   :  { %5528 = vadd.xlane.f32.xlu0 %v5527_v58 }
 0x651   :  { %v5490_v45 = vpop.xlane.xlu1 %5489 }
 0x652   :  { %v5506_v18 = vmul.f32 0.03125, %v5490_v45  ;;  %v5487_v46 = vpop.xlane.xlu0 %5486  ;;  %v5613_v45 = vld [vmem:[%s8557_s0 + $0x10] sm:$0xff] }
 0x653   :  { %v5505_v4 = vmul.f32 0.03125, %v5487_v46 }
 0x654   :  { %v8437_v36 = vsub.f32 %v5472_v5, %v5506_v18 }
 0x655   :  { %v8439_v26 = vsub.f32 %v5471_v55, %v5505_v4 }
 0x656   :  { %v5522_v62 = vmul.f32 %v8437_v36, %v8437_v36 }
 0x657   :  { %v5521_v38 = vmul.f32 %v8439_v26, %v8439_v26 }
 0x658   :  { %v5536_v34 = vsel %vm51_vm0, %v5522_v62, 0.0 }
 0x659   :  { %5537 = vadd.xlane.f32.xlu1 %v5536_v34  ;;  %v5533_v41 = vsel %vm51_vm0, %v5521_v38, 0.0 }
 0x65a   :  { %5534 = vadd.xlane.f32.xlu0 %v5533_v41 }
 0x682   :  { %v5496_v39 = vpop.xlane.xlu1 %5495 }
 0x683   :  { %v5508_v23 = vmul.f32 0.03125, %v5496_v39  ;;  %v5493_v3 = vpop.xlane.xlu0 %5492 }
 0x684   :  { %v5507_v15 = vmul.f32 0.03125, %v5493_v3 }
 0x685   :  { %v8447_v51 = vsub.f32 %v5474_v50, %v5508_v23 }
 0x686   :  { %v8449_v24 = vsub.f32 %v5473_v59, %v5507_v15 }
 0x687   :  { %v5524_v49 = vmul.f32 %v8447_v51, %v8447_v51 }
 0x688   :  { %v5523_v57 = vmul.f32 %v8449_v24, %v8449_v24 }
 0x689   :  { %v5542_v10 = vsel %vm51_vm0, %v5524_v49, 0.0 }
 0x68a   :  { %5543 = vadd.xlane.f32.xlu1 %v5542_v10  ;;  %v5539_v40 = vsel %vm51_vm0, %v5523_v57, 0.0  ;;  %v5616_v57 = vld [vmem:[%s8557_s0 + $0x28] sm:$0xff] }
 0x68b   :  { %5540 = vadd.xlane.f32.xlu0 %v5539_v40 }
 0x6a6   :  { %v5502_v14 = vpop.xlane.xlu1 %5501 }
 0x6a7   :  { %v5510_v43 = vmul.f32 0.03125, %v5502_v14  ;;  %v5499_v22 = vpop.xlane.xlu0 %5498  ;;  %v5615_v14 = vld [vmem:[%s8557_s0 + $0x20] sm:$0xff] }
 0x6a8   :  { %v5509_v12 = vmul.f32 0.03125, %v5499_v22 }
 0x6a9   :  { %v8457_v25 = vsub.f32 %v5476_v17, %v5510_v43 }
 0x6aa   :  { %v8459_v48 = vsub.f32 %v5475_v6, %v5509_v12  ;;  %v5532_v63 = vpop.xlane.xlu1 %5531 }
 0x6ab   :  { %v5526_v19 = vmul.f32 %v8457_v25, %v8457_v25  ;;  %v5552_v60 = vmul.f32 0.03125, %v5532_v63  ;;  %v5529_v5 = vpop.xlane.xlu0 %5528 }
 0x6ac   :  { %v5525_v11 = vmul.f32 %v8459_v48, %v8459_v48  ;;  %v5551_v55 = vmul.f32 0.03125, %v5529_v5 }
 0x6ad   :  { %v5548_v28 = vsel %vm51_vm0, %v5526_v19, 0.0  ;;  %v5560_v9 = vadd.f32 1e-05, %v5552_v60 }
 0x6ae   :  { %5549 = vadd.xlane.f32.xlu1 %v5548_v28  ;;  %v5545_v52 = vsel %vm51_vm0, %v5525_v11, 0.0  ;;  %v5559_v56 = vadd.f32 1e-05, %v5551_v55 }
 0x6af   :  { %5546 = vadd.xlane.f32.xlu0 %v5545_v52  ;;  %6677 = vrsqrt.f32 %v5560_v9 }
 0x6b0   :  { %6679 = vrsqrt.f32 %v5559_v56  ;;  %v5618_v56 = vld [vmem:[%s8557_s0 + $0x38] sm:$0xff] }
 0x6b9   :  { %v6678_v8 = vpop.eup %6677 }
 0x6ba   :  { %v6680_v31 = vpop.eup %6679  ;;  %v5576_v50 = vmul.f32 %v6678_v8, %v8423_v27 }
 0x6bb   :  { %v5575_v59 = vmul.f32 %v6680_v31, %v8425_v33 }
 0x6bc   :  { %v5590_v32 = vmul.f32 %v8470_v30, %v5576_v50  ;;  %v5617_v50 = vld [vmem:[%s8557_s0 + $0x30] sm:$0xff] }
 0x6bd   :  { %v5589_v2 = vmul.f32 %v8470_v30, %v5575_v59 }
 0x6be   :  { %v5604_v37 = vadd.f32 %v8476_v13, %v5590_v32 }
 0x6bf   :  { %v5603_v1 = vadd.f32 %v8476_v13, %v5589_v2 }
 0x6c0   :  { %v5620_v27 = vadd.f32 %v5612_v20, %v5604_v37 }
 0x6c1   :  { %v5619_v42 = vadd.f32 %v5611_v29, %v5603_v1 }
 0x6c2   :  { %5628 = vst.msk [vmem:[%s8569_s12 + $0x8] sm:$0xff] %vm51_vm0, %v5620_v27 }
 0x6c3   :  { %5627 = vst.msk [vmem:[%s8569_s12] sm:$0xff] %vm51_vm0, %v5619_v42 }
 0x6e6   :  { %v5538_v33 = vpop.xlane.xlu1 %5537 }
 0x6e7   :  { %v5554_v47 = vmul.f32 0.03125, %v5538_v33  ;;  %v5535_v53 = vpop.xlane.xlu0 %5534 }
 0x6e8   :  { %v5553_v7 = vmul.f32 0.03125, %v5535_v53 }
 0x6e9   :  { %v5562_v0 = vadd.f32 1e-05, %v5554_v47 }
 0x6ea   :  { %v5561_v17 = vadd.f32 1e-05, %v5553_v7 }
 0x6eb   :  { %6681 = vrsqrt.f32 %v5562_v0 }
 0x6ec   :  { %6683 = vrsqrt.f32 %v5561_v17 }
 0x6f5   :  { %v6682_v35 = vpop.eup %6681 }
 0x6f6   :  { %v6684_v44 = vpop.eup %6683  ;;  %v5578_v6 = vmul.f32 %v6682_v35, %v8437_v36 }
 0x6f7   :  { %v5577_v54 = vmul.f32 %v6684_v44, %v8439_v26 }
 0x6f8   :  { %v5592_v21 = vmul.f32 %v8470_v30, %v5578_v6 }
 0x6f9   :  { %v5591_v61 = vmul.f32 %v8470_v30, %v5577_v54 }
 0x6fa   :  { %v5606_v58 = vadd.f32 %v8476_v13, %v5592_v21 }
 0x6fb   :  { %v5605_v18 = vadd.f32 %v8476_v13, %v5591_v61 }
 0x6fc   :  { %v5622_v46 = vadd.f32 %v5614_v16, %v5606_v58 }
 0x6fd   :  { %v5621_v4 = vadd.f32 %v5613_v45, %v5605_v18 }
 0x6fe   :  { %5630 = vst.msk [vmem:[%s8569_s12 + $0x18] sm:$0xff] %vm51_vm0, %v5622_v46 }
 0x6ff   :  { %5629 = vst.msk [vmem:[%s8569_s12 + $0x10] sm:$0xff] %vm51_vm0, %v5621_v4 }
 0x717   :  { %v5544_v36 = vpop.xlane.xlu1 %5543 }
 0x718   :  { %v5556_v26 = vmul.f32 0.03125, %v5544_v36  ;;  %v5541_v62 = vpop.xlane.xlu0 %5540 }
 0x719   :  { %v5555_v38 = vmul.f32 0.03125, %v5541_v62 }
 0x71a   :  { %v5564_v34 = vadd.f32 1e-05, %v5556_v26 }
 0x71b   :  { %v5563_v41 = vadd.f32 1e-05, %v5555_v38 }
 0x71c   :  { %6685 = vrsqrt.f32 %v5564_v34 }
 0x71d   :  { %6687 = vrsqrt.f32 %v5563_v41 }
 0x726   :  { %v6686_v39 = vpop.eup %6685 }
 0x727   :  { %v6688_v23 = vpop.eup %6687  ;;  %v5580_v3 = vmul.f32 %v6686_v39, %v8447_v51 }
 0x728   :  { %v5579_v15 = vmul.f32 %v6688_v23, %v8449_v24 }
 0x729   :  { %v5594_v49 = vmul.f32 %v8470_v30, %v5580_v3 }
 0x72a   :  { %v5593_v10 = vmul.f32 %v8470_v30, %v5579_v15 }
 0x72b   :  { %v5608_v40 = vadd.f32 %v8476_v13, %v5594_v49 }
 0x72c   :  { %v5607_v43 = vadd.f32 %v8476_v13, %v5593_v10 }
 0x72d   :  { %v5624_v22 = vadd.f32 %v5616_v57, %v5608_v40 }
 0x72e   :  { %v5623_v51 = vadd.f32 %v5615_v14, %v5607_v43 }
 0x72f   :  { %5632 = vst.msk [vmem:[%s8569_s12 + $0x28] sm:$0xff] %vm51_vm0, %v5624_v22 }
 0x730   :  { %5631 = vst.msk [vmem:[%s8569_s12 + $0x20] sm:$0xff] %vm51_vm0, %v5623_v51 }
 0x73b   :  { %v5550_v24 = vpop.xlane.xlu1 %5549 }
 0x73c   :  { %v5558_v12 = vmul.f32 0.03125, %v5550_v24  ;;  %v5547_v63 = vpop.xlane.xlu0 %5546 }
 0x73d   :  { %v5557_v19 = vmul.f32 0.03125, %v5547_v63 }
 0x73e   :  { %v5566_v60 = vadd.f32 1e-05, %v5558_v12 }
 0x73f   :  { %v5565_v5 = vadd.f32 1e-05, %v5557_v19 }
 0x740   :  { %6689 = vrsqrt.f32 %v5566_v60 }
 0x741   :  { %6691 = vrsqrt.f32 %v5565_v5 }
 0x74a   :  { %v6690_v11 = vpop.eup %6689 }
 0x74b   :  { %v6692_v55 = vpop.eup %6691  ;;  %v5582_v28 = vmul.f32 %v6690_v11, %v8457_v25 }
 0x74c   :  { %v5581_v9 = vmul.f32 %v6692_v55, %v8459_v48 }
 0x74d   :  { %v5596_v52 = vmul.f32 %v8470_v30, %v5582_v28 }
 0x74e   :  { %v5595_v8 = vmul.f32 %v8470_v30, %v5581_v9 }
 0x74f   :  { %v5610_v31 = vadd.f32 %v8476_v13, %v5596_v52 }
 0x750   :  { %v5609_v59 = vadd.f32 %v8476_v13, %v5595_v8 }
 0x751   :  { %v5626_v32 = vadd.f32 %v5618_v56, %v5610_v31 }
 0x752   :  { %v5625_v25 = vadd.f32 %v5617_v50, %v5609_v59 }
 0x753   :  { %5634 = vst.msk [vmem:[%s8569_s12 + $0x38] sm:$0xff] %vm51_vm0, %v5626_v32 }
 0x754   :  { %5633 = vst.msk [vmem:[%s8569_s12 + $0x30] sm:$0xff] %vm51_vm0, %v5625_v25 }

</bundles_post_ra>
